<compile_context>
chip_gen: v6e
topology: v6e:2x2x1
jax: 0.10.0
libtpu: 0.0.40
codegen_flags: <defaults>
</compile_context>

<pallas_src>
from collections import namedtuple

import numpy as np
import jax
import jax.numpy as jnp
from jax import lax
from jax.experimental import pallas as pl
from jax.experimental.pallas import tpu as pltpu

ModelOutput = namedtuple('ModelOutput',
                         ['vertices', 'joints', 'joints_from_verts', 'rot_mats'])

# ---- synthetic SMPL sizes (real SMPL: V=6890 -> V_pad=6912) ------------------
NUM_JOINTS = 24                          # body joints incl. root
NUM_BETAS = 10
NUM_H36M = 17
NUM_POSE_BASIS = (NUM_JOINTS - 1) * 9    # 207
NUM_BLEND = NUM_BETAS + NUM_POSE_BASIS   # 217 (fused contraction depth)
NUM_BLEND_PAD = ((NUM_BLEND + 7) // 8) * 8   # 224 (8-sublane granule)
NUM_VERTS = 128
V3 = NUM_VERTS * 3

# standard SMPL kinematic tree (first 24 joints of kintree_table[0])
PARENTS = np.array([-1, 0, 0, 0, 1, 2, 3, 4, 5, 6, 7, 8,
                    9, 9, 9, 12, 13, 14, 16, 17, 18, 19, 20, 21], dtype=np.int32)


def _round_up(x, m):
    return ((x + m - 1) // m) * m


def _pick_v_tile(v_pad, target=2048):
    """Largest multiple-of-128 divisor of v_pad that is <= target (>= 128).

    Divisor => no partial boundary blocks.  target ~2048 lanes keeps live
    temporaries (T, v_posed rows) small while amortizing per-step overhead.
    """
    best = 128
    for cand in range(128, min(v_pad, max(target, 128)) + 1, 128):
        if v_pad % cand == 0:
            best = cand
    return best


# =============================== Pallas kernel ================================

def _smpl_fused_kernel(comb_ref, w_ref, tmpl_ref, lbsw_ref, a_ref, h36m_ref,
                       verts_ref, jfv_ref):
    # comb:(B,224) f32      w:(3,224,vt) bf16     tmpl:(3,vt) f32
    # lbsw:(24,vt) f32      a:(B,16,24) f32       h36m:(17,vt) f32
    # verts:(B,3,vt) f32    jfv:(1,B,3,17) f32 (partial sum for this V tile)
    B = a_ref.shape[0]
    comb = comb_ref[...]                                   # (B, 224)
    lbsw = lbsw_ref[...]                                   # (24, vt)
    h36m = h36m_ref[...]                                   # (17, vt)

    # Fused shape + pose blend, one coordinate row at a time (lane-dense in V).
    # blend_W stays bf16 in VMEM (halved HBM stream); the VPU upcast feeds an
    # exact f32 MXU pass and is hidden behind the weight DMA.  Cast `comb` to
    # bf16 instead if the MXU ever becomes the bottleneck.
    w0 = w_ref[0].astype(jnp.float32)
    w1 = w_ref[1].astype(jnp.float32)
    w2 = w_ref[2].astype(jnp.float32)
    vx = tmpl_ref[0:1, :] + jnp.dot(comb, w0, preferred_element_type=jnp.float32)
    vy = tmpl_ref[1:2, :] + jnp.dot(comb, w1, preferred_element_type=jnp.float32)
    vz = tmpl_ref[2:3, :] + jnp.dot(comb, w2, preferred_element_type=jnp.float32)

    for b in range(B):   # B is tiny & static (2) -> cheap unroll
        # per-vertex 3x4 transform rows: T = A_T[b] @ lbs_weights^T  -> (16, vt)
        T = jnp.dot(a_ref[b], lbsw, preferred_element_type=jnp.float32)
        bx, by, bz = vx[b:b + 1], vy[b:b + 1], vz[b:b + 1]          # (1, vt)
        # write the three coordinate rows straight into the output ref
        # (no sublane-axis concatenate / relayout)
        verts_ref[b, 0:1, :] = (T[0:1] * bx + T[1:2] * by + T[2:3] * bz + T[3:4])
        verts_ref[b, 1:2, :] = (T[4:5] * bx + T[5:6] * by + T[6:7] * bz + T[7:8])
        verts_ref[b, 2:3, :] = (T[8:9] * bx + T[9:10] * by + T[10:11] * bz
                                + T[11:12])
        # partial h36m regression for this V tile: contract the lane axis of
        # (3,vt) x (17,vt) -> (3,17); tiles are summed in the wrapper so the
        # grid axis stays "parallel" (both v7x TCs usable at real size).
        jfv_ref[0, b] = lax.dot_general(
            verts_ref[b], h36m, (((1,), (1,)), ((), ())),
            preferred_element_type=jnp.float32)


def smpl_fused(combined, blend_w, v_template_3v, lbs_weights_T, A_T,
               jreg_h36m, *, v_tile=None):
    """Fused blend + LBS + partial h36m regression, tiled over vertices."""
    B, K = combined.shape
    V_pad = blend_w.shape[2]
    if v_tile is None:
        v_tile = _pick_v_tile(V_pad)
    n_vt = V_pad // v_tile

    compiler_kwargs = dict(dimension_semantics=("parallel",))
    # double-buffered per-tile footprint (bf16 blend tile dominates at real V)
    est = 2 * (3 * K * v_tile * blend_w.dtype.itemsize
               + (3 + 24 + 24 + B * 8) * v_tile * 4) + (1 << 20)
    if est > (12 << 20):                       # below every gen's scoped default
        try:
            cap = pltpu.get_tpu_info().vmem_capacity_bytes // 2   # <=50% physical
        except Exception:                      # pragma: no cover - conservative
            cap = 32 << 20
        compiler_kwargs["vmem_limit_bytes"] = int(min(est + (4 << 20), cap))

    return pl.pallas_call(
        _smpl_fused_kernel,
        out_shape=(jax.ShapeDtypeStruct((B, 3, V_pad), jnp.float32),
                   jax.ShapeDtypeStruct((n_vt, B, 3, NUM_H36M), jnp.float32)),
        grid=(n_vt,),
        in_specs=[
            pl.BlockSpec((B, K), lambda v: (0, 0)),                    # resident
            pl.BlockSpec((3, K, v_tile), lambda v: (0, 0, v)),         # bf16 stream
            pl.BlockSpec((3, v_tile), lambda v: (0, v)),
            pl.BlockSpec((NUM_JOINTS, v_tile), lambda v: (0, v)),
            pl.BlockSpec((B, 16, NUM_JOINTS), lambda v: (0, 0, 0)),    # resident
            pl.BlockSpec((NUM_H36M, v_tile), lambda v: (0, v)),
        ],
        out_specs=(
            pl.BlockSpec((B, 3, v_tile), lambda v: (0, 0, v)),
            pl.BlockSpec((1, B, 3, NUM_H36M), lambda v: (v, 0, 0, 0)),
        ),
        compiler_params=pltpu.CompilerParams(**compiler_kwargs),
    )(combined, blend_w, v_template_3v, lbs_weights_T, A_T, jreg_h36m)


# ================================ JAX glue ====================================

def batch_rodrigues(rot_vecs):
    # rot_vecs: (N, 3) axis-angle -> (N, 3, 3) rotation matrices
    N = rot_vecs.shape[0]
    angle = jnp.linalg.norm(rot_vecs + 1e-8, axis=1, keepdims=True)  # (N,1)
    rot_dir = rot_vecs / angle
    cos = jnp.cos(angle)[:, None, :]
    sin = jnp.sin(angle)[:, None, :]
    rx, ry, rz = rot_dir[:, 0:1], rot_dir[:, 1:2], rot_dir[:, 2:3]
    zeros = jnp.zeros((N, 1), dtype=rot_vecs.dtype)
    K = jnp.concatenate([zeros, -rz, ry, rz, zeros, -rx, -ry, rx, zeros],
                        axis=1).reshape(N, 3, 3)
    ident = jnp.eye(3, dtype=rot_vecs.dtype)[None]
    return ident + sin * K + (1.0 - cos) * jnp.matmul(K, K)


def transform_mat(R, t):
    # R: (N,3,3), t: (N,3,1) -> (N,4,4)
    N = R.shape[0]
    R4 = jnp.concatenate([R, jnp.zeros((N, 1, 3), R.dtype)], axis=1)
    t4 = jnp.concatenate([t, jnp.ones((N, 1, 1), t.dtype)], axis=1)
    return jnp.concatenate([R4, t4], axis=2)


def batch_rigid_transform(rot_mats, joints, parents):
    # rot_mats: (B,J,3,3), joints: (B,J,3)
    B, J = joints.shape[0], joints.shape[1]
    joints = joints[..., None]                                       # (B,J,3,1)
    rel_joints = joints.at[:, 1:].set(joints[:, 1:] - joints[:, parents[1:]])
    transforms_mat = transform_mat(rot_mats.reshape(-1, 3, 3),
                                   rel_joints.reshape(-1, 3, 1)).reshape(B, J, 4, 4)
    chain = [transforms_mat[:, 0]]
    for i in range(1, J):
        chain.append(jnp.matmul(chain[int(parents[i])], transforms_mat[:, i]))
    transforms = jnp.stack(chain, axis=1)                            # (B,J,4,4)
    posed_joints = transforms[:, :, :3, 3]
    joints_homogen = jnp.concatenate(
        [joints, jnp.zeros((B, J, 1, 1), joints.dtype)], axis=2)     # (B,J,4,1)
    tj = jnp.matmul(transforms, joints_homogen)                      # (B,J,4,1)
    rel_transforms = transforms - jnp.concatenate(
        [jnp.zeros((B, J, 4, 3), transforms.dtype), tj], axis=3)
    return posed_joints, rel_transforms


def smpl_forward(params, pose_axis_angle, betas, global_orient, transl=None):
    """Mirrors SMPL_layer.forward (pose2rot=True)."""
    B = betas.shape[0]
    full_pose = jnp.concatenate([global_orient, pose_axis_angle], axis=1)  # (B,72)
    rot_mats = batch_rodrigues(full_pose.reshape(-1, 3)).reshape(B, NUM_JOINTS, 3, 3)
    ident = jnp.eye(3, dtype=jnp.float32)
    pose_feature = (rot_mats[:, 1:] - ident).reshape(B, NUM_POSE_BASIS)    # (B,207)

    # zero-pad the contraction K from 217 to 224 (8-sublane granule)
    combined = jnp.concatenate(
        [betas, pose_feature,
         jnp.zeros((B, NUM_BLEND_PAD - NUM_BLEND), jnp.float32)], axis=1)  # (B,224)

    # joint regression folded into tiny weights at init -> (B,10)@(10,72)
    J = params['J_template'][None] + jnp.matmul(
        betas, params['J_shapedirs']).reshape(B, NUM_JOINTS, 3)

    # kinematic chain (24 joints, sequential, tiny) in JAX glue
    J_transformed, A = batch_rigid_transform(rot_mats, J, PARENTS)
    A_T = jnp.transpose(A.reshape(B, NUM_JOINTS, 16), (0, 2, 1))           # (B,16,24)

    # ---- fused Pallas kernel: blend + LBS + partial h36m regression ----
    verts_cm, jfv_parts = smpl_fused(
        combined, params['blend_W'], params['v_template_3v'],
        params['lbs_weights_T'], A_T, params['jreg_h36m'])

    vertices = jnp.transpose(verts_cm[:, :, :NUM_VERTS], (0, 2, 1))        # (B,V,3)
    joints_from_verts = jnp.transpose(jfv_parts.sum(axis=0), (0, 2, 1))    # (B,17,3)
    joints = J_transformed

    if transl is not None:
        vertices = vertices + transl[:, None, :]
        joints = joints + transl[:, None, :]
        joints_from_verts = joints_from_verts + transl[:, None, :]
    else:
        vertices = vertices - joints_from_verts[:, 0:1, :]
        joints = joints - joints[:, 0:1, :]
        joints_from_verts = joints_from_verts - joints_from_verts[:, 0:1, :]

    return ModelOutput(vertices=vertices, joints=joints,
                       joints_from_verts=joints_from_verts, rot_mats=rot_mats)


# -------- pure-JAX reference (for verification only) --------
def smpl_forward_ref(p, pose_axis_angle, betas, global_orient):
    B = betas.shape[0]
    full_pose = jnp.concatenate([global_orient, pose_axis_angle], axis=1)
    rot_mats = batch_rodrigues(full_pose.reshape(-1, 3)).reshape(B, NUM_JOINTS, 3, 3)
    v_shaped = p['v_template'][None] + jnp.einsum('bl,vkl->bvk', betas, p['shapedirs'])
    J = jnp.einsum('jv,bvk->bjk', p['J_regressor'], v_shaped)
    pose_feature = (rot_mats[:, 1:] - jnp.eye(3, dtype=jnp.float32)).reshape(B, -1)
    pose_offsets = jnp.matmul(pose_feature, p['posedirs']).reshape(B, NUM_VERTS, 3)
    v_posed = v_shaped + pose_offsets
    J_transformed, A = batch_rigid_transform(rot_mats, J, PARENTS)
    T = jnp.einsum('vj,bjmn->bvmn', p['lbs_weights'], A)
    v_posed_h = jnp.concatenate(
        [v_posed, jnp.ones((B, NUM_VERTS, 1), jnp.float32)], axis=2)
    verts = jnp.matmul(T, v_posed_h[..., None])[:, :, :3, 0]
    jfv = jnp.einsum('jv,bvk->bjk', p['J_regressor_h36m'], verts)
    vertices = verts - jfv[:, 0:1, :]
    joints = J_transformed - J_transformed[:, 0:1, :]
    jfv = jfv - jfv[:, 0:1, :]
    return vertices, joints, jfv, rot_mats


# =================================== main =====================================

if __name__ == "__main__":
    # full-f32 matmul precision so the XLA reference matches the exact-f32
    # Pallas MXU matmuls at tight tolerance
    jax.config.update("jax_default_matmul_precision", "highest")

    key = jax.random.PRNGKey(0)
    ks = jax.random.split(key, 10)
    B = 2
    V = NUM_VERTS
    V_pad = _round_up(V, 128)          # toy V=128 is already lane-aligned

    # deterministic synthetic SMPL parameters (shapes per SMPL_layer.__init__)
    # TODO(synk): real model loads v_template/shapedirs/... from a pickled .pkl;
    #             replaced here with deterministic random tensors of same shapes.
    v_template = jax.random.normal(ks[0], (V, 3), jnp.float32) * 0.1
    shapedirs = jax.random.normal(ks[1], (V, 3, NUM_BETAS), jnp.float32) * 0.01
    posedirs = jax.random.normal(ks[2], (NUM_POSE_BASIS, V3), jnp.float32) * 0.01
    J_regressor = jax.nn.softmax(
        jax.random.normal(ks[3], (NUM_JOINTS, V), jnp.float32), axis=-1)
    J_regressor_h36m = jax.nn.softmax(
        jax.random.normal(ks[4], (NUM_H36M, V), jnp.float32), axis=-1)
    lbs_weights = jax.nn.softmax(
        jax.random.normal(ks[5], (V, NUM_JOINTS), jnp.float32) * 2.0, axis=-1)

    # ---- precomputed, layout-optimized parameters (done once at init) ----
    # bf16-round the big blend weights ONCE; kernel params AND the reference
    # use the rounded values, so the layout/kernel math is checked tightly.
    shapedirs_r = shapedirs.astype(jnp.bfloat16).astype(jnp.float32)
    posedirs_r = posedirs.astype(jnp.bfloat16).astype(jnp.float32)

    # (3, 224, V_pad) coordinate-major, lane-dense blend weights: [S | P | 0]
    sd_cm = jnp.transpose(shapedirs_r, (1, 2, 0))                        # (3,10,V)
    pd_cm = jnp.transpose(posedirs_r.reshape(NUM_POSE_BASIS, V, 3),
                          (2, 0, 1))                                     # (3,207,V)
    blend_W = jnp.concatenate(
        [sd_cm, pd_cm,
         jnp.zeros((3, NUM_BLEND_PAD - NUM_BLEND, V), jnp.float32)], axis=1)
    blend_W = jnp.pad(blend_W, ((0, 0), (0, 0), (0, V_pad - V))
                      ).astype(jnp.bfloat16)                             # (3,224,Vp)

    params = {
        'blend_W': blend_W,                                              # bf16
        'v_template_3v': jnp.pad(v_template.T, ((0, 0), (0, V_pad - V))),  # (3,Vp)
        'lbs_weights_T': jnp.pad(lbs_weights.T, ((0, 0), (0, V_pad - V))),  # (24,Vp)
        'jreg_h36m': jnp.pad(J_regressor_h36m, ((0, 0), (0, V_pad - V))),   # (17,Vp)
        'J_template': jnp.matmul(J_regressor, v_template),               # (24,3)
        'J_shapedirs': jnp.einsum('jv,vkl->jkl', J_regressor, shapedirs_r
                                  ).reshape(NUM_JOINTS * 3, NUM_BETAS).T,  # (10,72)
    }

    betas = jax.random.normal(ks[6], (B, NUM_BETAS), jnp.float32) * 0.5
    pose_axis_angle = jax.random.normal(ks[7], (B, (NUM_JOINTS - 1) * 3),
                                        jnp.float32) * 0.2
    global_orient = jax.random.normal(ks[8], (B, 3), jnp.float32) * 0.2

    fwd = jax.jit(smpl_forward)
    out = fwd(params, pose_axis_angle, betas, global_orient)
    jax.block_until_ready(out.vertices)
    jax.block_until_ready(out.joints)
    jax.block_until_ready(out.joints_from_verts)

    # verify against a pure-JAX reference of the same lbs math (same bf16-
    # rounded blend weights, f32 everywhere else)
    params_raw = dict(v_template=v_template, shapedirs=shapedirs_r,
                      posedirs=posedirs_r, J_regressor=J_regressor,
                      J_regressor_h36m=J_regressor_h36m, lbs_weights=lbs_weights)
    rv, rj, rjv, rrm = smpl_forward_ref(params_raw, pose_axis_angle, betas,
                                        global_orient)
    assert out.vertices.shape == (B, V, 3)
    assert out.joints.shape == (B, NUM_JOINTS, 3)
    assert out.joints_from_verts.shape == (B, NUM_H36M, 3)
    assert out.rot_mats.shape == (B, NUM_JOINTS, 3, 3)
    assert jnp.allclose(out.vertices, rv, atol=1e-4, rtol=1e-3)
    assert jnp.allclose(out.joints, rj, atol=1e-4, rtol=1e-3)
    assert jnp.allclose(out.joints_from_verts, rjv, atol=1e-4, rtol=1e-3)
    assert jnp.allclose(out.rot_mats, rrm, atol=1e-6, rtol=1e-5)

    print("KERNEL_OK")
</pallas_src>

<mosaic_0001>
module attributes {stable_mosaic.version = 11 : i64} {
  func.func @_smpl_fused_kernel(%arg0: i32, %arg1: memref<2x224xf32, #tpu.memory_space<vmem>>, %arg2: memref<3x224x128xbf16, #tpu.memory_space<vmem>>, %arg3: memref<3x128xf32, #tpu.memory_space<vmem>>, %arg4: memref<24x128xf32, #tpu.memory_space<vmem>>, %arg5: memref<2x16x24xf32, #tpu.memory_space<vmem>>, %arg6: memref<17x128xf32, #tpu.memory_space<vmem>>, %arg7: memref<2x3x128xf32, #tpu.memory_space<vmem>>, %arg8: memref<1x2x3x17xf32, #tpu.memory_space<vmem>>) attributes {dimension_semantics = [#tpu.dimension_semantics<parallel>], iteration_bounds = array<i64: 1>, scalar_prefetch = 0 : i64, scratch_operands = 0 : i64, tpu.core_type = #tpu.core_type<tc>, window_params = [{pipeline_mode = #tpu.pipeline_mode<synchronous>, transform_indices = @transform_0, window_bounds = array<i64: 2, 224>}, {transform_indices = @transform_1, window_bounds = array<i64: 3, 224, 128>}, {transform_indices = @transform_2, window_bounds = array<i64: 3, 128>}, {transform_indices = @transform_3, window_bounds = array<i64: 24, 128>}, {pipeline_mode = #tpu.pipeline_mode<synchronous>, transform_indices = @transform_4, window_bounds = array<i64: 2, 16, 24>}, {transform_indices = @transform_5, window_bounds = array<i64: 17, 128>}, {transform_indices = @transform_6, window_bounds = array<i64: 2, 3, 128>}, {transform_indices = @transform_7, window_bounds = array<i64: 1, 2, 3, 17>}]} {
    %c0 = arith.constant 0 : index
    %c0_0 = arith.constant 0 : index
    %0 = vector.load %arg1[%c0, %c0_0] : memref<2x224xf32, #tpu.memory_space<vmem>>, vector<2x224xf32>
    %c0_1 = arith.constant 0 : index
    %c0_2 = arith.constant 0 : index
    %1 = vector.load %arg4[%c0_1, %c0_2] : memref<24x128xf32, #tpu.memory_space<vmem>>, vector<24x128xf32>
    %c0_3 = arith.constant 0 : index
    %c0_4 = arith.constant 0 : index
    %2 = vector.load %arg6[%c0_3, %c0_4] : memref<17x128xf32, #tpu.memory_space<vmem>>, vector<17x128xf32>
    %c0_5 = arith.constant 0 : index
    %c0_6 = arith.constant 0 : index
    %c0_7 = arith.constant 0 : index
    %3 = vector.load %arg2[%c0_5, %c0_6, %c0_7] : memref<3x224x128xbf16, #tpu.memory_space<vmem>>, vector<1x224x128xbf16>
    %4 = vector.shape_cast %3 : vector<1x224x128xbf16> to vector<224x128xbf16>
    %5 = arith.extf %4 : vector<224x128xbf16> to vector<224x128xf32>
    %c1 = arith.constant 1 : index
    %c0_8 = arith.constant 0 : index
    %c0_9 = arith.constant 0 : index
    %6 = vector.load %arg2[%c1, %c0_8, %c0_9] : memref<3x224x128xbf16, #tpu.memory_space<vmem>>, vector<1x224x128xbf16>
    %7 = vector.shape_cast %6 : vector<1x224x128xbf16> to vector<224x128xbf16>
    %8 = arith.extf %7 : vector<224x128xbf16> to vector<224x128xf32>
    %c2 = arith.constant 2 : index
    %c0_10 = arith.constant 0 : index
    %c0_11 = arith.constant 0 : index
    %9 = vector.load %arg2[%c2, %c0_10, %c0_11] : memref<3x224x128xbf16, #tpu.memory_space<vmem>>, vector<1x224x128xbf16>
    %10 = vector.shape_cast %9 : vector<1x224x128xbf16> to vector<224x128xbf16>
    %11 = arith.extf %10 : vector<224x128xbf16> to vector<224x128xf32>
    %c0_12 = arith.constant 0 : index
    %c0_13 = arith.constant 0 : index
    %12 = vector.load %arg3[%c0_12, %c0_13] : memref<3x128xf32, #tpu.memory_space<vmem>>, vector<1x128xf32>
    %cst = arith.constant dense<0.000000e+00> : vector<2x128xf32>
    %13 = tpu.matmul %0, %5, %cst {dimension_numbers = #tpu.dot_dimension_numbers<[1], [0], [0], [1], [0, 0, 1, 1], [], []>, precision = #tpu.contract_precision<fp32>} : vector<2x224xf32>, vector<224x128xf32>, vector<2x128xf32> -> vector<2x128xf32>
    %14 = vector.broadcast %12 : vector<1x128xf32> to vector<2x128xf32>
    %15 = arith.addf %14, %13 : vector<2x128xf32>
    %c1_14 = arith.constant 1 : index
    %c0_15 = arith.constant 0 : index
    %16 = vector.load %arg3[%c1_14, %c0_15] : memref<3x128xf32, #tpu.memory_space<vmem>>, vector<1x128xf32>
    %cst_16 = arith.constant dense<0.000000e+00> : vector<2x128xf32>
    %17 = tpu.matmul %0, %8, %cst_16 {dimension_numbers = #tpu.dot_dimension_numbers<[1], [0], [0], [1], [0, 0, 1, 1], [], []>, precision = #tpu.contract_precision<fp32>} : vector<2x224xf32>, vector<224x128xf32>, vector<2x128xf32> -> vector<2x128xf32>
    %18 = vector.broadcast %16 : vector<1x128xf32> to vector<2x128xf32>
    %19 = arith.addf %18, %17 : vector<2x128xf32>
    %c2_17 = arith.constant 2 : index
    %c0_18 = arith.constant 0 : index
    %20 = vector.load %arg3[%c2_17, %c0_18] : memref<3x128xf32, #tpu.memory_space<vmem>>, vector<1x128xf32>
    %cst_19 = arith.constant dense<0.000000e+00> : vector<2x128xf32>
    %21 = tpu.matmul %0, %11, %cst_19 {dimension_numbers = #tpu.dot_dimension_numbers<[1], [0], [0], [1], [0, 0, 1, 1], [], []>, precision = #tpu.contract_precision<fp32>} : vector<2x224xf32>, vector<224x128xf32>, vector<2x128xf32> -> vector<2x128xf32>
    %22 = vector.broadcast %20 : vector<1x128xf32> to vector<2x128xf32>
    %23 = arith.addf %22, %21 : vector<2x128xf32>
    %c0_20 = arith.constant 0 : index
    %c0_21 = arith.constant 0 : index
    %c0_22 = arith.constant 0 : index
    %24 = vector.load %arg5[%c0_20, %c0_21, %c0_22] : memref<2x16x24xf32, #tpu.memory_space<vmem>>, vector<1x16x24xf32>
    %25 = vector.shape_cast %24 : vector<1x16x24xf32> to vector<16x24xf32>
    %cst_23 = arith.constant dense<0.000000e+00> : vector<16x128xf32>
    %26 = tpu.matmul %25, %1, %cst_23 {dimension_numbers = #tpu.dot_dimension_numbers<[1], [0], [0], [1], [0, 0, 1, 1], [], []>, precision = #tpu.contract_precision<fp32>} : vector<16x24xf32>, vector<24x128xf32>, vector<16x128xf32> -> vector<16x128xf32>
    %27 = vector.extract_strided_slice %15 {offsets = [0, 0], sizes = [1, 128], strides = [1, 1]} : vector<2x128xf32> to vector<1x128xf32>
    %28 = vector.extract_strided_slice %19 {offsets = [0, 0], sizes = [1, 128], strides = [1, 1]} : vector<2x128xf32> to vector<1x128xf32>
    %29 = vector.extract_strided_slice %23 {offsets = [0, 0], sizes = [1, 128], strides = [1, 1]} : vector<2x128xf32> to vector<1x128xf32>
    %30 = vector.extract_strided_slice %26 {offsets = [0, 0], sizes = [1, 128], strides = [1, 1]} : vector<16x128xf32> to vector<1x128xf32>
    %31 = arith.mulf %30, %27 : vector<1x128xf32>
    %32 = vector.extract_strided_slice %26 {offsets = [1, 0], sizes = [1, 128], strides = [1, 1]} : vector<16x128xf32> to vector<1x128xf32>
    %33 = arith.mulf %32, %28 : vector<1x128xf32>
    %34 = arith.addf %31, %33 : vector<1x128xf32>
    %35 = vector.extract_strided_slice %26 {offsets = [2, 0], sizes = [1, 128], strides = [1, 1]} : vector<16x128xf32> to vector<1x128xf32>
    %36 = arith.mulf %35, %29 : vector<1x128xf32>
    %37 = arith.addf %34, %36 : vector<1x128xf32>
    %38 = vector.extract_strided_slice %26 {offsets = [3, 0], sizes = [1, 128], strides = [1, 1]} : vector<16x128xf32> to vector<1x128xf32>
    %39 = arith.addf %37, %38 : vector<1x128xf32>
    %c0_24 = arith.constant 0 : index
    %c0_25 = arith.constant 0 : index
    %c0_26 = arith.constant 0 : index
    %40 = vector.load %arg7[%c0_24, %c0_25, %c0_26] : memref<2x3x128xf32, #tpu.memory_space<vmem>>, vector<1x1x128xf32>
    %41 = vector.shape_cast %40 : vector<1x1x128xf32> to vector<1x128xf32>
    %42 = vector.shape_cast %39 : vector<1x128xf32> to vector<1x1x128xf32>
    tpu.vector_store %arg7[%c0_24, %c0_25, %c0_26], %42 {strides = array<i32>} : memref<2x3x128xf32, #tpu.memory_space<vmem>>, vector<1x1x128xf32>,
    %43 = vector.extract_strided_slice %26 {offsets = [4, 0], sizes = [1, 128], strides = [1, 1]} : vector<16x128xf32> to vector<1x128xf32>
    %44 = arith.mulf %43, %27 : vector<1x128xf32>
    %45 = vector.extract_strided_slice %26 {offsets = [5, 0], sizes = [1, 128], strides = [1, 1]} : vector<16x128xf32> to vector<1x128xf32>
    %46 = arith.mulf %45, %28 : vector<1x128xf32>
    %47 = arith.addf %44, %46 : vector<1x128xf32>
    %48 = vector.extract_strided_slice %26 {offsets = [6, 0], sizes = [1, 128], strides = [1, 1]} : vector<16x128xf32> to vector<1x128xf32>
    %49 = arith.mulf %48, %29 : vector<1x128xf32>
    %50 = arith.addf %47, %49 : vector<1x128xf32>
    %51 = vector.extract_strided_slice %26 {offsets = [7, 0], sizes = [1, 128], strides = [1, 1]} : vector<16x128xf32> to vector<1x128xf32>
    %52 = arith.addf %50, %51 : vector<1x128xf32>
    %c0_27 = arith.constant 0 : index
    %c1_28 = arith.constant 1 : index
    %c0_29 = arith.constant 0 : index
    %53 = vector.load %arg7[%c0_27, %c1_28, %c0_29] : memref<2x3x128xf32, #tpu.memory_space<vmem>>, vector<1x1x128xf32>
    %54 = vector.shape_cast %53 : vector<1x1x128xf32> to vector<1x128xf32>
    %55 = vector.shape_cast %52 : vector<1x128xf32> to vector<1x1x128xf32>
    tpu.vector_store %arg7[%c0_27, %c1_28, %c0_29], %55 {strides = array<i32>} : memref<2x3x128xf32, #tpu.memory_space<vmem>>, vector<1x1x128xf32>,
    %56 = vector.extract_strided_slice %26 {offsets = [8, 0], sizes = [1, 128], strides = [1, 1]} : vector<16x128xf32> to vector<1x128xf32>
    %57 = arith.mulf %56, %27 : vector<1x128xf32>
    %58 = vector.extract_strided_slice %26 {offsets = [9, 0], sizes = [1, 128], strides = [1, 1]} : vector<16x128xf32> to vector<1x128xf32>
    %59 = arith.mulf %58, %28 : vector<1x128xf32>
    %60 = arith.addf %57, %59 : vector<1x128xf32>
    %61 = vector.extract_strided_slice %26 {offsets = [10, 0], sizes = [1, 128], strides = [1, 1]} : vector<16x128xf32> to vector<1x128xf32>
    %62 = arith.mulf %61, %29 : vector<1x128xf32>
    %63 = arith.addf %60, %62 : vector<1x128xf32>
    %64 = vector.extract_strided_slice %26 {offsets = [11, 0], sizes = [1, 128], strides = [1, 1]} : vector<16x128xf32> to vector<1x128xf32>
    %65 = arith.addf %63, %64 : vector<1x128xf32>
    %c0_30 = arith.constant 0 : index
    %c2_31 = arith.constant 2 : index
    %c0_32 = arith.constant 0 : index
    %66 = vector.load %arg7[%c0_30, %c2_31, %c0_32] : memref<2x3x128xf32, #tpu.memory_space<vmem>>, vector<1x1x128xf32>
    %67 = vector.shape_cast %66 : vector<1x1x128xf32> to vector<1x128xf32>
    %68 = vector.shape_cast %65 : vector<1x128xf32> to vector<1x1x128xf32>
    tpu.vector_store %arg7[%c0_30, %c2_31, %c0_32], %68 {strides = array<i32>} : memref<2x3x128xf32, #tpu.memory_space<vmem>>, vector<1x1x128xf32>,
    %c0_33 = arith.constant 0 : index
    %c0_34 = arith.constant 0 : index
    %c0_35 = arith.constant 0 : index
    %69 = vector.load %arg7[%c0_33, %c0_34, %c0_35] : memref<2x3x128xf32, #tpu.memory_space<vmem>>, vector<1x3x128xf32>
    %70 = vector.shape_cast %69 : vector<1x3x128xf32> to vector<3x128xf32>
    %cst_36 = arith.constant dense<0.000000e+00> : vector<3x17xf32>
    %71 = tpu.matmul %70, %2, %cst_36 {dimension_numbers = #tpu.dot_dimension_numbers<[1], [1], [0], [0], [0, 0, 1, 0], [], []>, precision = #tpu.contract_precision<fp32>} : vector<3x128xf32>, vector<17x128xf32>, vector<3x17xf32> -> vector<3x17xf32>
    %c0_37 = arith.constant 0 : index
    %c0_38 = arith.constant 0 : index
    %c0_39 = arith.constant 0 : index
    %c0_40 = arith.constant 0 : index
    %72 = vector.load %arg8[%c0_37, %c0_38, %c0_39, %c0_40] : memref<1x2x3x17xf32, #tpu.memory_space<vmem>>, vector<1x1x3x17xf32>
    %73 = vector.shape_cast %72 : vector<1x1x3x17xf32> to vector<3x17xf32>
    %74 = vector.shape_cast %71 : vector<3x17xf32> to vector<1x1x3x17xf32>
    tpu.vector_store %arg8[%c0_37, %c0_38, %c0_39, %c0_40], %74 {strides = array<i32>} : memref<1x2x3x17xf32, #tpu.memory_space<vmem>>, vector<1x1x3x17xf32>,
    %c1_41 = arith.constant 1 : index
    %c0_42 = arith.constant 0 : index
    %c0_43 = arith.constant 0 : index
    %75 = vector.load %arg5[%c1_41, %c0_42, %c0_43] : memref<2x16x24xf32, #tpu.memory_space<vmem>>, vector<1x16x24xf32>
    %76 = vector.shape_cast %75 : vector<1x16x24xf32> to vector<16x24xf32>
    %cst_44 = arith.constant dense<0.000000e+00> : vector<16x128xf32>
    %77 = tpu.matmul %76, %1, %cst_44 {dimension_numbers = #tpu.dot_dimension_numbers<[1], [0], [0], [1], [0, 0, 1, 1], [], []>, precision = #tpu.contract_precision<fp32>} : vector<16x24xf32>, vector<24x128xf32>, vector<16x128xf32> -> vector<16x128xf32>
    %78 = vector.extract_strided_slice %15 {offsets = [1, 0], sizes = [1, 128], strides = [1, 1]} : vector<2x128xf32> to vector<1x128xf32>
    %79 = vector.extract_strided_slice %19 {offsets = [1, 0], sizes = [1, 128], strides = [1, 1]} : vector<2x128xf32> to vector<1x128xf32>
    %80 = vector.extract_strided_slice %23 {offsets = [1, 0], sizes = [1, 128], strides = [1, 1]} : vector<2x128xf32> to vector<1x128xf32>
    %81 = vector.extract_strided_slice %77 {offsets = [0, 0], sizes = [1, 128], strides = [1, 1]} : vector<16x128xf32> to vector<1x128xf32>
    %82 = arith.mulf %81, %78 : vector<1x128xf32>
    %83 = vector.extract_strided_slice %77 {offsets = [1, 0], sizes = [1, 128], strides = [1, 1]} : vector<16x128xf32> to vector<1x128xf32>
    %84 = arith.mulf %83, %79 : vector<1x128xf32>
    %85 = arith.addf %82, %84 : vector<1x128xf32>
    %86 = vector.extract_strided_slice %77 {offsets = [2, 0], sizes = [1, 128], strides = [1, 1]} : vector<16x128xf32> to vector<1x128xf32>
    %87 = arith.mulf %86, %80 : vector<1x128xf32>
    %88 = arith.addf %85, %87 : vector<1x128xf32>
    %89 = vector.extract_strided_slice %77 {offsets = [3, 0], sizes = [1, 128], strides = [1, 1]} : vector<16x128xf32> to vector<1x128xf32>
    %90 = arith.addf %88, %89 : vector<1x128xf32>
    %c1_45 = arith.constant 1 : index
    %c0_46 = arith.constant 0 : index
    %c0_47 = arith.constant 0 : index
    %91 = vector.load %arg7[%c1_45, %c0_46, %c0_47] : memref<2x3x128xf32, #tpu.memory_space<vmem>>, vector<1x1x128xf32>
    %92 = vector.shape_cast %91 : vector<1x1x128xf32> to vector<1x128xf32>
    %93 = vector.shape_cast %90 : vector<1x128xf32> to vector<1x1x128xf32>
    tpu.vector_store %arg7[%c1_45, %c0_46, %c0_47], %93 {strides = array<i32>} : memref<2x3x128xf32, #tpu.memory_space<vmem>>, vector<1x1x128xf32>,
    %94 = vector.extract_strided_slice %77 {offsets = [4, 0], sizes = [1, 128], strides = [1, 1]} : vector<16x128xf32> to vector<1x128xf32>
    %95 = arith.mulf %94, %78 : vector<1x128xf32>
    %96 = vector.extract_strided_slice %77 {offsets = [5, 0], sizes = [1, 128], strides = [1, 1]} : vector<16x128xf32> to vector<1x128xf32>
    %97 = arith.mulf %96, %79 : vector<1x128xf32>
    %98 = arith.addf %95, %97 : vector<1x128xf32>
    %99 = vector.extract_strided_slice %77 {offsets = [6, 0], sizes = [1, 128], strides = [1, 1]} : vector<16x128xf32> to vector<1x128xf32>
    %100 = arith.mulf %99, %80 : vector<1x128xf32>
    %101 = arith.addf %98, %100 : vector<1x128xf32>
    %102 = vector.extract_strided_slice %77 {offsets = [7, 0], sizes = [1, 128], strides = [1, 1]} : vector<16x128xf32> to vector<1x128xf32>
    %103 = arith.addf %101, %102 : vector<1x128xf32>
    %c1_48 = arith.constant 1 : index
    %c1_49 = arith.constant 1 : index
    %c0_50 = arith.constant 0 : index
    %104 = vector.load %arg7[%c1_48, %c1_49, %c0_50] : memref<2x3x128xf32, #tpu.memory_space<vmem>>, vector<1x1x128xf32>
    %105 = vector.shape_cast %104 : vector<1x1x128xf32> to vector<1x128xf32>
    %106 = vector.shape_cast %103 : vector<1x128xf32> to vector<1x1x128xf32>
    tpu.vector_store %arg7[%c1_48, %c1_49, %c0_50], %106 {strides = array<i32>} : memref<2x3x128xf32, #tpu.memory_space<vmem>>, vector<1x1x128xf32>,
    %107 = vector.extract_strided_slice %77 {offsets = [8, 0], sizes = [1, 128], strides = [1, 1]} : vector<16x128xf32> to vector<1x128xf32>
    %108 = arith.mulf %107, %78 : vector<1x128xf32>
    %109 = vector.extract_strided_slice %77 {offsets = [9, 0], sizes = [1, 128], strides = [1, 1]} : vector<16x128xf32> to vector<1x128xf32>
    %110 = arith.mulf %109, %79 : vector<1x128xf32>
    %111 = arith.addf %108, %110 : vector<1x128xf32>
    %112 = vector.extract_strided_slice %77 {offsets = [10, 0], sizes = [1, 128], strides = [1, 1]} : vector<16x128xf32> to vector<1x128xf32>
    %113 = arith.mulf %112, %80 : vector<1x128xf32>
    %114 = arith.addf %111, %113 : vector<1x128xf32>
    %115 = vector.extract_strided_slice %77 {offsets = [11, 0], sizes = [1, 128], strides = [1, 1]} : vector<16x128xf32> to vector<1x128xf32>
    %116 = arith.addf %114, %115 : vector<1x128xf32>
    %c1_51 = arith.constant 1 : index
    %c2_52 = arith.constant 2 : index
    %c0_53 = arith.constant 0 : index
    %117 = vector.load %arg7[%c1_51, %c2_52, %c0_53] : memref<2x3x128xf32, #tpu.memory_space<vmem>>, vector<1x1x128xf32>
    %118 = vector.shape_cast %117 : vector<1x1x128xf32> to vector<1x128xf32>
    %119 = vector.shape_cast %116 : vector<1x128xf32> to vector<1x1x128xf32>
    tpu.vector_store %arg7[%c1_51, %c2_52, %c0_53], %119 {strides = array<i32>} : memref<2x3x128xf32, #tpu.memory_space<vmem>>, vector<1x1x128xf32>,
    %c1_54 = arith.constant 1 : index
    %c0_55 = arith.constant 0 : index
    %c0_56 = arith.constant 0 : index
    %120 = vector.load %arg7[%c1_54, %c0_55, %c0_56] : memref<2x3x128xf32, #tpu.memory_space<vmem>>, vector<1x3x128xf32>
    %121 = vector.shape_cast %120 : vector<1x3x128xf32> to vector<3x128xf32>
    %cst_57 = arith.constant dense<0.000000e+00> : vector<3x17xf32>
    %122 = tpu.matmul %121, %2, %cst_57 {dimension_numbers = #tpu.dot_dimension_numbers<[1], [1], [0], [0], [0, 0, 1, 0], [], []>, precision = #tpu.contract_precision<fp32>} : vector<3x128xf32>, vector<17x128xf32>, vector<3x17xf32> -> vector<3x17xf32>
    %c0_58 = arith.constant 0 : index
    %c1_59 = arith.constant 1 : index
    %c0_60 = arith.constant 0 : index
    %c0_61 = arith.constant 0 : index
    %123 = vector.load %arg8[%c0_58, %c1_59, %c0_60, %c0_61] : memref<1x2x3x17xf32, #tpu.memory_space<vmem>>, vector<1x1x3x17xf32>
    %124 = vector.shape_cast %123 : vector<1x1x3x17xf32> to vector<3x17xf32>
    %125 = vector.shape_cast %122 : vector<3x17xf32> to vector<1x1x3x17xf32>
    tpu.vector_store %arg8[%c0_58, %c1_59, %c0_60, %c0_61], %125 {strides = array<i32>} : memref<1x2x3x17xf32, #tpu.memory_space<vmem>>, vector<1x1x3x17xf32>,
    return
  }
  func.func @transform_0(%arg0: i32) -> (i32, i32) {
    %c0_i32 = arith.constant 0 : i32
    %c0_i32_0 = arith.constant 0 : i32
    %c0_i32_1 = arith.constant 0 : i32
    return %c0_i32, %c0_i32_0 : i32, i32
  }
  func.func @transform_1(%arg0: i32) -> (i32, i32, i32) {
    %c0_i32 = arith.constant 0 : i32
    %c0_i32_0 = arith.constant 0 : i32
    %c0_i32_1 = arith.constant 0 : i32
    return %c0_i32, %c0_i32_0, %arg0 : i32, i32, i32
  }
  func.func @transform_2(%arg0: i32) -> (i32, i32) {
    %c0_i32 = arith.constant 0 : i32
    %c0_i32_0 = arith.constant 0 : i32
    return %c0_i32, %arg0 : i32, i32
  }
  func.func @transform_3(%arg0: i32) -> (i32, i32) {
    %c0_i32 = arith.constant 0 : i32
    %c0_i32_0 = arith.constant 0 : i32
    return %c0_i32, %arg0 : i32, i32
  }
  func.func @transform_4(%arg0: i32) -> (i32, i32, i32) {
    %c0_i32 = arith.constant 0 : i32
    %c0_i32_0 = arith.constant 0 : i32
    %c0_i32_1 = arith.constant 0 : i32
    %c0_i32_2 = arith.constant 0 : i32
    return %c0_i32, %c0_i32_0, %c0_i32_1 : i32, i32, i32
  }
  func.func @transform_5(%arg0: i32) -> (i32, i32) {
    %c0_i32 = arith.constant 0 : i32
    %c0_i32_0 = arith.constant 0 : i32
    return %c0_i32, %arg0 : i32, i32
  }
  func.func @transform_6(%arg0: i32) -> (i32, i32, i32) {
    %c0_i32 = arith.constant 0 : i32
    %c0_i32_0 = arith.constant 0 : i32
    %c0_i32_1 = arith.constant 0 : i32
    return %c0_i32, %c0_i32_0, %arg0 : i32, i32, i32
  }
  func.func @transform_7(%arg0: i32) -> (i32, i32, i32, i32) {
    %c0_i32 = arith.constant 0 : i32
    %c0_i32_0 = arith.constant 0 : i32
    %c0_i32_1 = arith.constant 0 : i32
    %c0_i32_2 = arith.constant 0 : i32
    return %arg0, %c0_i32, %c0_i32_0, %c0_i32_1 : i32, i32, i32, i32
  }
}

</mosaic_0001>

<bundles_post_ra>
// kernel: smpl_forward.1
= control target key start
LH: loop header
LB: loop body
LE: loop exit
PB: predicated region body
PF: predicated region fallthrough
CT: control target
= control target key end

     0   :  { %v4881_v0 = vmov 0.0   ;;  %vm213_vm0 = vcmask 785408   ;;  %vm2161_vm1 = vcmask 195584   ;;  %vm4882_vm2 = vmmov 0   ;;  %s7358_s1 = inlined_call_operand.vmem [shape: bf16[3,224,128], index: 1, kind: input, shape index: {}]   ;;  %s7359_s0 = inlined_call_operand.vmem [shape: f32[2,224], index: 0, kind: input, shape index: {}]   ;;  %s7360_s4 = inlined_call_operand.vmem [shape: f32[2,16,24], index: 4, kind: input, shape index: {}]   ;;  %s7361_s3 = inlined_call_operand.vmem [shape: f32[24,128], index: 3, kind: input, shape index: {}]   ;;  %s7362_s5 = inlined_call_operand.vmem [shape: f32[17,128], index: 5, kind: input, shape index: {}]   ;;  %s7363_s2 = inlined_call_operand.vmem [shape: f32[3,128], index: 2, kind: input, shape index: {}]   ;;  %s7364_s6 = inlined_call_operand.vmem [shape: f32[2,3,128], index: 6, kind: output, shape index: {0}]   ;;  %s7365_s7 = inlined_call_operand.vmem [shape: f32[1,2,3,17], index: 7, kind: output, shape index: {1}]  }
   0x1   :  { %216 = vmatprep.subr.mxu0 %v4881_v0  ;;  %v4520_v1 = vld [vmem:[%s7358_s1 + $0x38] sm:$0xff]   ;;  %v4519_v2 = vld [vmem:[%s7358_s1 + $0x30] sm:$0xff]   ;;  %296 = vmatprep.subr.mxu1 %v4881_v0  ;;  %v4518_v3 = vld [vmem:[%s7358_s1 + $0x28] sm:$0xff]   ;;  %vm3214_vm3 = vcmask 133120  }
   0x2   :  { %v4934_v4 = vunpack.c.h.bf16 %v4520_v1  ;;  %v4936_v5 = vunpack.c.l.bf16 %v4520_v1  ;;  %v4938_v6 = vunpack.c.h.bf16 %v4519_v2  ;;  %v4940_v7 = vunpack.c.l.bf16 %v4519_v2  ;;  %v4517_v8 = vld [vmem:[%s7358_s1 + $0x20] sm:$0xff]   ;;  %v4516_v16 = vld [vmem:[%s7358_s1 + $0x18] sm:$0xff]   ;;  %v4515_v31 = vld [vmem:[%s7358_s1 + $0x10] sm:$0xff]  }
   0x3   :  { %v4945_v9 = vunpack.c.h.bf16 %v4518_v3  ;;  %v4947_v10 = vunpack.c.l.bf16 %v4518_v3  ;;  %v4949_v11 = vunpack.c.h.bf16 %v4517_v8  ;;  %v4986_v23 = vunpack.c.l.bf16 %v4517_v8  ;;  %v4514_v43 = vld [vmem:[%s7358_s1 + $0x8] sm:$0xff]   ;;  %v4347_v53 = vld [vmem:[%s7358_s1] sm:$0xff]  }
   0x4   :  { %217 = vmatpush1.msra.mxu0 %v4934_v4  ;;  %v4954_v12 = vsub.f32 %v4934_v4, %v4934_v4  ;;  %v4958_v13 = vsub.f32 %v4936_v5, %v4936_v5  ;;  %v4962_v14 = vsub.f32 %v4938_v6, %v4938_v6  ;;  %v4966_v15 = vsub.f32 %v4940_v7, %v4940_v7  ;;  %v4526_v63 = vld [vmem:[%s7358_s1 + $0x68] sm:$0xff]  }
   0x5   :  { %218 = vmatprep.subr.mxu0 %v4881_v0  ;;  %v4974_v17 = vsub.f32 %v4945_v9, %v4945_v9  ;;  %v4978_v18 = vsub.f32 %v4947_v10, %v4947_v10  ;;  %v4988_v24 = vunpack.c.h.bf16 %v4516_v16  ;;  %v4992_v25 = vsub.f32 %v4949_v11, %v4949_v11 }
   0x6   :  { %219 = vmatpush1.msra.mxu0 %v4936_v5  ;;  %v7384_v19 = vand.u32 4294901760, %v4954_v12  ;;  %v7383_v20 = vand.u32 4294901760, %v4958_v13  ;;  %v7381_v21 = vand.u32 4294901760, %v4962_v14  ;;  %v7380_v22 = vand.u32 4294901760, %v4966_v15 }
   0x7   :  { %220 = vmatprep.subr.mxu0 %v4881_v0  ;;  %v7378_v29 = vand.u32 4294901760, %v4974_v17  ;;  %v5006_v30 = vunpack.c.l.bf16 %v4516_v16  ;;  %v7376_v35 = vand.u32 4294901760, %v4978_v18  ;;  %v7375_v36 = vand.u32 4294901760, %v4992_v25 }
   0x8   :  { %221 = vmatpush1.msra.mxu0 %v4938_v6  ;;  %v299_v26 = vsub.f32 %v4954_v12, %v7384_v19  ;;  %v305_v27 = vsub.f32 %v4958_v13, %v7383_v20  ;;  %v311_v28 = vsub.f32 %v4962_v14, %v7381_v21  ;;  %v317_v34 = vsub.f32 %v4966_v15, %v7380_v22  ;;  %v4521_v19 = vld [vmem:[%s7358_s1 + $0x40] sm:$0xff]  }
   0x9   :  { %222 = vmatprep.subr.mxu0 %v4881_v0  ;;  %v5020_v37 = vsub.f32 %v4986_v23, %v4986_v23  ;;  %v323_v39 = vsub.f32 %v4974_v17, %v7378_v29  ;;  %v5026_v40 = vunpack.c.h.bf16 %v4515_v31  ;;  %v5030_v41 = vsub.f32 %v4988_v24, %v4988_v24 }
   0xa   :  { %223 = vmatpush1.msra.mxu0 %v4940_v7  ;;  %v300_v32 = vand.u32 4294901760, %v299_v26  ;;  %v306_v33 = vand.u32 4294901760, %v305_v27  ;;  %v312_v38 = vand.u32 4294901760, %v311_v28  ;;  %v5034_v42 = vunpack.c.l.bf16 %v4515_v31 }
   0xb   :  { %224 = vmatprep.subr.mxu0 %v4881_v0  ;;  %v318_v44 = vand.u32 4294901760, %v317_v34  ;;  %v329_v45 = vsub.f32 %v4978_v18, %v7376_v35  ;;  %v7374_v46 = vand.u32 4294901760, %v5020_v37  ;;  %v5046_v47 = vsub.f32 %v5006_v30, %v5006_v30 }
   0xc   :  { %225 = vmatpush1.msra.mxu0 %v4945_v9  ;;  %301 = vmatpush1.msra.mxu1 %v300_v32  ;;  %v335_v48 = vsub.f32 %v4992_v25, %v7375_v36  ;;  %v324_v49 = vand.u32 4294901760, %v323_v39  ;;  %v5054_v50 = vunpack.c.h.bf16 %v4514_v43  ;;  %v7372_v51 = vand.u32 4294901760, %v5030_v41 }
   0xd   :  { %226 = vmatprep.subr.mxu0 %v4881_v0  ;;  %302 = vmatprep.subr.mxu1 %v4881_v0  ;;  %v5059_v52 = vsub.f32 %v5026_v40, %v5026_v40  ;;  %v5068_v54 = vsub.f32 %v5034_v42, %v5034_v42  ;;  %v330_v55 = vand.u32 4294901760, %v329_v45  ;;  %v341_v56 = vsub.f32 %v5020_v37, %v7374_v46 }
   0xe   :  { %227 = vmatpush1.msra.mxu0 %v4947_v10  ;;  %307 = vmatpush1.msra.mxu1 %v306_v33  ;;  %v5074_v57 = vunpack.c.l.bf16 %v4514_v43  ;;  %v7371_v58 = vand.u32 4294901760, %v5046_v47  ;;  %v336_v59 = vand.u32 4294901760, %v335_v48  ;;  %v347_v60 = vsub.f32 %v5030_v41, %v7372_v51 }
   0xf   :  { %228 = vmatprep.subr.mxu0 %v4881_v0  ;;  %308 = vmatprep.subr.mxu1 %v4881_v0  ;;  %v5083_v61 = vunpack.c.h.bf16 %v4347_v53  ;;  %v7369_v62 = vand.u32 4294901760, %v5059_v52  ;;  %v5091_v1 = vsub.f32 %v5054_v50, %v5054_v50  ;;  %v7368_v2 = vand.u32 4294901760, %v5068_v54 }
  0x10   :  { %229 = vmatpush1.msra.mxu0 %v4949_v11  ;;  %313 = vmatpush1.msra.mxu1 %v312_v38  ;;  %v342_v3 = vand.u32 4294901760, %v341_v56  ;;  %v353_v8 = vsub.f32 %v5046_v47, %v7371_v58  ;;  %v5100_v16 = vunpack.c.l.bf16 %v4347_v53  ;;  %v5104_v26 = vsub.f32 %v5074_v57, %v5074_v57  ;;  %v4525_v38 = vld [vmem:[%s7358_s1 + $0x60] sm:$0xff]  }
  0x11   :  { %230 = vmatprep.subr.mxu0 %v4881_v0  ;;  %314 = vmatprep.subr.mxu1 %v4881_v0  ;;  %v5108_v27 = vunpack.c.h.bf16 %v4526_v63  ;;  %v348_v28 = vand.u32 4294901760, %v347_v60  ;;  %v359_v31 = vsub.f32 %v5059_v52, %v7369_v62  ;;  %v7367_v32 = vand.u32 4294901760, %v5091_v1 }
  0x12   :  { %231 = vmatpush1.msra.mxu0 %v4986_v23  ;;  %319 = vmatpush1.msra.mxu1 %v318_v44  ;;  %v5117_v33 = vsub.f32 %v5083_v61, %v5083_v61  ;;  %v365_v34 = vsub.f32 %v5068_v54, %v7368_v2  ;;  %v354_v39 = vand.u32 4294901760, %v353_v8  ;;  %v5128_v43 = vunpack.c.l.bf16 %v4526_v63  ;;  %v5156_v63 = vld.sshfl [vmem:[%s7359_s0] sm:$0x33 pattern:$0x76325410] }
  0x13   :  { %232 = vmatprep.subr.mxu0 %v4881_v0  ;;  %320 = vmatprep.subr.mxu1 %v4881_v0  ;;  %v7366_v44 = vand.u32 4294901760, %v5104_v26  ;;  %v5133_v45 = vsub.f32 %v5100_v16, %v5100_v16  ;;  %v5139_v48 = vsub.f32 %v5108_v27, %v5108_v27  ;;  %v371_v53 = vsub.f32 %v5091_v1, %v7367_v32  ;;  %v4523_v32 = vld [vmem:[%s7358_s1 + $0x50] sm:$0xff]  }
  0x14   :  { %233 = vmatpush1.msra.mxu0 %v4988_v24  ;;  %325 = vmatpush1.msra.mxu1 %v324_v49  ;;  %7484 = vst [vmem:[#allocation2_spill] sm:$0xff] %v5128_v43  ;;  %v360_v49 = vand.u32 4294901760, %v359_v31  ;;  %v7370_v56 = vand.u32 4294901760, %v5117_v33  ;;  %v366_v60 = vand.u32 4294901760, %v365_v34  ;;  %v5162_v8 = vunpack.c.l.bf16 %v4525_v38 }
  0x15   :  { %234 = vmatprep.subr.mxu0 %v4881_v0  ;;  %326 = vmatprep.subr.mxu1 %v4881_v0  ;;  %v5167_v31 = vsub.f32 %v5128_v43, %v5128_v43  ;;  %v211_v62 = vcombine.high %v5156_v63, %v5156_v63  ;;  %v5216_v35 = vunpack.c.l.bf16 %v4523_v32  ;;  %v5244_v21 = vand.u32 4294901760, %v5156_v63 }
  0x16   :  { %235 = vmatpush1.msra.mxu0 %v5006_v30  ;;  %331 = vmatpush1.msra.mxu1 %v330_v55  ;;  %v5145_v55 = vunpack.c.h.bf16 %v4525_v38  ;;  %7486 = vst [vmem:[#allocation4_spill] sm:$0xff] %v5162_v8  ;;  %v383_v38 = vsub.f32 %v5117_v33, %v7370_v56  ;;  %v5198_v51 = vsub.f32 %v5162_v8, %v5162_v8 }
  0x17   :  { %236 = vmatprep.subr.mxu0 %v4881_v0  ;;  %332 = vmatprep.subr.mxu1 %v4881_v0  ;;  %v7379_v58 = vand.u32 4294901760, %v5167_v31  ;;  %v214_v36 = vsel %vm213_vm0, %v211_v62, 0  ;;  %7490 = vst [vmem:[#allocation8_spill] sm:$0xff] %v5216_v35  ;;  %v4522_v62 = vld [vmem:[%s7358_s1 + $0x48] sm:$0xff]  }
  0x18   :  { %237 = vmatpush1.msra.mxu0 %v5026_v40  ;;  %337 = vmatpush1.msra.mxu1 %v336_v59  ;;  %7485 = vst [vmem:[#allocation3_spill] sm:$0xff] %v5145_v55  ;;  %v4524_v59 = vld [vmem:[%s7358_s1 + $0x58] sm:$0xff]   ;;  %v5183_v2 = vsub.f32 %v5145_v55, %v5145_v55 }
  0x19   :  { %238 = vmatprep.subr.mxu0 %v4881_v0  ;;  %338 = vmatprep.subr.mxu1 %v4881_v0  ;;  %v5171_v34 = vunpack.c.h.bf16 %v4524_v59 }
  0x1a   :  { %239 = vmatpush1.msra.mxu0 %v5034_v42  ;;  %343 = vmatpush1.msra.mxu1 %v342_v3  ;;  %v377_v3 = vsub.f32 %v5104_v26, %v7366_v44  ;;  %v372_v44 = vand.u32 4294901760, %v371_v53 }
  0x1b   :  { %240 = vmatprep.subr.mxu0 %v4881_v0  ;;  %344 = vmatprep.subr.mxu1 %v4881_v0  ;;  %7487 = vst [vmem:[#allocation5_spill] sm:$0xff] %v5171_v34  ;;  %v5211_v46 = vsub.f32 %v5171_v34, %v5171_v34 }
  0x1c   :  { %241 = vmatpush1.msra.mxu0 %v5054_v50  ;;  %349 = vmatpush1.msra.mxu1 %v348_v28  ;;  %v7373_v28 = vand.u32 4294901760, %v5133_v45  ;;  %v378_v53 = vand.u32 4294901760, %v377_v3  ;;  %v384_v3 = vand.u32 4294901760, %v383_v38  ;;  %v7385_v38 = vand.u32 4294901760, %v5198_v51 }
  0x1d   :  { %242 = vmatprep.subr.mxu0 %v4881_v0  ;;  %350 = vmatprep.subr.mxu1 %v4881_v0  ;;  %v7495_v20 = vand.u32 4294901760, %v5211_v46 }
  0x1e   :  { %243 = vmatpush1.msra.mxu0 %v5074_v57  ;;  %355 = vmatpush1.msra.mxu1 %v354_v39  ;;  %v7377_v39 = vand.u32 4294901760, %v5139_v48  ;;  %v389_v56 = vsub.f32 %v5133_v45, %v7373_v28  ;;  %v7382_v28 = vand.u32 4294901760, %v5183_v2 }
  0x1f   :  { %244 = vmatprep.subr.mxu0 %v4881_v0  ;;  %356 = vmatprep.subr.mxu1 %v4881_v0 }
  0x20   :  { %245 = vmatpush1.msra.mxu0 %v5083_v61  ;;  %361 = vmatpush1.msra.mxu1 %v360_v49  ;;  %v5189_v49 = vunpack.c.l.bf16 %v4524_v59  ;;  %v403_v59 = vsub.f32 %v5139_v48, %v7377_v39  ;;  %v390_v39 = vand.u32 4294901760, %v389_v56  ;;  %v5232_v56 = vand.u32 4294901760, %v214_v36 }
  0x21   :  { %246 = vmatprep.subr.mxu0 %v4881_v0  ;;  %362 = vmatprep.subr.mxu1 %v4881_v0 }
  0x22   :  { %7488 = vst [vmem:[#allocation6_spill] sm:$0xff] %v5189_v49  ;;  %247 = vmatpush1.msra.mxu0 %v5100_v16  ;;  %367 = vmatpush1.msra.mxu1 %v366_v60  ;;  %v5205_v60 = vunpack.c.h.bf16 %v4523_v32  ;;  %v5228_v29 = vsub.f32 %v5189_v49, %v5189_v49  ;;  %v404_v32 = vand.u32 4294901760, %v403_v59  ;;  %v5248_v59 = vunpack.c.h.bf16 %v4522_v62 }
  0x23   :  { %256 = vmatprep.subr.mxu0 %v4881_v0  ;;  %368 = vmatprep.subr.mxu1 %v4881_v0 }
  0x24   :  { %7489 = vst [vmem:[#allocation7_spill] sm:$0xff] %v5205_v60  ;;  %257 = vmatpush2.msra.mxu0 %v5108_v27  ;;  %373 = vmatpush1.msra.mxu1 %v372_v44  ;;  %v409_v44 = vsub.f32 %v5167_v31, %v7379_v58  ;;  %7491 = vst [vmem:[#allocation9_spill] sm:$0xff] %v5228_v29  ;;  %v5241_v22 = vsub.f32 %v5205_v60, %v5205_v60 }
  0x25   :  { %258 = vmatprep.subr.mxu0 %v4881_v0  ;;  %374 = vmatprep.subr.mxu1 %v4881_v0  ;;  %7493 = vst [vmem:[#allocation11_spill] sm:$0xff] %v5248_v59  ;;  %v5260_v58 = vsub.f32 %v5216_v35, %v5216_v35 }
  0x26   :  { %259 = vmatpush2.msra.mxu0 %v5128_v43  ;;  %379 = vmatpush1.msra.mxu1 %v378_v53  ;;  %v415_v53 = vsub.f32 %v5183_v2, %v7382_v28  ;;  %7492 = vst [vmem:[#allocation10_spill] sm:$0xff] %v5241_v22  ;;  %v421_v28 = vsub.f32 %v5198_v51, %v7385_v38 }
  0x27   :  { %260 = vmatprep.subr.mxu0 %v4881_v0  ;;  %380 = vmatprep.subr.mxu1 %v4881_v0  ;;  %v5276_v43 = vsub.f32 %v5156_v63, %v5244_v21 }
  0x28   :  { %261 = vmatpush2.msra.mxu0 %v5145_v55  ;;  %385 = vmatpush1.msra.mxu1 %v384_v3  ;;  %v410_v3 = vand.u32 4294901760, %v409_v44  ;;  %v5267_v44 = vsub.f32 %v214_v36, %v5232_v56  ;;  %v416_v38 = vand.u32 4294901760, %v415_v53  ;;  %v5280_v36 = vunpack.c.h.bf16 %v4521_v19 }
  0x29   :  { %262 = vmatprep.subr.mxu0 %v4881_v0  ;;  %386 = vmatprep.subr.mxu1 %v4881_v0  ;;  %7496 = vst [vmem:[#allocation13_spill] sm:$0xff] %v5276_v43  ;;  %v5293_v55 = vunpack.c.l.bf16 %v4521_v19  ;;  %v5307_v63 = vand.u32 4294901760, %v5276_v43 }
  0x2a   :  { %263 = vmatpush2.msra.mxu0 %v5162_v8  ;;  %391 = vmatpush1.msra.mxu1 %v390_v39  ;;  %v5264_v39 = vunpack.c.l.bf16 %v4522_v62  ;;  %7494 = vst [vmem:[#allocation12_spill] sm:$0xff] %v5267_v44  ;;  %v427_v8 = vsub.f32 %v5211_v46, %v7495_v20  ;;  %v5284_v62 = vsub.f32 %v5248_v59, %v5248_v59  ;;  %v422_v20 = vand.u32 4294901760, %v421_v28 }
  0x2b   :  { %264 = vmatprep.subr.mxu0 %v4881_v0  ;;  %400 = vmatprep.subr.mxu1 %v4881_v0  ;;  %7500 = vst [vmem:[#allocation15_spill] sm:$0xff] %v5307_v63 }
  0x2c   :  { %265 = vmatpush2.msra.mxu0 %v5171_v34  ;;  %405 = vmatpush2.msra.mxu1 %v404_v32  ;;  %v7497_v32 = vand.u32 4294901760, %v5228_v29  ;;  %v5296_v34 = vand.u32 4294901760, %v5267_v44  ;;  %v428_v28 = vand.u32 4294901760, %v427_v8 }
  0x2d   :  { %266 = vmatprep.subr.mxu0 %v4881_v0  ;;  %406 = vmatprep.subr.mxu1 %v4881_v0 }
  0x2e   :  { %267 = vmatpush2.msra.mxu0 %v5189_v49  ;;  %411 = vmatpush2.msra.mxu1 %v410_v3  ;;  %v433_v53 = vsub.f32 %v5228_v29, %v7497_v32  ;;  %7498 = vst [vmem:[#allocation14_spill] sm:$0xff] %v5296_v34  ;;  %v5300_v49 = vsub.f32 %v5264_v39, %v5264_v39  ;;  %v7499_v3 = vand.u32 4294901760, %v5241_v22 }
  0x2f   :  { %268 = vmatprep.subr.mxu0 %v4881_v0  ;;  %412 = vmatprep.subr.mxu1 %v4881_v0  ;;  %v5314_v29 = vsub.f32 %v5280_v36, %v5280_v36 }
  0x30   :  { %269 = vmatpush2.msra.mxu0 %v5205_v60  ;;  %417 = vmatpush2.msra.mxu1 %v416_v38  ;;  %v439_v32 = vsub.f32 %v5241_v22, %v7499_v3  ;;  %v434_v8 = vand.u32 4294901760, %v433_v53  ;;  %v7501_v38 = vand.u32 4294901760, %v5260_v58  ;;  %v283_v60 = vsub.f32 %v5267_v44, %v5296_v34 }
  0x31   :  { %270 = vmatprep.subr.mxu0 %v4881_v0  ;;  %418 = vmatprep.subr.mxu1 %v4881_v0  ;;  %v5327_v22 = vsub.f32 %v5293_v55, %v5293_v55  ;;  %v289_v53 = vsub.f32 %v5276_v43, %v5307_v63  ;;  %v7411_v19 = vand.u32 4294901760, %v5314_v29 }
  0x32   :  { %271 = vmatpush2.msra.mxu0 %v5216_v35  ;;  %423 = vmatpush2.msra.mxu1 %v422_v20  ;;  %v445_v3 = vsub.f32 %v5260_v58, %v7501_v38  ;;  %v440_v20 = vand.u32 4294901760, %v439_v32  ;;  %v7502_v38 = vand.u32 4294901760, %v5284_v62  ;;  %v7503_v32 = vand.u32 4294901760, %v5300_v49 }
  0x33   :  { %272 = vmatprep.subr.mxu0 %v4881_v0  ;;  %424 = vmatprep.subr.mxu1 %v4881_v0 }
  0x34   :  { %273 = vmatpush2.msra.mxu0 %v5248_v59  ;;  %429 = vmatpush2.msra.mxu1 %v428_v28  ;;  %v451_v34 = vsub.f32 %v5284_v62, %v7502_v38  ;;  %v446_v35 = vand.u32 4294901760, %v445_v3  ;;  %v5341_v28 = vand.u32 4294901760, %v283_v60  ;;  %v457_v63 = vsub.f32 %v5300_v49, %v7503_v32  ;;  %v7507_v32 = vld [vmem:[#allocation10_spill] sm:$0xff] }
  0x35   :  { %274 = vmatprep.subr.mxu0 %v4881_v0  ;;  %430 = vmatprep.subr.mxu1 %v4881_v0  ;;  %v7410_v59 = vand.u32 4294901760, %v5327_v22  ;;  %v5348_v38 = vand.u32 4294901760, %v289_v53  ;;  %v463_v60 = vsub.f32 %v5314_v29, %v7411_v19  ;;  %v7506_v53 = vld [vmem:[#allocation2_spill] sm:$0xff]  ;;  %v7515_v19 = vand.u32 4294901760, %v4954_v12 }
  0x36   :  { %275 = vmatpush2.msra.mxu0 %v5264_v39  ;;  %435 = vmatpush2.msra.mxu1 %v434_v8  ;;  %v452_v8 = vand.u32 4294901760, %v451_v34  ;;  %v458_v3 = vand.u32 4294901760, %v457_v63  ;;  %v7505_v63 = vld [vmem:[#allocation9_spill] sm:$0xff] }
  0x37   :  { %276 = vmatprep.subr.mxu0 %v4881_v0  ;;  %436 = vmatprep.subr.mxu1 %v4881_v0  ;;  %7504 = vst [vmem:[#allocation16_spill] sm:$0xff] %v5348_v38  ;;  %v464_v34 = vand.u32 4294901760, %v463_v60  ;;  %v7509_v60 = vld [vmem:[#allocation4_spill] sm:$0xff] }
  0x38   :  { %277 = vmatpush2.msra.mxu0 %v5280_v36  ;;  %441 = vmatpush2.msra.mxu1 %v440_v20  ;;  %v469_v20 = vsub.f32 %v5327_v22, %v7410_v59  ;;  %v7514_v59 = vld [vmem:[#allocation11_spill] sm:$0xff] }
  0x39   :  { %278 = vmatprep.subr.mxu0 %v4881_v0  ;;  %442 = vmatprep.subr.mxu1 %v4881_v0 }
  0x3a   :  { %279 = vmatpush2.msra.mxu0 %v5293_v55  ;;  %447 = vmatpush2.msra.mxu1 %v446_v35  ;;  %v470_v35 = vand.u32 4294901760, %v469_v20  ;;  %v7511_v20 = vld [vmem:[#allocation6_spill] sm:$0xff] }
  0x3b   :  { %285 = vmatprep.mubr.f32.mxu0 %v5341_v28  ;;  %448 = vmatprep.subr.mxu1 %v4881_v0 }
  0x3c   :  { %480 = vmatprep.subr.mxu0 %v4881_v0  ;;  %291 = vmatmul.mubr.f32.vlgmr.msra.gmra.mxu0 %v5348_v38 }
  0x3d   :  { %453 = vmatpush2.msra.mxu1 %v452_v8  ;;  %482 = vmatpush1.msra.mxu0 %v4954_v12  ;;  %v7508_v8 = vld [vmem:[#allocation3_spill] sm:$0xff]  ;;  %v7518_v12 = vld [vmem:[#allocation14_spill] sm:$0xff] }
  0x3e   :  { %454 = vmatprep.subr.mxu1 %v4881_v0  ;;  %483 = vmatprep.subr.mxu0 %v4881_v0 }
  0x3f   :  { %459 = vmatpush2.msra.mxu1 %v458_v3  ;;  %485 = vmatpush1.msra.mxu0 %v4958_v13  ;;  %v7510_v3 = vld [vmem:[#allocation5_spill] sm:$0xff] }
  0x40   :  { %460 = vmatprep.subr.mxu1 %v4881_v0  ;;  %486 = vmatprep.subr.mxu0 %v4881_v0 }
  0x41   :  { %465 = vmatpush2.msra.mxu1 %v464_v34  ;;  %488 = vmatpush1.msra.mxu0 %v4962_v14  ;;  %v7512_v34 = vld [vmem:[#allocation7_spill] sm:$0xff] }
  0x42   :  { %466 = vmatprep.subr.mxu1 %v4881_v0  ;;  %489 = vmatprep.subr.mxu0 %v4881_v0 }
  0x43   :  { %471 = vmatpush2.msra.mxu1 %v470_v35  ;;  %473 = vmatprep.mubr.f32.mxu1 %v5232_v56  ;;  %v7513_v35 = vld [vmem:[#allocation8_spill] sm:$0xff] }
  0x44   :  { %491 = vmatpush1.msra.mxu0 %v4966_v15  ;;  %475 = vmatmul.mubr.f32.vlgmr.msra.gmra.mxu1 %v5244_v21 }
  0x45   :  { %492 = vmatprep.subr.mxu0 %v4881_v0  ;;  %582 = vmatprep.subr.mxu1 %v4881_v0 }
  0x46   :  { %494 = vmatpush1.msra.mxu0 %v4974_v17  ;;  %583 = vmatpush1.msra.mxu1 %v4934_v4 }
  0x47   :  { %495 = vmatprep.subr.mxu0 %v4881_v0  ;;  %584 = vmatprep.subr.mxu1 %v4881_v0 }
  0x48   :  { %497 = vmatpush1.msra.mxu0 %v4978_v18  ;;  %585 = vmatpush1.msra.mxu1 %v4936_v5 }
  0x49   :  { %498 = vmatprep.subr.mxu0 %v4881_v0  ;;  %586 = vmatprep.subr.mxu1 %v4881_v0 }
  0x4a   :  { %500 = vmatpush1.msra.mxu0 %v4992_v25  ;;  %587 = vmatpush1.msra.mxu1 %v4938_v6 }
  0x4b   :  { %501 = vmatprep.subr.mxu0 %v4881_v0  ;;  %588 = vmatprep.subr.mxu1 %v4881_v0 }
  0x4c   :  { %503 = vmatpush1.msra.mxu0 %v5020_v37  ;;  %589 = vmatpush1.msra.mxu1 %v4940_v7 }
  0x4d   :  { %504 = vmatprep.subr.mxu0 %v4881_v0  ;;  %590 = vmatprep.subr.mxu1 %v4881_v0 }
  0x4e   :  { %506 = vmatpush1.msra.mxu0 %v5030_v41  ;;  %591 = vmatpush1.msra.mxu1 %v4945_v9 }
  0x4f   :  { %507 = vmatprep.subr.mxu0 %v4881_v0  ;;  %592 = vmatprep.subr.mxu1 %v4881_v0 }
  0x50   :  { %509 = vmatpush1.msra.mxu0 %v5046_v47  ;;  %593 = vmatpush1.msra.mxu1 %v4947_v10 }
  0x51   :  { %510 = vmatprep.subr.mxu0 %v4881_v0  ;;  %594 = vmatprep.subr.mxu1 %v4881_v0 }
  0x52   :  { %512 = vmatpush1.msra.mxu0 %v5059_v52  ;;  %595 = vmatpush1.msra.mxu1 %v4949_v11 }
  0x53   :  { %513 = vmatprep.subr.mxu0 %v4881_v0  ;;  %596 = vmatprep.subr.mxu1 %v4881_v0 }
  0x54   :  { %515 = vmatpush1.msra.mxu0 %v5068_v54  ;;  %597 = vmatpush1.msra.mxu1 %v4986_v23 }
  0x55   :  { %516 = vmatprep.subr.mxu0 %v4881_v0  ;;  %598 = vmatprep.subr.mxu1 %v4881_v0 }
  0x56   :  { %518 = vmatpush1.msra.mxu0 %v5091_v1  ;;  %599 = vmatpush1.msra.mxu1 %v4988_v24 }
  0x57   :  { %519 = vmatprep.subr.mxu0 %v4881_v0  ;;  %600 = vmatprep.subr.mxu1 %v4881_v0 }
  0x58   :  { %521 = vmatpush1.msra.mxu0 %v5104_v26  ;;  %601 = vmatpush1.msra.mxu1 %v5006_v30 }
  0x59   :  { %522 = vmatprep.subr.mxu0 %v4881_v0  ;;  %602 = vmatprep.subr.mxu1 %v4881_v0 }
  0x5a   :  { %524 = vmatpush1.msra.mxu0 %v5117_v33  ;;  %603 = vmatpush1.msra.mxu1 %v5026_v40 }
  0x5b   :  { %525 = vmatprep.subr.mxu0 %v4881_v0  ;;  %604 = vmatprep.subr.mxu1 %v4881_v0 }
  0x5c   :  { %527 = vmatpush1.msra.mxu0 %v5133_v45  ;;  %605 = vmatpush1.msra.mxu1 %v5034_v42 }
  0x5d   :  { %536 = vmatprep.subr.mxu0 %v4881_v0  ;;  %606 = vmatprep.subr.mxu1 %v4881_v0 }
  0x5e   :  { %538 = vmatpush2.msra.mxu0 %v5139_v48  ;;  %607 = vmatpush1.msra.mxu1 %v5054_v50 }
  0x5f   :  { %539 = vmatprep.subr.mxu0 %v4881_v0  ;;  %608 = vmatprep.subr.mxu1 %v4881_v0 }
  0x60   :  { %541 = vmatpush2.msra.mxu0 %v5167_v31  ;;  %609 = vmatpush1.msra.mxu1 %v5074_v57 }
  0x61   :  { %542 = vmatprep.subr.mxu0 %v4881_v0  ;;  %610 = vmatprep.subr.mxu1 %v4881_v0 }
  0x62   :  { %544 = vmatpush2.msra.mxu0 %v5183_v2  ;;  %611 = vmatpush1.msra.mxu1 %v5083_v61 }
  0x63   :  { %545 = vmatprep.subr.mxu0 %v4881_v0  ;;  %612 = vmatprep.subr.mxu1 %v4881_v0 }
  0x64   :  { %547 = vmatpush2.msra.mxu0 %v5198_v51  ;;  %613 = vmatpush1.msra.mxu1 %v5100_v16 }
  0x65   :  { %548 = vmatprep.subr.mxu0 %v4881_v0  ;;  %622 = vmatprep.subr.mxu1 %v4881_v0 }
  0x66   :  { %550 = vmatpush2.msra.mxu0 %v5211_v46  ;;  %623 = vmatpush2.msra.mxu1 %v5108_v27 }
  0x67   :  { %551 = vmatprep.subr.mxu0 %v4881_v0  ;;  %624 = vmatprep.subr.mxu1 %v4881_v0 }
  0x68   :  { %553 = vmatpush2.msra.mxu0 %v7505_v63  ;;  %625 = vmatpush2.msra.mxu1 %v7506_v53 }
  0x69   :  { %554 = vmatprep.subr.mxu0 %v4881_v0  ;;  %626 = vmatprep.subr.mxu1 %v4881_v0 }
  0x6a   :  { %556 = vmatpush2.msra.mxu0 %v7507_v32  ;;  %627 = vmatpush2.msra.mxu1 %v7508_v8 }
  0x6b   :  { %557 = vmatprep.subr.mxu0 %v4881_v0  ;;  %628 = vmatprep.subr.mxu1 %v4881_v0 }
  0x6c   :  { %559 = vmatpush2.msra.mxu0 %v5260_v58  ;;  %629 = vmatpush2.msra.mxu1 %v7509_v60 }
  0x6d   :  { %560 = vmatprep.subr.mxu0 %v4881_v0  ;;  %630 = vmatprep.subr.mxu1 %v4881_v0 }
  0x6e   :  { %562 = vmatpush2.msra.mxu0 %v5284_v62  ;;  %631 = vmatpush2.msra.mxu1 %v7510_v3 }
  0x6f   :  { %563 = vmatprep.subr.mxu0 %v4881_v0  ;;  %632 = vmatprep.subr.mxu1 %v4881_v0 }
  0x70   :  { %565 = vmatpush2.msra.mxu0 %v5300_v49  ;;  %633 = vmatpush2.msra.mxu1 %v7511_v20 }
  0x71   :  { %566 = vmatprep.subr.mxu0 %v4881_v0  ;;  %634 = vmatprep.subr.mxu1 %v4881_v0 }
  0x72   :  { %568 = vmatpush2.msra.mxu0 %v5314_v29  ;;  %635 = vmatpush2.msra.mxu1 %v7512_v34 }
  0x73   :  { %569 = vmatprep.subr.mxu0 %v4881_v0  ;;  %636 = vmatprep.subr.mxu1 %v4881_v0 }
  0x74   :  { %571 = vmatpush2.msra.mxu0 %v5327_v22  ;;  %574 = vmatprep.mubr.f32.mxu0 %v5267_v44  ;;  %v7516_v44 = vand.u32 4294901760, %v4958_v13  ;;  %v7519_v13 = vand.u32 4294901760, %v4966_v15  ;;  %v7523_v15 = vand.u32 4294901760, %v4992_v25  ;;  %v7535_v25 = vand.u32 4294901760, %v5183_v2 }
  0x75   :  { %637 = vmatpush2.msra.mxu1 %v7513_v35  ;;  %577 = vmatmul.mubr.f32.vlgmr.msra.gmra.mxu0 %v5276_v43  ;;  %v7517_v43 = vand.u32 4294901760, %v4962_v14  ;;  %v7521_v14 = vand.u32 4294901760, %v4974_v17  ;;  %v7531_v17 = vand.u32 4294901760, %v5117_v33 }
  0x76   :  { %638 = vmatprep.subr.mxu1 %v4881_v0  ;;  %658 = vmatprep.subr.mxu0 %v4881_v0 }
  0x77   :  { %639 = vmatpush2.msra.mxu1 %v7514_v59  ;;  %661 = vmatpush1.msra.mxu0 %v7515_v19 }
  0x78   :  { %640 = vmatprep.subr.mxu1 %v4881_v0  ;;  %662 = vmatprep.subr.mxu0 %v4881_v0 }
  0x79   :  { %641 = vmatpush2.msra.mxu1 %v5264_v39  ;;  %665 = vmatpush1.msra.mxu0 %v7516_v44  ;;  %v7520_v44 = vld [vmem:[#allocation15_spill] sm:$0xff] }
  0x7a   :  { %642 = vmatprep.subr.mxu1 %v4881_v0  ;;  %666 = vmatprep.subr.mxu0 %v4881_v0 }
  0x7b   :  { %643 = vmatpush2.msra.mxu1 %v5280_v36  ;;  %669 = vmatpush1.msra.mxu0 %v7517_v43  ;;  %v7522_v43 = vand.u32 4294901760, %v4978_v18  ;;  %v7532_v18 = vand.u32 4294901760, %v5133_v45 }
  0x7c   :  { %644 = vmatprep.subr.mxu1 %v4881_v0  ;;  %670 = vmatprep.subr.mxu0 %v4881_v0 }
  0x7d   :  { %645 = vmatpush2.msra.mxu1 %v5293_v55  ;;  %649 = vmatprep.mubr.f32.mxu1 %v7518_v12 }
  0x7e   :  { %673 = vmatpush1.msra.mxu0 %v7519_v13  ;;  %653 = vmatmul.mubr.f32.vlgmr.msra.gmra.mxu1 %v7520_v44  ;;  %v4529_v13 = vld [vmem:[%s7358_s1 + $0x80] sm:$0xff]   ;;  %v4535_v44 = vld [vmem:[%s7358_s1 + $0xb0] sm:$0xff]  }
  0x7f   :  { %674 = vmatprep.subr.mxu0 %v4881_v0  ;;  %786 = vmatprep.subr.mxu1 %v4881_v0 }
  0x80   :  { %677 = vmatpush1.msra.mxu0 %v7521_v14  ;;  %787 = vmatpush1.msra.mxu1 %v4934_v4  ;;  %v7524_v4 = vand.u32 4294901760, %v5020_v37  ;;  %v7537_v37 = vand.u32 4294901760, %v5211_v46  ;;  %v7540_v46 = vand.u32 4294901760, %v5260_v58  ;;  %v4532_v58 = vld [vmem:[%s7358_s1 + $0x98] sm:$0xff]  }
  0x81   :  { %678 = vmatprep.subr.mxu0 %v4881_v0  ;;  %788 = vmatprep.subr.mxu1 %v4881_v0  ;;  %v5649_v45 = vunpack.c.l.bf16 %v4532_v58 }
  0x82   :  { %681 = vmatpush1.msra.mxu0 %v7522_v43  ;;  %789 = vmatpush1.msra.mxu1 %v4936_v5  ;;  %v7525_v5 = vand.u32 4294901760, %v5030_v41  ;;  %v4534_v41 = vld [vmem:[%s7358_s1 + $0xa8] sm:$0xff]  }
  0x83   :  { %682 = vmatprep.subr.mxu0 %v4881_v0  ;;  %790 = vmatprep.subr.mxu1 %v4881_v0 }
  0x84   :  { %685 = vmatpush1.msra.mxu0 %v7523_v15  ;;  %791 = vmatpush1.msra.mxu1 %v4938_v6  ;;  %v7526_v6 = vand.u32 4294901760, %v5046_v47  ;;  %v5598_v47 = vunpack.c.h.bf16 %v4534_v41 }
  0x85   :  { %686 = vmatprep.subr.mxu0 %v4881_v0  ;;  %792 = vmatprep.subr.mxu1 %v4881_v0 }
  0x86   :  { %689 = vmatpush1.msra.mxu0 %v7524_v4  ;;  %793 = vmatpush1.msra.mxu1 %v4940_v7  ;;  %v7527_v7 = vand.u32 4294901760, %v5059_v52  ;;  %v5608_v52 = vunpack.c.l.bf16 %v4534_v41  ;;  %v4527_v41 = vld [vmem:[%s7358_s1 + $0x70] sm:$0xff]  }
  0x87   :  { %690 = vmatprep.subr.mxu0 %v4881_v0  ;;  %794 = vmatprep.subr.mxu1 %v4881_v0 }
  0x88   :  { %693 = vmatpush1.msra.mxu0 %v7525_v5  ;;  %795 = vmatpush1.msra.mxu1 %v4945_v9  ;;  %v7528_v9 = vand.u32 4294901760, %v5068_v54  ;;  %v7542_v54 = vand.u32 4294901760, %v5300_v49 }
  0x89   :  { %694 = vmatprep.subr.mxu0 %v4881_v0  ;;  %796 = vmatprep.subr.mxu1 %v4881_v0 }
  0x8a   :  { %697 = vmatpush1.msra.mxu0 %v7526_v6  ;;  %797 = vmatpush1.msra.mxu1 %v4947_v10  ;;  %v7529_v10 = vand.u32 4294901760, %v5091_v1  ;;  %v7543_v1 = vand.u32 4294901760, %v5314_v29  ;;  %v5729_v6 = vunpack.c.h.bf16 %v4529_v13 }
  0x8b   :  { %698 = vmatprep.subr.mxu0 %v4881_v0  ;;  %798 = vmatprep.subr.mxu1 %v4881_v0 }
  0x8c   :  { %701 = vmatpush1.msra.mxu0 %v7527_v7  ;;  %799 = vmatpush1.msra.mxu1 %v4949_v11  ;;  %v7530_v11 = vand.u32 4294901760, %v5104_v26  ;;  %v5637_v26 = vunpack.c.h.bf16 %v4532_v58 }
  0x8d   :  { %702 = vmatprep.subr.mxu0 %v4881_v0  ;;  %800 = vmatprep.subr.mxu1 %v4881_v0 }
  0x8e   :  { %705 = vmatpush1.msra.mxu0 %v7528_v9  ;;  %801 = vmatpush1.msra.mxu1 %v4986_v23  ;;  %v7533_v23 = vand.u32 4294901760, %v5139_v48  ;;  %v4531_v48 = vld [vmem:[%s7358_s1 + $0x90] sm:$0xff]   ;;  %v5665_v49 = vsub.f32 %v5637_v26, %v5637_v26 }
  0x8f   :  { %706 = vmatprep.subr.mxu0 %v4881_v0  ;;  %802 = vmatprep.subr.mxu1 %v4881_v0  ;;  %v5672_v19 = vunpack.c.h.bf16 %v4531_v48 }
  0x90   :  { %709 = vmatpush1.msra.mxu0 %v7529_v10  ;;  %803 = vmatpush1.msra.mxu1 %v4988_v24  ;;  %v7534_v24 = vand.u32 4294901760, %v5167_v31 }
  0x91   :  { %710 = vmatprep.subr.mxu0 %v4881_v0  ;;  %804 = vmatprep.subr.mxu1 %v4881_v0 }
  0x92   :  { %713 = vmatpush1.msra.mxu0 %v7530_v11  ;;  %805 = vmatpush1.msra.mxu1 %v5006_v30  ;;  %v7536_v30 = vand.u32 4294901760, %v5198_v51  ;;  %v7541_v51 = vand.u32 4294901760, %v5284_v62  ;;  %v4528_v11 = vld [vmem:[%s7358_s1 + $0x78] sm:$0xff]  }
  0x93   :  { %714 = vmatprep.subr.mxu0 %v4881_v0  ;;  %806 = vmatprep.subr.mxu1 %v4881_v0 }
  0x94   :  { %717 = vmatpush1.msra.mxu0 %v7531_v17  ;;  %807 = vmatpush1.msra.mxu1 %v5026_v40  ;;  %v7538_v40 = vand.u32 4294901760, %v7505_v63 }
  0x95   :  { %718 = vmatprep.subr.mxu0 %v4881_v0  ;;  %808 = vmatprep.subr.mxu1 %v4881_v0 }
  0x96   :  { %721 = vmatpush1.msra.mxu0 %v7532_v18  ;;  %809 = vmatpush1.msra.mxu1 %v5034_v42  ;;  %v7539_v42 = vand.u32 4294901760, %v7507_v32  ;;  %v5745_v18 = vunpack.c.l.bf16 %v4529_v13 }
  0x97   :  { %730 = vmatprep.subr.mxu0 %v4881_v0  ;;  %810 = vmatprep.subr.mxu1 %v4881_v0 }
  0x98   :  { %733 = vmatpush2.msra.mxu0 %v7533_v23  ;;  %811 = vmatpush1.msra.mxu1 %v5054_v50  ;;  %v4533_v50 = vld [vmem:[%s7358_s1 + $0xa0] sm:$0xff]   ;;  %v5779_v58 = vsub.f32 %v5745_v18, %v5745_v18 }
  0x99   :  { %734 = vmatprep.subr.mxu0 %v4881_v0  ;;  %812 = vmatprep.subr.mxu1 %v4881_v0  ;;  %v5629_v2 = vunpack.c.l.bf16 %v4533_v50 }
  0x9a   :  { %737 = vmatpush2.msra.mxu0 %v7534_v24  ;;  %813 = vmatpush1.msra.mxu1 %v5074_v57  ;;  %v5615_v57 = vunpack.c.h.bf16 %v4533_v50 }
  0x9b   :  { %738 = vmatprep.subr.mxu0 %v4881_v0  ;;  %814 = vmatprep.subr.mxu1 %v4881_v0  ;;  %v5659_v31 = vsub.f32 %v5629_v2, %v5629_v2 }
  0x9c   :  { %741 = vmatpush2.msra.mxu0 %v7535_v25  ;;  %815 = vmatpush1.msra.mxu1 %v5083_v61  ;;  %v5622_v61 = vsub.f32 %v5598_v47, %v5598_v47  ;;  %v5645_v33 = vsub.f32 %v5615_v57, %v5615_v57 }
  0x9d   :  { %742 = vmatprep.subr.mxu0 %v4881_v0  ;;  %816 = vmatprep.subr.mxu1 %v4881_v0 }
  0x9e   :  { %745 = vmatpush2.msra.mxu0 %v7536_v30  ;;  %817 = vmatpush1.msra.mxu1 %v5100_v16  ;;  %v5633_v16 = vsub.f32 %v5608_v52, %v5608_v52  ;;  %v7432_v29 = vand.u32 4294901760, %v5622_v61  ;;  %v7430_v63 = vand.u32 4294901760, %v5645_v33 }
  0x9f   :  { %746 = vmatprep.subr.mxu0 %v4881_v0  ;;  %826 = vmatprep.subr.mxu1 %v4881_v0 }
  0xa0   :  { %749 = vmatpush2.msra.mxu0 %v7537_v37  ;;  %827 = vmatpush2.msra.mxu1 %v5108_v27  ;;  %v7544_v27 = vand.u32 4294901760, %v5327_v22  ;;  %v7431_v22 = vand.u32 4294901760, %v5633_v16  ;;  %v947_v62 = vsub.f32 %v5622_v61, %v7432_v29  ;;  %v5758_v37 = vunpack.c.h.bf16 %v4528_v11 }
  0xa1   :  { %750 = vmatprep.subr.mxu0 %v4881_v0  ;;  %828 = vmatprep.subr.mxu1 %v4881_v0 }
  0xa2   :  { %753 = vmatpush2.msra.mxu0 %v7538_v40  ;;  %829 = vmatpush2.msra.mxu1 %v7506_v53  ;;  %v5682_v53 = vsub.f32 %v5649_v45, %v5649_v45  ;;  %v953_v32 = vsub.f32 %v5633_v16, %v7431_v22  ;;  %v4536_v22 = vld [vmem:[%s7358_s1 + $0xb8] sm:$0xff]  }
  0xa3   :  { %754 = vmatprep.subr.mxu0 %v4881_v0  ;;  %830 = vmatprep.subr.mxu1 %v4881_v0 }
  0xa4   :  { %757 = vmatpush2.msra.mxu0 %v7539_v42  ;;  %831 = vmatpush2.msra.mxu1 %v7508_v8  ;;  %v5689_v8 = vunpack.c.l.bf16 %v4531_v48  ;;  %v954_v14 = vand.u32 4294901760, %v953_v32  ;;  %v5766_v42 = vsub.f32 %v5729_v6, %v5729_v6  ;;  %v5796_v32 = vunpack.c.l.bf16 %v4527_v41 }
  0xa5   :  { %758 = vmatprep.subr.mxu0 %v4881_v0  ;;  %832 = vmatprep.subr.mxu1 %v4881_v0 }
  0xa6   :  { %761 = vmatpush2.msra.mxu0 %v7540_v46  ;;  %833 = vmatpush2.msra.mxu1 %v7509_v60  ;;  %v7426_v60 = vand.u32 4294901760, %v5665_v49 }
  0xa7   :  { %762 = vmatprep.subr.mxu0 %v4881_v0  ;;  %834 = vmatprep.subr.mxu1 %v4881_v0 }
  0xa8   :  { %765 = vmatpush2.msra.mxu0 %v7541_v51  ;;  %835 = vmatpush2.msra.mxu1 %v7510_v3  ;;  %v948_v3 = vand.u32 4294901760, %v947_v62  ;;  %v971_v4 = vsub.f32 %v5665_v49, %v7426_v60  ;;  %v5774_v51 = vunpack.c.l.bf16 %v4528_v11  ;;  %v7416_v62 = vand.u32 4294901760, %v5766_v42 }
  0xa9   :  { %766 = vmatprep.subr.mxu0 %v4881_v0  ;;  %836 = vmatprep.subr.mxu1 %v4881_v0 }
  0xaa   :  { %769 = vmatpush2.msra.mxu0 %v7542_v54  ;;  %837 = vmatpush2.msra.mxu1 %v7511_v20  ;;  %v959_v20 = vsub.f32 %v5645_v33, %v7430_v63  ;;  %v972_v25 = vand.u32 4294901760, %v971_v4  ;;  %v5939_v63 = vunpack.c.h.bf16 %v4536_v22 }
  0xab   :  { %770 = vmatprep.subr.mxu0 %v4881_v0  ;;  %838 = vmatprep.subr.mxu1 %v4881_v0 }
  0xac   :  { %773 = vmatpush2.msra.mxu0 %v7543_v1  ;;  %839 = vmatpush2.msra.mxu1 %v7512_v34  ;;  %v960_v5 = vand.u32 4294901760, %v959_v20  ;;  %v5783_v1 = vunpack.c.h.bf16 %v4527_v41  ;;  %7551 = vst [vmem:[#allocation6_spill] sm:$0xff] %v5939_v63 }
  0xad   :  { %774 = vmatprep.subr.mxu0 %v4881_v0  ;;  %840 = vmatprep.subr.mxu1 %v4881_v0 }
  0xae   :  { %777 = vmatpush2.msra.mxu0 %v7544_v27  ;;  %779 = vmatprep.mubr.f32.mxu0 %v5232_v56  ;;  %v5814_v4 = vsub.f32 %v5783_v1, %v5783_v1 }
  0xaf   :  { %841 = vmatpush2.msra.mxu1 %v7513_v35  ;;  %781 = vmatmul.mubr.f32.vlgmr.msra.gmra.mxu0 %v5244_v21  ;;  %v5704_v35 = vsub.f32 %v5672_v19, %v5672_v19 }
  0xb0   :  { %842 = vmatprep.subr.mxu1 %v4881_v0  ;;  %864 = vmatprep.subr.mxu0 %v4881_v0 }
  0xb1   :  { %843 = vmatpush2.msra.mxu1 %v7514_v59  ;;  %865 = vmatpush1.msra.mxu0 %v5598_v47  ;;  %v4530_v59 = vld [vmem:[%s7358_s1 + $0x88] sm:$0xff]   ;;  %v7424_v7 = vand.u32 4294901760, %v5704_v35 }
  0xb2   :  { %844 = vmatprep.subr.mxu1 %v4881_v0  ;;  %866 = vmatprep.subr.mxu0 %v4881_v0  ;;  %v5700_v34 = vunpack.c.h.bf16 %v4530_v59  ;;  %v5717_v15 = vunpack.c.l.bf16 %v4530_v59  ;;  %v5792_v59 = vsub.f32 %v5758_v37, %v5758_v37 }
  0xb3   :  { %845 = vmatpush2.msra.mxu1 %v5264_v39  ;;  %867 = vmatpush1.msra.mxu0 %v5608_v52  ;;  %v7428_v39 = vand.u32 4294901760, %v5659_v31  ;;  %v983_v30 = vsub.f32 %v5704_v35, %v7424_v7 }
  0xb4   :  { %846 = vmatprep.subr.mxu1 %v4881_v0  ;;  %868 = vmatprep.subr.mxu0 %v4881_v0  ;;  %v5734_v9 = vsub.f32 %v5700_v34, %v5700_v34  ;;  %v5750_v24 = vsub.f32 %v5717_v15, %v5717_v15 }
  0xb5   :  { %847 = vmatpush2.msra.mxu1 %v5280_v36  ;;  %869 = vmatpush1.msra.mxu0 %v5615_v57  ;;  %v7425_v36 = vand.u32 4294901760, %v5682_v53  ;;  %v965_v43 = vsub.f32 %v5659_v31, %v7428_v39  ;;  %v984_v27 = vand.u32 4294901760, %v983_v30  ;;  %v5830_v30 = vsub.f32 %v5796_v32, %v5796_v32 }
  0xb6   :  { %848 = vmatprep.subr.mxu1 %v4881_v0  ;;  %870 = vmatprep.subr.mxu0 %v4881_v0  ;;  %v7420_v40 = vand.u32 4294901760, %v5734_v9  ;;  %v7419_v54 = vand.u32 4294901760, %v5750_v24 }
  0xb7   :  { %849 = vmatpush2.msra.mxu1 %v5293_v55  ;;  %851 = vmatprep.mubr.f32.mxu1 %v5232_v56  ;;  %v5721_v55 = vsub.f32 %v5689_v8, %v5689_v8  ;;  %v977_v10 = vsub.f32 %v5682_v53, %v7425_v36  ;;  %v966_v17 = vand.u32 4294901760, %v965_v43  ;;  %v5808_v43 = vsub.f32 %v5774_v51, %v5774_v51 }
  0xb8   :  { %871 = vmatpush1.msra.mxu0 %v5629_v2  ;;  %853 = vmatmul.mubr.f32.vlgmr.msra.gmra.mxu1 %v5244_v21  ;;  %v995_v48 = vsub.f32 %v5734_v9, %v7420_v40  ;;  %v1001_v13 = vsub.f32 %v5750_v24, %v7419_v54 }
  0xb9   :  { %872 = vmatprep.subr.mxu0 %v4881_v0  ;;  %944 = vmatprep.subr.mxu1 %v4881_v0  ;;  %v7421_v23 = vand.u32 4294901760, %v5721_v55  ;;  %v978_v46 = vand.u32 4294901760, %v977_v10  ;;  %v1007_v10 = vsub.f32 %v5766_v42, %v7416_v62 }
  0xba   :  { %873 = vmatpush1.msra.mxu0 %v5637_v26  ;;  %949 = vmatpush1.msra.mxu1 %v948_v3  ;;  %v4540_v3 = vld [vmem:[%s7358_s1 + $0xd8] sm:$0xff]   ;;  %v1002_v41 = vand.u32 4294901760, %v1001_v13 }
  0xbb   :  { %874 = vmatprep.subr.mxu0 %v4881_v0  ;;  %950 = vmatprep.subr.mxu1 %v4881_v0  ;;  %v989_v50 = vsub.f32 %v5721_v55, %v7421_v23  ;;  %v5820_v11 = vunpack.c.h.bf16 %v4540_v3  ;;  %v1008_v62 = vand.u32 4294901760, %v1007_v10 }
  0xbc   :  { %875 = vmatpush1.msra.mxu0 %v5649_v45  ;;  %955 = vmatpush1.msra.mxu1 %v954_v14  ;;  %v7417_v14 = vand.u32 4294901760, %v5779_v58 }
  0xbd   :  { %876 = vmatprep.subr.mxu0 %v4881_v0  ;;  %956 = vmatprep.subr.mxu1 %v4881_v0  ;;  %v990_v20 = vand.u32 4294901760, %v989_v50  ;;  %v5836_v50 = vunpack.c.l.bf16 %v4540_v3  ;;  %v5850_v3 = vsub.f32 %v5820_v11, %v5820_v11 }
  0xbe   :  { %877 = vmatpush1.msra.mxu0 %v5672_v19  ;;  %961 = vmatpush1.msra.mxu1 %v960_v5  ;;  %v996_v5 = vand.u32 4294901760, %v995_v48  ;;  %v7423_v48 = vand.u32 4294901760, %v5814_v4 }
  0xbf   :  { %878 = vmatprep.subr.mxu0 %v4881_v0  ;;  %962 = vmatprep.subr.mxu1 %v4881_v0  ;;  %7545 = vst [vmem:[#allocation9_spill] sm:$0xff] %v5836_v50  ;;  %v5866_v40 = vsub.f32 %v5836_v50, %v5836_v50 }
  0xc0   :  { %879 = vmatpush1.msra.mxu0 %v5689_v8  ;;  %967 = vmatpush1.msra.mxu1 %v966_v17  ;;  %v7418_v17 = vand.u32 4294901760, %v5792_v59  ;;  %v1031_v23 = vsub.f32 %v5814_v4, %v7423_v48 }
  0xc1   :  { %880 = vmatprep.subr.mxu0 %v4881_v0  ;;  %968 = vmatprep.subr.mxu1 %v4881_v0  ;;  %v7433_v36 = vand.u32 4294901760, %v5866_v40 }
  0xc2   :  { %881 = vmatpush1.msra.mxu0 %v5700_v34  ;;  %973 = vmatpush1.msra.mxu1 %v972_v25  ;;  %v4539_v25 = vld [vmem:[%s7358_s1 + $0xd0] sm:$0xff]  }
  0xc3   :  { %882 = vmatprep.subr.mxu0 %v4881_v0  ;;  %974 = vmatprep.subr.mxu1 %v4881_v0  ;;  %v5846_v13 = vunpack.c.h.bf16 %v4539_v25  ;;  %v5862_v54 = vunpack.c.l.bf16 %v4539_v25  ;;  %v7429_v25 = vand.u32 4294901760, %v5850_v3 }
  0xc4   :  { %883 = vmatpush1.msra.mxu0 %v5717_v15  ;;  %979 = vmatpush1.msra.mxu1 %v978_v46  ;;  %v1013_v46 = vsub.f32 %v5779_v58, %v7417_v14  ;;  %v7427_v14 = vand.u32 4294901760, %v5830_v30 }
  0xc5   :  { %884 = vmatprep.subr.mxu0 %v4881_v0  ;;  %980 = vmatprep.subr.mxu1 %v4881_v0  ;;  %7546 = vst [vmem:[#allocation2_spill] sm:$0xff] %v5846_v13  ;;  %7547 = vst [vmem:[#allocation10_spill] sm:$0xff] %v5862_v54  ;;  %v5895_v60 = vsub.f32 %v5862_v54, %v5862_v54 }
  0xc6   :  { %885 = vmatpush1.msra.mxu0 %v5729_v6  ;;  %985 = vmatpush1.msra.mxu1 %v984_v27  ;;  %v7422_v27 = vand.u32 4294901760, %v5808_v43  ;;  %v1014_v10 = vand.u32 4294901760, %v1013_v46  ;;  %v1037_v48 = vsub.f32 %v5830_v30, %v7427_v14  ;;  %v1032_v14 = vand.u32 4294901760, %v1031_v23 }
  0xc7   :  { %886 = vmatprep.subr.mxu0 %v4881_v0  ;;  %986 = vmatprep.subr.mxu1 %v4881_v0 }
  0xc8   :  { %887 = vmatpush1.msra.mxu0 %v5745_v18  ;;  %991 = vmatpush1.msra.mxu1 %v990_v20  ;;  %v1019_v20 = vsub.f32 %v5792_v59, %v7418_v17  ;;  %v1025_v17 = vsub.f32 %v5808_v43, %v7422_v27  ;;  %v5879_v27 = vsub.f32 %v5846_v13, %v5846_v13  ;;  %v1038_v23 = vand.u32 4294901760, %v1037_v48 }
  0xc9   :  { %888 = vmatprep.subr.mxu0 %v4881_v0  ;;  %992 = vmatprep.subr.mxu1 %v4881_v0 }
  0xca   :  { %889 = vmatpush1.msra.mxu0 %v5758_v37  ;;  %997 = vmatpush1.msra.mxu1 %v996_v5  ;;  %v4538_v5 = vld [vmem:[%s7358_s1 + $0xc8] sm:$0xff]  }
  0xcb   :  { %890 = vmatprep.subr.mxu0 %v4881_v0  ;;  %998 = vmatprep.subr.mxu1 %v4881_v0  ;;  %v5874_v46 = vunpack.c.h.bf16 %v4538_v5  ;;  %v5890_v7 = vunpack.c.l.bf16 %v4538_v5 }
  0xcc   :  { %891 = vmatpush1.msra.mxu0 %v5774_v51  ;;  %1003 = vmatpush1.msra.mxu1 %v1002_v41  ;;  %v1020_v41 = vand.u32 4294901760, %v1019_v20  ;;  %v1026_v20 = vand.u32 4294901760, %v1025_v17  ;;  %v1051_v17 = vsub.f32 %v5850_v3, %v7429_v25 }
  0xcd   :  { %892 = vmatprep.subr.mxu0 %v4881_v0  ;;  %1004 = vmatprep.subr.mxu1 %v4881_v0  ;;  %7548 = vst [vmem:[#allocation3_spill] sm:$0xff] %v5874_v46  ;;  %v5908_v39 = vsub.f32 %v5874_v46, %v5874_v46  ;;  %v5924_v29 = vsub.f32 %v5890_v7, %v5890_v7 }
  0xce   :  { %893 = vmatpush1.msra.mxu0 %v5783_v1  ;;  %1009 = vmatpush1.msra.mxu1 %v1008_v62  ;;  %v4537_v62 = vld [vmem:[%s7358_s1 + $0xc0] sm:$0xff]   ;;  %v1052_v48 = vand.u32 4294901760, %v1051_v17  ;;  %v7552_v17 = vand.u32 4294901760, %v5895_v60 }
  0xcf   :  { %894 = vmatprep.subr.mxu0 %v4881_v0  ;;  %1010 = vmatprep.subr.mxu1 %v4881_v0  ;;  %v5903_v5 = vunpack.c.h.bf16 %v4537_v62  ;;  %v5916_v25 = vunpack.c.l.bf16 %v4537_v62 }
  0xd0   :  { %895 = vmatpush1.msra.mxu0 %v5796_v32  ;;  %1015 = vmatpush1.msra.mxu1 %v1014_v10  ;;  %v7434_v10 = vand.u32 4294901760, %v5879_v27 }
  0xd1   :  { %904 = vmatprep.subr.mxu0 %v4881_v0  ;;  %1016 = vmatprep.subr.mxu1 %v4881_v0  ;;  %7549 = vst [vmem:[#allocation4_spill] sm:$0xff] %v5903_v5  ;;  %7550 = vst [vmem:[#allocation5_spill] sm:$0xff] %v5916_v25  ;;  %v5951_v12 = vsub.f32 %v5916_v25, %v5916_v25 }
  0xd2   :  { %905 = vmatpush2.msra.mxu0 %v5820_v11  ;;  %1021 = vmatpush1.msra.mxu1 %v1020_v41  ;;  %v1057_v41 = vsub.f32 %v5866_v40, %v7433_v36  ;;  %v1063_v62 = vsub.f32 %v5879_v27, %v7434_v10  ;;  %v5935_v36 = vsub.f32 %v5903_v5, %v5903_v5 }
  0xd3   :  { %906 = vmatprep.subr.mxu0 %v4881_v0  ;;  %1022 = vmatprep.subr.mxu1 %v4881_v0  ;;  %v1069_v10 = vsub.f32 %v5895_v60, %v7552_v17  ;;  %v7553_v17 = vand.u32 4294901760, %v5908_v39 }
  0xd4   :  { %907 = vmatpush2.msra.mxu0 %v5836_v50  ;;  %1027 = vmatpush1.msra.mxu1 %v1026_v20 }
  0xd5   :  { %908 = vmatprep.subr.mxu0 %v4881_v0  ;;  %1028 = vmatprep.subr.mxu1 %v4881_v0  ;;  %v1075_v20 = vsub.f32 %v5908_v39, %v7553_v17 }
  0xd6   :  { %909 = vmatpush2.msra.mxu0 %v5846_v13  ;;  %1033 = vmatpush1.msra.mxu1 %v1032_v14  ;;  %v1058_v14 = vand.u32 4294901760, %v1057_v41  ;;  %v1064_v41 = vand.u32 4294901760, %v1063_v62  ;;  %v5964_v13 = vunpack.c.h.bf16 %v4535_v44  ;;  %v7554_v62 = vand.u32 4294901760, %v5924_v29 }
  0xd7   :  { %910 = vmatprep.subr.mxu0 %v4881_v0  ;;  %1034 = vmatprep.subr.mxu1 %v4881_v0 }
  0xd8   :  { %911 = vmatpush2.msra.mxu0 %v5862_v54  ;;  %1039 = vmatpush1.msra.mxu1 %v1038_v23  ;;  %v5955_v23 = vunpack.c.l.bf16 %v4536_v22  ;;  %v5968_v22 = vsub.f32 %v5939_v63, %v5939_v63  ;;  %v1081_v17 = vsub.f32 %v5924_v29, %v7554_v62 }
  0xd9   :  { %912 = vmatprep.subr.mxu0 %v4881_v0  ;;  %1048 = vmatprep.subr.mxu1 %v4881_v0 }
  0xda   :  { %913 = vmatpush2.msra.mxu0 %v5874_v46  ;;  %1053 = vmatpush2.msra.mxu1 %v1052_v48  ;;  %v1070_v48 = vand.u32 4294901760, %v1069_v10  ;;  %v5977_v46 = vunpack.c.l.bf16 %v4535_v44  ;;  %v5981_v50 = vsub.f32 %v5955_v23, %v5955_v23  ;;  %v1076_v10 = vand.u32 4294901760, %v1075_v20 }
  0xdb   :  { %914 = vmatprep.subr.mxu0 %v4881_v0  ;;  %1054 = vmatprep.subr.mxu1 %v4881_v0  ;;  %v5992_v44 = vsub.f32 %v5964_v13, %v5964_v13  ;;  %v7556_v20 = vand.u32 4294901760, %v5951_v12 }
  0xdc   :  { %915 = vmatpush2.msra.mxu0 %v5890_v7  ;;  %1059 = vmatpush2.msra.mxu1 %v1058_v14  ;;  %v7555_v14 = vand.u32 4294901760, %v5935_v36  ;;  %v6003_v54 = vsub.f32 %v5977_v46, %v5977_v46 }
  0xdd   :  { %916 = vmatprep.subr.mxu0 %v4881_v0  ;;  %1060 = vmatprep.subr.mxu1 %v4881_v0 }
  0xde   :  { %917 = vmatpush2.msra.mxu0 %v5903_v5  ;;  %1065 = vmatpush2.msra.mxu1 %v1064_v41  ;;  %v1087_v62 = vsub.f32 %v5935_v36, %v7555_v14  ;;  %v1082_v5 = vand.u32 4294901760, %v1081_v17  ;;  %v1093_v41 = vsub.f32 %v5951_v12, %v7556_v20  ;;  %v7450_v20 = vand.u32 4294901760, %v5992_v44 }
  0xdf   :  { %918 = vmatprep.subr.mxu0 %v4881_v0  ;;  %1066 = vmatprep.subr.mxu1 %v4881_v0 }
  0xe0   :  { %919 = vmatpush2.msra.mxu0 %v5916_v25  ;;  %1071 = vmatpush2.msra.mxu1 %v1070_v48  ;;  %v1088_v25 = vand.u32 4294901760, %v1087_v62  ;;  %v7557_v48 = vand.u32 4294901760, %v5968_v22  ;;  %v1094_v14 = vand.u32 4294901760, %v1093_v41 }
  0xe1   :  { %920 = vmatprep.subr.mxu0 %v4881_v0  ;;  %1072 = vmatprep.subr.mxu1 %v4881_v0 }
  0xe2   :  { %921 = vmatpush2.msra.mxu0 %v5939_v63  ;;  %1077 = vmatpush2.msra.mxu1 %v1076_v10  ;;  %v1099_v17 = vsub.f32 %v5968_v22, %v7557_v48  ;;  %v7558_v10 = vand.u32 4294901760, %v5981_v50  ;;  %v7449_v63 = vand.u32 4294901760, %v6003_v54 }
  0xe3   :  { %922 = vmatprep.subr.mxu0 %v4881_v0  ;;  %1078 = vmatprep.subr.mxu1 %v4881_v0 }
  0xe4   :  { %923 = vmatpush2.msra.mxu0 %v5955_v23  ;;  %1083 = vmatpush2.msra.mxu1 %v1082_v5  ;;  %v1105_v62 = vsub.f32 %v5981_v50, %v7558_v10  ;;  %v1100_v48 = vand.u32 4294901760, %v1099_v17  ;;  %v1111_v5 = vsub.f32 %v5992_v44, %v7450_v20  ;;  %v7567_v20 = vld [vmem:[#allocation6_spill] sm:$0xff] }
  0xe5   :  { %924 = vmatprep.subr.mxu0 %v4881_v0  ;;  %1084 = vmatprep.subr.mxu1 %v4881_v0 }
  0xe6   :  { %925 = vmatpush2.msra.mxu0 %v5964_v13  ;;  %1089 = vmatpush2.msra.mxu1 %v1088_v25  ;;  %v1106_v41 = vand.u32 4294901760, %v1105_v62  ;;  %v1117_v25 = vsub.f32 %v6003_v54, %v7449_v63  ;;  %v1112_v17 = vand.u32 4294901760, %v1111_v5  ;;  %v7566_v63 = vld [vmem:[#allocation13_spill] sm:$0xff] }
  0xe7   :  { %926 = vmatprep.subr.mxu0 %v4881_v0  ;;  %1090 = vmatprep.subr.mxu1 %v4881_v0 }
  0xe8   :  { %927 = vmatpush2.msra.mxu0 %v5977_v46  ;;  %1095 = vmatpush2.msra.mxu1 %v1094_v14  ;;  %v1118_v14 = vand.u32 4294901760, %v1117_v25  ;;  %v7559_v25 = vld [vmem:[#allocation9_spill] sm:$0xff] }
  0xe9   :  { %933 = vmatprep.mubr.f32.mxu0 %v5341_v28  ;;  %1096 = vmatprep.subr.mxu1 %v4881_v0 }
  0xea   :  { %1128 = vmatprep.subr.mxu0 %v4881_v0  ;;  %939 = vmatmul.mubr.f32.vlgmr.msra.gmra.mxu0 %v5348_v38  ;;  %v7568_v38 = vand.u32 4294901760, %v5622_v61 }
  0xeb   :  { %1101 = vmatpush2.msra.mxu1 %v1100_v48  ;;  %1130 = vmatpush1.msra.mxu0 %v5622_v61  ;;  %v7572_v61 = vand.u32 4294901760, %v5659_v31 }
  0xec   :  { %1102 = vmatprep.subr.mxu1 %v4881_v0  ;;  %1131 = vmatprep.subr.mxu0 %v4881_v0 }
  0xed   :  { %1107 = vmatpush2.msra.mxu1 %v1106_v41  ;;  %1133 = vmatpush1.msra.mxu0 %v5633_v16 }
  0xee   :  { %1108 = vmatprep.subr.mxu1 %v4881_v0  ;;  %1134 = vmatprep.subr.mxu0 %v4881_v0 }
  0xef   :  { %1113 = vmatpush2.msra.mxu1 %v1112_v17  ;;  %1136 = vmatpush1.msra.mxu0 %v5645_v33  ;;  %v7560_v17 = vld [vmem:[#allocation2_spill] sm:$0xff] }
  0xf0   :  { %1114 = vmatprep.subr.mxu1 %v4881_v0  ;;  %1137 = vmatprep.subr.mxu0 %v4881_v0 }
  0xf1   :  { %1119 = vmatpush2.msra.mxu1 %v1118_v14  ;;  %1121 = vmatprep.mubr.f32.mxu1 %v5232_v56  ;;  %v7561_v14 = vld [vmem:[#allocation10_spill] sm:$0xff] }
  0xf2   :  { %1139 = vmatpush1.msra.mxu0 %v5659_v31  ;;  %1123 = vmatmul.mubr.f32.vlgmr.msra.gmra.mxu1 %v5244_v21  ;;  %v7576_v31 = vand.u32 4294901760, %v5704_v35 }
  0xf3   :  { %1140 = vmatprep.subr.mxu0 %v4881_v0  ;;  %1230 = vmatprep.subr.mxu1 %v4881_v0 }
  0xf4   :  { %1142 = vmatpush1.msra.mxu0 %v5665_v49  ;;  %1231 = vmatpush1.msra.mxu1 %v5598_v47 }
  0xf5   :  { %1143 = vmatprep.subr.mxu0 %v4881_v0  ;;  %1232 = vmatprep.subr.mxu1 %v4881_v0 }
  0xf6   :  { %1145 = vmatpush1.msra.mxu0 %v5682_v53  ;;  %1233 = vmatpush1.msra.mxu1 %v5608_v52 }
  0xf7   :  { %1146 = vmatprep.subr.mxu0 %v4881_v0  ;;  %1234 = vmatprep.subr.mxu1 %v4881_v0 }
  0xf8   :  { %1148 = vmatpush1.msra.mxu0 %v5704_v35  ;;  %1235 = vmatpush1.msra.mxu1 %v5615_v57  ;;  %v7579_v35 = vand.u32 4294901760, %v5750_v24 }
  0xf9   :  { %1149 = vmatprep.subr.mxu0 %v4881_v0  ;;  %1236 = vmatprep.subr.mxu1 %v4881_v0 }
  0xfa   :  { %1151 = vmatpush1.msra.mxu0 %v5721_v55  ;;  %1237 = vmatpush1.msra.mxu1 %v5629_v2 }
  0xfb   :  { %1152 = vmatprep.subr.mxu0 %v4881_v0  ;;  %1238 = vmatprep.subr.mxu1 %v4881_v0 }
  0xfc   :  { %1154 = vmatpush1.msra.mxu0 %v5734_v9  ;;  %1239 = vmatpush1.msra.mxu1 %v5637_v26  ;;  %v292_v10 = vpop.f32.mrf.mxu0 }
  0xfd   :  { %1155 = vmatprep.subr.mxu0 %v4881_v0  ;;  %1240 = vmatprep.subr.mxu1 %v4881_v0 }
  0xfe   :  { %1157 = vmatpush1.msra.mxu0 %v5750_v24  ;;  %1241 = vmatpush1.msra.mxu1 %v5649_v45  ;;  %v294_v62 = vpop.f32.mrf.mxu0  ;;  %v7584_v24 = vand.u32 4294901760, %v5814_v4 }
  0xff   :  { %1158 = vmatprep.subr.mxu0 %v4881_v0  ;;  %1242 = vmatprep.subr.mxu1 %v4881_v0  ;;  %v7563_v62 = vld [vmem:[#allocation4_spill] sm:$0xff] }
 0x100   :  { %1160 = vmatpush1.msra.mxu0 %v5766_v42  ;;  %1243 = vmatpush1.msra.mxu1 %v5672_v19 }
 0x101   :  { %1161 = vmatprep.subr.mxu0 %v4881_v0  ;;  %1244 = vmatprep.subr.mxu1 %v4881_v0 }
 0x102   :  { %1163 = vmatpush1.msra.mxu0 %v5779_v58  ;;  %1245 = vmatpush1.msra.mxu1 %v5689_v8 }
 0x103   :  { %1164 = vmatprep.subr.mxu0 %v4881_v0  ;;  %1246 = vmatprep.subr.mxu1 %v4881_v0 }
 0x104   :  { %1166 = vmatpush1.msra.mxu0 %v5792_v59  ;;  %1247 = vmatpush1.msra.mxu1 %v5700_v34  ;;  %v476_v48 = vpop.f32.mrf.mxu1 }
 0x105   :  { %1167 = vmatprep.subr.mxu0 %v4881_v0  ;;  %1248 = vmatprep.subr.mxu1 %v4881_v0  ;;  %v6083_v5 = vadd.f32 %v476_v48, %v292_v10  ;;  %v7562_v10 = vld [vmem:[#allocation3_spill] sm:$0xff]  ;;  %v7564_v48 = vld [vmem:[#allocation12_spill] sm:$0xff] }
 0x106   :  { %1169 = vmatpush1.msra.mxu0 %v5808_v43  ;;  %1249 = vmatpush1.msra.mxu1 %v5717_v15  ;;  %v478_v41 = vpop.f32.mrf.mxu1 }
 0x107   :  { %1170 = vmatprep.subr.mxu0 %v4881_v0  ;;  %1250 = vmatprep.subr.mxu1 %v4881_v0  ;;  %v7565_v41 = vld [vmem:[#allocation5_spill] sm:$0xff] }
 0x108   :  { %1172 = vmatpush1.msra.mxu0 %v5814_v4  ;;  %1251 = vmatpush1.msra.mxu1 %v5729_v6  ;;  %v7596_v4 = vand.u32 4294901760, %v5992_v44 }
 0x109   :  { %1173 = vmatprep.subr.mxu0 %v4881_v0  ;;  %1252 = vmatprep.subr.mxu1 %v4881_v0 }
 0x10a   :  { %1175 = vmatpush1.msra.mxu0 %v5830_v30  ;;  %1253 = vmatpush1.msra.mxu1 %v5745_v18 }
 0x10b   :  { %1184 = vmatprep.subr.mxu0 %v4881_v0  ;;  %1254 = vmatprep.subr.mxu1 %v4881_v0 }
 0x10c   :  { %1186 = vmatpush2.msra.mxu0 %v5850_v3  ;;  %1255 = vmatpush1.msra.mxu1 %v5758_v37 }
 0x10d   :  { %1187 = vmatprep.subr.mxu0 %v4881_v0  ;;  %1256 = vmatprep.subr.mxu1 %v4881_v0 }
 0x10e   :  { %1189 = vmatpush2.msra.mxu0 %v5866_v40  ;;  %1257 = vmatpush1.msra.mxu1 %v5774_v51 }
 0x10f   :  { %1190 = vmatprep.subr.mxu0 %v4881_v0  ;;  %1258 = vmatprep.subr.mxu1 %v4881_v0 }
 0x110   :  { %1192 = vmatpush2.msra.mxu0 %v5879_v27  ;;  %1259 = vmatpush1.msra.mxu1 %v5783_v1 }
 0x111   :  { %1193 = vmatprep.subr.mxu0 %v4881_v0  ;;  %1260 = vmatprep.subr.mxu1 %v4881_v0 }
 0x112   :  { %1195 = vmatpush2.msra.mxu0 %v5895_v60  ;;  %1261 = vmatpush1.msra.mxu1 %v5796_v32 }
 0x113   :  { %1196 = vmatprep.subr.mxu0 %v4881_v0  ;;  %1270 = vmatprep.subr.mxu1 %v4881_v0 }
 0x114   :  { %1198 = vmatpush2.msra.mxu0 %v5908_v39  ;;  %1271 = vmatpush2.msra.mxu1 %v5820_v11 }
 0x115   :  { %1199 = vmatprep.subr.mxu0 %v4881_v0  ;;  %1272 = vmatprep.subr.mxu1 %v4881_v0 }
 0x116   :  { %1201 = vmatpush2.msra.mxu0 %v5924_v29  ;;  %1273 = vmatpush2.msra.mxu1 %v7559_v25 }
 0x117   :  { %1202 = vmatprep.subr.mxu0 %v4881_v0  ;;  %1274 = vmatprep.subr.mxu1 %v4881_v0 }
 0x118   :  { %1204 = vmatpush2.msra.mxu0 %v5935_v36  ;;  %1275 = vmatpush2.msra.mxu1 %v7560_v17 }
 0x119   :  { %1205 = vmatprep.subr.mxu0 %v4881_v0  ;;  %1276 = vmatprep.subr.mxu1 %v4881_v0 }
 0x11a   :  { %1207 = vmatpush2.msra.mxu0 %v5951_v12  ;;  %1277 = vmatpush2.msra.mxu1 %v7561_v14 }
 0x11b   :  { %1208 = vmatprep.subr.mxu0 %v4881_v0  ;;  %1278 = vmatprep.subr.mxu1 %v4881_v0 }
 0x11c   :  { %1210 = vmatpush2.msra.mxu0 %v5968_v22  ;;  %1279 = vmatpush2.msra.mxu1 %v7562_v10 }
 0x11d   :  { %1211 = vmatprep.subr.mxu0 %v4881_v0  ;;  %1280 = vmatprep.subr.mxu1 %v4881_v0 }
 0x11e   :  { %1213 = vmatpush2.msra.mxu0 %v5981_v50  ;;  %1281 = vmatpush2.msra.mxu1 %v5890_v7 }
 0x11f   :  { %1214 = vmatprep.subr.mxu0 %v4881_v0  ;;  %1282 = vmatprep.subr.mxu1 %v4881_v0 }
 0x120   :  { %1216 = vmatpush2.msra.mxu0 %v5992_v44  ;;  %1283 = vmatpush2.msra.mxu1 %v7563_v62 }
 0x121   :  { %1217 = vmatprep.subr.mxu0 %v4881_v0  ;;  %1284 = vmatprep.subr.mxu1 %v4881_v0 }
 0x122   :  { %1219 = vmatpush2.msra.mxu0 %v6003_v54  ;;  %1222 = vmatprep.mubr.f32.mxu0 %v7564_v48  ;;  %v7569_v48 = vand.u32 4294901760, %v5633_v16  ;;  %v7573_v16 = vld [vmem:[#allocation15_spill] sm:$0xff] }
 0x123   :  { %1285 = vmatpush2.msra.mxu1 %v7565_v41  ;;  %1225 = vmatmul.mubr.f32.vlgmr.msra.gmra.mxu0 %v7566_v63  ;;  %v7570_v63 = vand.u32 4294901760, %v5645_v33  ;;  %v7574_v33 = vand.u32 4294901760, %v5665_v49  ;;  %v7578_v49 = vand.u32 4294901760, %v5734_v9  ;;  %v7583_v9 = vand.u32 4294901760, %v5808_v43  ;;  %v4546_v43 = vld [vmem:[%s7358_s1 + $0x108] sm:$0xff]  }
 0x124   :  { %1286 = vmatprep.subr.mxu1 %v4881_v0  ;;  %1306 = vmatprep.subr.mxu0 %v4881_v0 }
 0x125   :  { %1287 = vmatpush2.msra.mxu1 %v7567_v20  ;;  %1309 = vmatpush1.msra.mxu0 %v7568_v38  ;;  %v7571_v38 = vld [vmem:[#allocation14_spill] sm:$0xff] }
 0x126   :  { %1288 = vmatprep.subr.mxu1 %v4881_v0  ;;  %1310 = vmatprep.subr.mxu0 %v4881_v0 }
 0x127   :  { %1289 = vmatpush2.msra.mxu1 %v5955_v23  ;;  %1313 = vmatpush1.msra.mxu0 %v7569_v48 }
 0x128   :  { %1290 = vmatprep.subr.mxu1 %v4881_v0  ;;  %1314 = vmatprep.subr.mxu0 %v4881_v0 }
 0x129   :  { %1291 = vmatpush2.msra.mxu1 %v5964_v13  ;;  %1317 = vmatpush1.msra.mxu0 %v7570_v63  ;;  %v7575_v63 = vand.u32 4294901760, %v5682_v53 }
 0x12a   :  { %1292 = vmatprep.subr.mxu1 %v4881_v0  ;;  %1318 = vmatprep.subr.mxu0 %v4881_v0 }
 0x12b   :  { %1293 = vmatpush2.msra.mxu1 %v5977_v46  ;;  %1297 = vmatprep.mubr.f32.mxu1 %v7571_v38 }
 0x12c   :  { %1321 = vmatpush1.msra.mxu0 %v7572_v61  ;;  %1301 = vmatmul.mubr.f32.vlgmr.msra.gmra.mxu1 %v7573_v16 }
 0x12d   :  { %1322 = vmatprep.subr.mxu0 %v4881_v0  ;;  %1434 = vmatprep.subr.mxu1 %v4881_v0 }
 0x12e   :  { %1325 = vmatpush1.msra.mxu0 %v7574_v33  ;;  %1435 = vmatpush1.msra.mxu1 %v5598_v47  ;;  %v7577_v47 = vand.u32 4294901760, %v5721_v55 }
 0x12f   :  { %1326 = vmatprep.subr.mxu0 %v4881_v0  ;;  %1436 = vmatprep.subr.mxu1 %v4881_v0 }
 0x130   :  { %1329 = vmatpush1.msra.mxu0 %v7575_v63  ;;  %1437 = vmatpush1.msra.mxu1 %v5608_v52 }
 0x131   :  { %1330 = vmatprep.subr.mxu0 %v4881_v0  ;;  %1438 = vmatprep.subr.mxu1 %v4881_v0 }
 0x132   :  { %1333 = vmatpush1.msra.mxu0 %v7576_v31  ;;  %1439 = vmatpush1.msra.mxu1 %v5615_v57 }
 0x133   :  { %1334 = vmatprep.subr.mxu0 %v4881_v0  ;;  %1440 = vmatprep.subr.mxu1 %v4881_v0 }
 0x134   :  { %1337 = vmatpush1.msra.mxu0 %v7577_v47  ;;  %1441 = vmatpush1.msra.mxu1 %v5629_v2  ;;  %v7580_v2 = vand.u32 4294901760, %v5766_v42  ;;  %v7591_v42 = vand.u32 4294901760, %v5924_v29  ;;  %v7593_v29 = vand.u32 4294901760, %v5951_v12  ;;  %v7595_v12 = vand.u32 4294901760, %v5981_v50 }
 0x135   :  { %1338 = vmatprep.subr.mxu0 %v4881_v0  ;;  %1442 = vmatprep.subr.mxu1 %v4881_v0  ;;  %v578_v52 = vpop.f32.mrf.mxu0  ;;  %v6315_v50 = vunpack.c.h.bf16 %v4546_v43 }
 0x136   :  { %1341 = vmatpush1.msra.mxu0 %v7578_v49  ;;  %1443 = vmatpush1.msra.mxu1 %v5637_v26  ;;  %v579_v57 = vadd.f32 %v578_v52, %v6083_v5  ;;  %v7581_v26 = vand.u32 4294901760, %v5779_v58  ;;  %v7594_v58 = vand.u32 4294901760, %v5968_v22  ;;  %v4543_v52 = vld [vmem:[%s7358_s1 + $0xf0] sm:$0xff]  }
 0x137   :  { %1342 = vmatprep.subr.mxu0 %v4881_v0  ;;  %1444 = vmatprep.subr.mxu1 %v4881_v0  ;;  %v580_v53 = vpop.f32.mrf.mxu0 }
 0x138   :  { %1345 = vmatpush1.msra.mxu0 %v7579_v35  ;;  %1445 = vmatpush1.msra.mxu1 %v5649_v45  ;;  %v7582_v45 = vand.u32 4294901760, %v5792_v59 }
 0x139   :  { %1346 = vmatprep.subr.mxu0 %v4881_v0  ;;  %1446 = vmatprep.subr.mxu1 %v4881_v0 }
 0x13a   :  { %1349 = vmatpush1.msra.mxu0 %v7580_v2  ;;  %1447 = vmatpush1.msra.mxu1 %v5672_v19 }
 0x13b   :  { %1350 = vmatprep.subr.mxu0 %v4881_v0  ;;  %1448 = vmatprep.subr.mxu1 %v4881_v0 }
 0x13c   :  { %1353 = vmatpush1.msra.mxu0 %v7581_v26  ;;  %1449 = vmatpush1.msra.mxu1 %v5689_v8 }
 0x13d   :  { %1354 = vmatprep.subr.mxu0 %v4881_v0  ;;  %1450 = vmatprep.subr.mxu1 %v4881_v0 }
 0x13e   :  { %1357 = vmatpush1.msra.mxu0 %v7582_v45  ;;  %1451 = vmatpush1.msra.mxu1 %v5700_v34  ;;  %v654_v55 = vpop.f32.mrf.mxu1  ;;  %v7585_v34 = vand.u32 4294901760, %v5830_v30  ;;  %v7597_v30 = vand.u32 4294901760, %v6003_v54  ;;  %v6327_v54 = vunpack.c.l.bf16 %v4546_v43  ;;  %v6405_v45 = vunpack.c.h.bf16 %v4543_v52 }
 0x13f   :  { %1358 = vmatprep.subr.mxu0 %v4881_v0  ;;  %1452 = vmatprep.subr.mxu1 %v4881_v0  ;;  %v6215_v19 = vadd.f32 %v654_v55, %v579_v57 }
 0x140   :  { %1361 = vmatpush1.msra.mxu0 %v7583_v9  ;;  %1453 = vmatpush1.msra.mxu1 %v5717_v15  ;;  %v656_v8 = vpop.f32.mrf.mxu1  ;;  %v7586_v15 = vand.u32 4294901760, %v5850_v3  ;;  %v4545_v3 = vld [vmem:[%s7358_s1 + $0x100] sm:$0xff]  }
 0x141   :  { %1362 = vmatprep.subr.mxu0 %v4881_v0  ;;  %1454 = vmatprep.subr.mxu1 %v4881_v0  ;;  %v4542_v8 = vld [vmem:[%s7358_s1 + $0xe8] sm:$0xff]  }
 0x142   :  { %1365 = vmatpush1.msra.mxu0 %v7584_v24  ;;  %1455 = vmatpush1.msra.mxu1 %v5729_v6  ;;  %v7587_v6 = vand.u32 4294901760, %v5866_v40  ;;  %v7590_v40 = vand.u32 4294901760, %v5908_v39  ;;  %v4548_v39 = vld [vmem:[%s7358_s1 + $0x118] sm:$0xff]  }
 0x143   :  { %1366 = vmatprep.subr.mxu0 %v4881_v0  ;;  %1456 = vmatprep.subr.mxu1 %v4881_v0 }
 0x144   :  { %1369 = vmatpush1.msra.mxu0 %v7585_v34  ;;  %1457 = vmatpush1.msra.mxu1 %v5745_v18  ;;  %v7588_v18 = vand.u32 4294901760, %v5879_v27  ;;  %v6420_v34 = vunpack.c.l.bf16 %v4543_v52 }
 0x145   :  { %1378 = vmatprep.subr.mxu0 %v4881_v0  ;;  %1458 = vmatprep.subr.mxu1 %v4881_v0 }
 0x146   :  { %1381 = vmatpush2.msra.mxu0 %v7586_v15  ;;  %1459 = vmatpush1.msra.mxu1 %v5758_v37  ;;  %v7589_v37 = vand.u32 4294901760, %v5895_v60  ;;  %v7592_v60 = vand.u32 4294901760, %v5935_v36  ;;  %v4547_v36 = vld [vmem:[%s7358_s1 + $0x110] sm:$0xff]   ;;  %v6454_v43 = vsub.f32 %v6420_v34, %v6420_v34 }
 0x147   :  { %1382 = vmatprep.subr.mxu0 %v4881_v0  ;;  %1460 = vmatprep.subr.mxu1 %v4881_v0  ;;  %v6290_v59 = vunpack.c.h.bf16 %v4547_v36 }
 0x148   :  { %1385 = vmatpush2.msra.mxu0 %v7587_v6  ;;  %1461 = vmatpush1.msra.mxu1 %v5774_v51  ;;  %v6273_v51 = vunpack.c.h.bf16 %v4548_v39 }
 0x149   :  { %1386 = vmatprep.subr.mxu0 %v4881_v0  ;;  %1462 = vmatprep.subr.mxu1 %v4881_v0  ;;  %v6323_v22 = vsub.f32 %v6290_v59, %v6290_v59 }
 0x14a   :  { %1389 = vmatpush2.msra.mxu0 %v7588_v18  ;;  %1463 = vmatpush1.msra.mxu1 %v5783_v1  ;;  %v6283_v1 = vunpack.c.l.bf16 %v4548_v39  ;;  %v4541_v39 = vld [vmem:[%s7358_s1 + $0xe0] sm:$0xff]  }
 0x14b   :  { %1390 = vmatprep.subr.mxu0 %v4881_v0  ;;  %1464 = vmatprep.subr.mxu1 %v4881_v0  ;;  %v6472_v52 = vunpack.c.l.bf16 %v4541_v39 }
 0x14c   :  { %1393 = vmatpush2.msra.mxu0 %v7589_v37  ;;  %1465 = vmatpush1.msra.mxu1 %v5796_v32  ;;  %v6294_v32 = vsub.f32 %v6273_v51, %v6273_v51 }
 0x14d   :  { %1394 = vmatprep.subr.mxu0 %v4881_v0  ;;  %1474 = vmatprep.subr.mxu1 %v4881_v0 }
 0x14e   :  { %1397 = vmatpush2.msra.mxu0 %v7590_v40  ;;  %1475 = vmatpush2.msra.mxu1 %v5820_v11  ;;  %v6308_v11 = vsub.f32 %v6283_v1, %v6283_v1  ;;  %v7468_v27 = vand.u32 4294901760, %v6294_v32  ;;  %v6433_v40 = vunpack.c.h.bf16 %v4542_v8 }
 0x14f   :  { %1398 = vmatprep.subr.mxu0 %v4881_v0  ;;  %1476 = vmatprep.subr.mxu1 %v4881_v0 }
 0x150   :  { %1401 = vmatpush2.msra.mxu0 %v7591_v42  ;;  %1477 = vmatpush2.msra.mxu1 %v7559_v25  ;;  %v7467_v44 = vand.u32 4294901760, %v6308_v11  ;;  %v6338_v25 = vunpack.c.h.bf16 %v4545_v3 }
 0x151   :  { %1402 = vmatprep.subr.mxu0 %v4881_v0  ;;  %1478 = vmatprep.subr.mxu1 %v4881_v0 }
 0x152   :  { %1405 = vmatpush2.msra.mxu0 %v7592_v60  ;;  %1479 = vmatpush2.msra.mxu1 %v7560_v17  ;;  %v1595_v17 = vsub.f32 %v6294_v32, %v7468_v27  ;;  %v1601_v48 = vsub.f32 %v6308_v11, %v7467_v44  ;;  %v6371_v61 = vsub.f32 %v6338_v25, %v6338_v25  ;;  %v4550_v44 = vld [vmem:[%s7358_s1 + $0x128] sm:$0xff]  }
 0x153   :  { %1406 = vmatprep.subr.mxu0 %v4881_v0  ;;  %1480 = vmatprep.subr.mxu1 %v4881_v0  ;;  %v6441_v60 = vsub.f32 %v6405_v45, %v6405_v45 }
 0x154   :  { %1409 = vmatpush2.msra.mxu0 %v7593_v29  ;;  %1481 = vmatpush2.msra.mxu1 %v7561_v14  ;;  %v7466_v14 = vand.u32 4294901760, %v6323_v22  ;;  %v1596_v33 = vand.u32 4294901760, %v1595_v17  ;;  %v1602_v49 = vand.u32 4294901760, %v1601_v48  ;;  %v7458_v35 = vand.u32 4294901760, %v6371_v61 }
 0x155   :  { %1410 = vmatprep.subr.mxu0 %v4881_v0  ;;  %1482 = vmatprep.subr.mxu1 %v4881_v0  ;;  %v7452_v48 = vand.u32 4294901760, %v6441_v60 }
 0x156   :  { %1413 = vmatpush2.msra.mxu0 %v7594_v58  ;;  %1483 = vmatpush2.msra.mxu1 %v7562_v10  ;;  %v6348_v10 = vsub.f32 %v6315_v50, %v6315_v50  ;;  %v1607_v63 = vsub.f32 %v6323_v22, %v7466_v14  ;;  %v1631_v18 = vsub.f32 %v6371_v61, %v7458_v35  ;;  %v6449_v58 = vunpack.c.l.bf16 %v4542_v8 }
 0x157   :  { %1414 = vmatprep.subr.mxu0 %v4881_v0  ;;  %1484 = vmatprep.subr.mxu1 %v4881_v0  ;;  %v6617_v14 = vunpack.c.h.bf16 %v4550_v44 }
 0x158   :  { %1417 = vmatpush2.msra.mxu0 %v7595_v12  ;;  %1485 = vmatpush2.msra.mxu1 %v5890_v7  ;;  %v6304_v7 = vunpack.c.l.bf16 %v4547_v36  ;;  %v7462_v47 = vand.u32 4294901760, %v6348_v10  ;;  %v1608_v2 = vand.u32 4294901760, %v1607_v63 }
 0x159   :  { %1418 = vmatprep.subr.mxu0 %v4881_v0  ;;  %1486 = vmatprep.subr.mxu1 %v4881_v0  ;;  %7604 = vst [vmem:[#allocation3_spill] sm:$0xff] %v6617_v14 }
 0x15a   :  { %1421 = vmatpush2.msra.mxu0 %v7596_v4  ;;  %1487 = vmatpush2.msra.mxu1 %v7563_v62  ;;  %v6334_v5 = vsub.f32 %v6304_v7, %v6304_v7  ;;  %v6357_v62 = vsub.f32 %v6327_v54, %v6327_v54  ;;  %v1619_v26 = vsub.f32 %v6348_v10, %v7462_v47  ;;  %v1632_v4 = vand.u32 4294901760, %v1631_v18 }
 0x15b   :  { %1422 = vmatprep.subr.mxu0 %v4881_v0  ;;  %1488 = vmatprep.subr.mxu1 %v4881_v0 }
 0x15c   :  { %1425 = vmatpush2.msra.mxu0 %v7597_v30  ;;  %1427 = vmatprep.mubr.f32.mxu0 %v5232_v56  ;;  %v1620_v37 = vand.u32 4294901760, %v1619_v26  ;;  %v6484_v26 = vsub.f32 %v6449_v58, %v6449_v58 }
 0x15d   :  { %1489 = vmatpush2.msra.mxu1 %v7565_v41  ;;  %1429 = vmatmul.mubr.f32.vlgmr.msra.gmra.mxu0 %v5244_v21  ;;  %v6364_v41 = vunpack.c.l.bf16 %v4545_v3  ;;  %v6458_v3 = vunpack.c.h.bf16 %v4541_v39  ;;  %v4553_v39 = vld [vmem:[%s7358_s1 + $0x140] sm:$0xff]  }
 0x15e   :  { %1490 = vmatprep.subr.mxu1 %v4881_v0  ;;  %1512 = vmatprep.subr.mxu0 %v4881_v0  ;;  %v6540_v35 = vunpack.c.l.bf16 %v4553_v39 }
 0x15f   :  { %1491 = vmatpush2.msra.mxu1 %v7567_v20  ;;  %1513 = vmatpush1.msra.mxu0 %v6273_v51  ;;  %v4544_v20 = vld [vmem:[%s7358_s1 + $0xf8] sm:$0xff]  }
 0x160   :  { %1492 = vmatprep.subr.mxu1 %v4881_v0  ;;  %1514 = vmatprep.subr.mxu0 %v4881_v0  ;;  %v6378_v31 = vunpack.c.h.bf16 %v4544_v20  ;;  %v6392_v53 = vunpack.c.l.bf16 %v4544_v20  ;;  %7600 = vst [vmem:[#allocation11_spill] sm:$0xff] %v6540_v35  ;;  %v6573_v47 = vsub.f32 %v6540_v35, %v6540_v35 }
 0x161   :  { %1493 = vmatpush2.msra.mxu1 %v5955_v23  ;;  %1515 = vmatpush1.msra.mxu0 %v6283_v1  ;;  %v7464_v23 = vand.u32 4294901760, %v6334_v5 }
 0x162   :  { %1494 = vmatprep.subr.mxu1 %v4881_v0  ;;  %1516 = vmatprep.subr.mxu0 %v4881_v0  ;;  %v6409_v55 = vsub.f32 %v6378_v31, %v6378_v31  ;;  %v6425_v6 = vsub.f32 %v6392_v53, %v6392_v53 }
 0x163   :  { %1495 = vmatpush2.msra.mxu1 %v5964_v13  ;;  %1517 = vmatpush1.msra.mxu0 %v6290_v59  ;;  %v7461_v13 = vand.u32 4294901760, %v6357_v62  ;;  %v1613_v57 = vsub.f32 %v6334_v5, %v7464_v23 }
 0x164   :  { %1496 = vmatprep.subr.mxu1 %v4881_v0  ;;  %1518 = vmatprep.subr.mxu0 %v4881_v0  ;;  %v7456_v42 = vand.u32 4294901760, %v6409_v55  ;;  %v7454_v12 = vand.u32 4294901760, %v6425_v6 }
 0x165   :  { %1497 = vmatpush2.msra.mxu1 %v5977_v46  ;;  %1499 = vmatprep.mubr.f32.mxu1 %v5232_v56  ;;  %v6396_v46 = vsub.f32 %v6364_v41, %v6364_v41  ;;  %v1625_v9 = vsub.f32 %v6357_v62, %v7461_v13  ;;  %v1614_v24 = vand.u32 4294901760, %v1613_v57 }
 0x166   :  { %1519 = vmatpush1.msra.mxu0 %v6304_v7  ;;  %1501 = vmatmul.mubr.f32.vlgmr.msra.gmra.mxu1 %v5244_v21  ;;  %v1643_v20 = vsub.f32 %v6409_v55, %v7456_v42  ;;  %v1649_v57 = vsub.f32 %v6425_v6, %v7454_v12 }
 0x167   :  { %1520 = vmatprep.subr.mxu0 %v4881_v0  ;;  %1592 = vmatprep.subr.mxu1 %v4881_v0  ;;  %v7457_v15 = vand.u32 4294901760, %v6396_v46  ;;  %v1626_v29 = vand.u32 4294901760, %v1625_v9  ;;  %v6490_v9 = vsub.f32 %v6458_v3, %v6458_v3 }
 0x168   :  { %1521 = vmatpush1.msra.mxu0 %v6315_v50  ;;  %1597 = vmatpush1.msra.mxu1 %v1596_v33  ;;  %v6468_v33 = vsub.f32 %v6433_v40, %v6433_v40  ;;  %v1644_v8 = vand.u32 4294901760, %v1643_v20  ;;  %v7460_v20 = vand.u32 4294901760, %v6484_v26 }
 0x169   :  { %1522 = vmatprep.subr.mxu0 %v4881_v0  ;;  %1598 = vmatprep.subr.mxu1 %v4881_v0  ;;  %v1637_v36 = vsub.f32 %v6396_v46, %v7457_v15 }
 0x16a   :  { %1523 = vmatpush1.msra.mxu0 %v6327_v54  ;;  %1603 = vmatpush1.msra.mxu1 %v1602_v49  ;;  %v1673_v15 = vsub.f32 %v6484_v26, %v7460_v20 }
 0x16b   :  { %1524 = vmatprep.subr.mxu0 %v4881_v0  ;;  %1604 = vmatprep.subr.mxu1 %v4881_v0  ;;  %v1638_v49 = vand.u32 4294901760, %v1637_v36  ;;  %v1650_v36 = vand.u32 4294901760, %v1649_v57 }
 0x16c   :  { %1525 = vmatpush1.msra.mxu0 %v6338_v25  ;;  %1609 = vmatpush1.msra.mxu1 %v1608_v2  ;;  %v7453_v2 = vand.u32 4294901760, %v6454_v43 }
 0x16d   :  { %1526 = vmatprep.subr.mxu0 %v4881_v0  ;;  %1610 = vmatprep.subr.mxu1 %v4881_v0 }
 0x16e   :  { %1527 = vmatpush1.msra.mxu0 %v6364_v41  ;;  %1615 = vmatpush1.msra.mxu1 %v1614_v24  ;;  %v1655_v24 = vsub.f32 %v6441_v60, %v7452_v48 }
 0x16f   :  { %1528 = vmatprep.subr.mxu0 %v4881_v0  ;;  %1616 = vmatprep.subr.mxu1 %v4881_v0  ;;  %v782_v30 = vpop.f32.mrf.mxu0 }
 0x170   :  { %1529 = vmatpush1.msra.mxu0 %v6378_v31  ;;  %1621 = vmatpush1.msra.mxu1 %v1620_v37  ;;  %v783_v17 = vadd.f32 %v782_v30, %v6215_v19  ;;  %v4554_v19 = vld [vmem:[%s7358_s1 + $0x148] sm:$0xff]   ;;  %v7455_v37 = vand.u32 4294901760, %v6468_v33  ;;  %v1656_v48 = vand.u32 4294901760, %v1655_v24  ;;  %v4552_v24 = vld [vmem:[%s7358_s1 + $0x138] sm:$0xff]  }
 0x171   :  { %1530 = vmatprep.subr.mxu0 %v4881_v0  ;;  %1622 = vmatprep.subr.mxu1 %v4881_v0  ;;  %v784_v63 = vpop.f32.mrf.mxu0  ;;  %v6496_v18 = vunpack.c.h.bf16 %v4554_v19  ;;  %v6512_v30 = vunpack.c.l.bf16 %v4554_v19  ;;  %v6568_v20 = vunpack.c.l.bf16 %v4552_v24 }
 0x172   :  { %1531 = vmatpush1.msra.mxu0 %v6392_v53  ;;  %1627 = vmatpush1.msra.mxu1 %v1626_v29  ;;  %v6506_v29 = vsub.f32 %v6472_v52, %v6472_v52  ;;  %v7459_v63 = vand.u32 4294901760, %v6490_v9  ;;  %v1667_v57 = vsub.f32 %v6468_v33, %v7455_v37 }
 0x173   :  { %1532 = vmatprep.subr.mxu0 %v4881_v0  ;;  %1628 = vmatprep.subr.mxu1 %v4881_v0  ;;  %v6526_v19 = vsub.f32 %v6496_v18, %v6496_v18  ;;  %v6602_v27 = vsub.f32 %v6568_v20, %v6568_v20 }
 0x174   :  { %1533 = vmatpush1.msra.mxu0 %v6405_v45  ;;  %1633 = vmatpush1.msra.mxu1 %v1632_v4  ;;  %v1661_v4 = vsub.f32 %v6454_v43, %v7453_v2  ;;  %v6522_v2 = vunpack.c.h.bf16 %v4553_v39 }
 0x175   :  { %1534 = vmatprep.subr.mxu0 %v4881_v0  ;;  %1634 = vmatprep.subr.mxu1 %v4881_v0  ;;  %v7465_v39 = vand.u32 4294901760, %v6526_v19 }
 0x176   :  { %1535 = vmatpush1.msra.mxu0 %v6420_v34  ;;  %1639 = vmatpush1.msra.mxu1 %v1638_v49  ;;  %7598 = vst [vmem:[#allocation7_spill] sm:$0xff] %v6522_v2  ;;  %v1662_v37 = vand.u32 4294901760, %v1661_v4  ;;  %v6552_v4 = vunpack.c.h.bf16 %v4552_v24 }
 0x177   :  { %1536 = vmatprep.subr.mxu0 %v4881_v0  ;;  %1640 = vmatprep.subr.mxu1 %v4881_v0 }
 0x178   :  { %1537 = vmatpush1.msra.mxu0 %v6433_v40  ;;  %1645 = vmatpush1.msra.mxu1 %v1644_v8  ;;  %v854_v49 = vpop.f32.mrf.mxu1  ;;  %v7463_v8 = vand.u32 4294901760, %v6506_v29  ;;  %7601 = vst [vmem:[#allocation9_spill] sm:$0xff] %v6552_v4  ;;  %v6586_v23 = vsub.f32 %v6552_v4, %v6552_v4 }
 0x179   :  { %1538 = vmatprep.subr.mxu0 %v4881_v0  ;;  %1646 = vmatprep.subr.mxu1 %v4881_v0  ;;  %v6530_v12 = vadd.f32 %v854_v49, %v783_v17  ;;  %v6544_v17 = vsub.f32 %v6512_v30, %v6512_v30  ;;  %v6557_v49 = vsub.f32 %v6522_v2, %v6522_v2 }
 0x17a   :  { %1539 = vmatpush1.msra.mxu0 %v6449_v58  ;;  %1651 = vmatpush1.msra.mxu1 %v1650_v36  ;;  %v856_v42 = vpop.f32.mrf.mxu1  ;;  %v1679_v36 = vsub.f32 %v6490_v9, %v7459_v63  ;;  %v1685_v63 = vsub.f32 %v6506_v29, %v7463_v8 }
 0x17b   :  { %7599 = vst [vmem:[#allocation8_spill] sm:$0xff] %v6530_v12  ;;  %1540 = vmatprep.subr.mxu0 %v4881_v0  ;;  %1652 = vmatprep.subr.mxu1 %v4881_v0  ;;  %v1668_v42 = vand.u32 4294901760, %v1667_v57  ;;  %v1674_v57 = vand.u32 4294901760, %v1673_v15  ;;  %v7469_v13 = vand.u32 4294901760, %v6544_v17  ;;  %v1699_v15 = vsub.f32 %v6526_v19, %v7465_v39  ;;  %v4549_v12 = vld [vmem:[%s7358_s1 + $0x120] sm:$0xff]  }
 0x17c   :  { %1541 = vmatpush1.msra.mxu0 %v6458_v3  ;;  %1657 = vmatpush1.msra.mxu1 %v1656_v48  ;;  %v4551_v48 = vld [vmem:[%s7358_s1 + $0x130] sm:$0xff]   ;;  %v1680_v8 = vand.u32 4294901760, %v1679_v36  ;;  %v7470_v24 = vand.u32 4294901760, %v6557_v49  ;;  %v1686_v36 = vand.u32 4294901760, %v1685_v63 }
 0x17d   :  { %1542 = vmatprep.subr.mxu0 %v4881_v0  ;;  %1658 = vmatprep.subr.mxu1 %v4881_v0  ;;  %v6594_v39 = vunpack.c.l.bf16 %v4551_v48  ;;  %v1700_v63 = vand.u32 4294901760, %v1699_v15  ;;  %v7605_v15 = vand.u32 4294901760, %v6573_v47 }
 0x17e   :  { %1543 = vmatpush1.msra.mxu0 %v6472_v52  ;;  %1663 = vmatpush1.msra.mxu1 %v1662_v37  ;;  %v6581_v37 = vunpack.c.h.bf16 %v4551_v48  ;;  %v1711_v48 = vsub.f32 %v6557_v49, %v7470_v24 }
 0x17f   :  { %1552 = vmatprep.subr.mxu0 %v4881_v0  ;;  %1664 = vmatprep.subr.mxu1 %v4881_v0  ;;  %7603 = vst [vmem:[#allocation10_spill] sm:$0xff] %v6594_v39  ;;  %v1717_v24 = vsub.f32 %v6573_v47, %v7605_v15  ;;  %v6629_v16 = vsub.f32 %v6594_v39, %v6594_v39  ;;  %v7606_v15 = vand.u32 4294901760, %v6586_v23 }
 0x180   :  { %1553 = vmatpush2.msra.mxu0 %v6496_v18  ;;  %1669 = vmatpush1.msra.mxu1 %v1668_v42  ;;  %7602 = vst [vmem:[#allocation2_spill] sm:$0xff] %v6581_v37  ;;  %v1705_v42 = vsub.f32 %v6544_v17, %v7469_v13  ;;  %v6613_v13 = vsub.f32 %v6581_v37, %v6581_v37 }
 0x181   :  { %1554 = vmatprep.subr.mxu0 %v4881_v0  ;;  %1670 = vmatprep.subr.mxu1 %v4881_v0 }
 0x182   :  { %1555 = vmatpush2.msra.mxu0 %v6512_v30  ;;  %1675 = vmatpush1.msra.mxu1 %v1674_v57  ;;  %v1723_v57 = vsub.f32 %v6586_v23, %v7606_v15 }
 0x183   :  { %1556 = vmatprep.subr.mxu0 %v4881_v0  ;;  %1676 = vmatprep.subr.mxu1 %v4881_v0 }
 0x184   :  { %1557 = vmatpush2.msra.mxu0 %v6522_v2  ;;  %1681 = vmatpush1.msra.mxu1 %v1680_v8  ;;  %v1706_v8 = vand.u32 4294901760, %v1705_v42  ;;  %v1712_v42 = vand.u32 4294901760, %v1711_v48  ;;  %v7607_v48 = vand.u32 4294901760, %v6602_v27 }
 0x185   :  { %1558 = vmatprep.subr.mxu0 %v4881_v0  ;;  %1682 = vmatprep.subr.mxu1 %v4881_v0 }
 0x186   :  { %1559 = vmatpush2.msra.mxu0 %v6540_v35  ;;  %1687 = vmatpush1.msra.mxu1 %v1686_v36  ;;  %v6633_v36 = vunpack.c.l.bf16 %v4550_v44  ;;  %v6642_v35 = vunpack.c.h.bf16 %v4549_v12  ;;  %v6646_v44 = vsub.f32 %v6617_v14, %v6617_v14  ;;  %v1729_v15 = vsub.f32 %v6602_v27, %v7607_v48 }
 0x187   :  { %1560 = vmatprep.subr.mxu0 %v4881_v0  ;;  %1696 = vmatprep.subr.mxu1 %v4881_v0 }
 0x188   :  { %1561 = vmatpush2.msra.mxu0 %v6552_v4  ;;  %1701 = vmatpush2.msra.mxu1 %v1700_v63  ;;  %v1718_v63 = vand.u32 4294901760, %v1717_v24  ;;  %v6655_v4 = vunpack.c.l.bf16 %v4549_v12  ;;  %v6659_v2 = vsub.f32 %v6633_v36, %v6633_v36  ;;  %v1724_v24 = vand.u32 4294901760, %v1723_v57 }
 0x189   :  { %1562 = vmatprep.subr.mxu0 %v4881_v0  ;;  %1702 = vmatprep.subr.mxu1 %v4881_v0  ;;  %v6670_v12 = vsub.f32 %v6642_v35, %v6642_v35  ;;  %v7609_v57 = vand.u32 4294901760, %v6629_v16 }
 0x18a   :  { %1563 = vmatpush2.msra.mxu0 %v6568_v20  ;;  %1707 = vmatpush2.msra.mxu1 %v1706_v8  ;;  %v7608_v8 = vand.u32 4294901760, %v6613_v13  ;;  %v6681_v38 = vsub.f32 %v6655_v4, %v6655_v4 }
 0x18b   :  { %1564 = vmatprep.subr.mxu0 %v4881_v0  ;;  %1708 = vmatprep.subr.mxu1 %v4881_v0 }
 0x18c   :  { %1565 = vmatpush2.msra.mxu0 %v6581_v37  ;;  %1713 = vmatpush2.msra.mxu1 %v1712_v42  ;;  %v1735_v48 = vsub.f32 %v6613_v13, %v7608_v8  ;;  %v1730_v37 = vand.u32 4294901760, %v1729_v15  ;;  %v1741_v42 = vsub.f32 %v6629_v16, %v7609_v57  ;;  %v1758_v57 = vand.u32 4294901760, %v6670_v12 }
 0x18d   :  { %1566 = vmatprep.subr.mxu0 %v4881_v0  ;;  %1714 = vmatprep.subr.mxu1 %v4881_v0 }
 0x18e   :  { %1567 = vmatpush2.msra.mxu0 %v6594_v39  ;;  %1719 = vmatpush2.msra.mxu1 %v1718_v63  ;;  %v1736_v39 = vand.u32 4294901760, %v1735_v48  ;;  %v7610_v63 = vand.u32 4294901760, %v6646_v44  ;;  %v1742_v8 = vand.u32 4294901760, %v1741_v42 }
 0x18f   :  { %1568 = vmatprep.subr.mxu0 %v4881_v0  ;;  %1720 = vmatprep.subr.mxu1 %v4881_v0 }
 0x190   :  { %1569 = vmatpush2.msra.mxu0 %v6617_v14  ;;  %1725 = vmatpush2.msra.mxu1 %v1724_v24  ;;  %v1747_v15 = vsub.f32 %v6646_v44, %v7610_v63  ;;  %v7611_v24 = vand.u32 4294901760, %v6659_v2  ;;  %v7483_v14 = vand.u32 4294901760, %v6681_v38 }
 0x191   :  { %1570 = vmatprep.subr.mxu0 %v4881_v0  ;;  %1726 = vmatprep.subr.mxu1 %v4881_v0 }
 0x192   :  { %1571 = vmatpush2.msra.mxu0 %v6633_v36  ;;  %1731 = vmatpush2.msra.mxu1 %v1730_v37  ;;  %v1753_v48 = vsub.f32 %v6659_v2, %v7611_v24  ;;  %v1748_v63 = vand.u32 4294901760, %v1747_v15  ;;  %v1759_v37 = vsub.f32 %v6670_v12, %v1758_v57  ;;  %v7612_v24 = vld [vmem:[#allocation16_spill] sm:$0xff] }
 0x193   :  { %1572 = vmatprep.subr.mxu0 %v4881_v0  ;;  %1732 = vmatprep.subr.mxu1 %v4881_v0 }
 0x194   :  { %1573 = vmatpush2.msra.mxu0 %v6642_v35  ;;  %1737 = vmatpush2.msra.mxu1 %v1736_v39  ;;  %v1754_v42 = vand.u32 4294901760, %v1753_v48  ;;  %v1765_v39 = vsub.f32 %v6681_v38, %v7483_v14  ;;  %v1760_v15 = vand.u32 4294901760, %v1759_v37  ;;  %v7621_v14 = vand.u32 4294901760, %v6294_v32 }
 0x195   :  { %1574 = vmatprep.subr.mxu0 %v4881_v0  ;;  %1738 = vmatprep.subr.mxu1 %v4881_v0 }
 0x196   :  { %1575 = vmatpush2.msra.mxu0 %v6655_v4  ;;  %1743 = vmatpush2.msra.mxu1 %v1742_v8 }
 0x197   :  { %1581 = vmatprep.mubr.f32.mxu0 %v5341_v28  ;;  %1744 = vmatprep.subr.mxu1 %v4881_v0  ;;  %v1766_v28 = vand.u32 4294901760, %v1765_v39  ;;  %v7613_v39 = vld [vmem:[#allocation7_spill] sm:$0xff] }
 0x198   :  { %1776 = vmatprep.subr.mxu0 %v4881_v0  ;;  %1587 = vmatmul.mubr.f32.vlgmr.msra.gmra.mxu0 %v7612_v24  ;;  %v7614_v24 = vld [vmem:[#allocation11_spill] sm:$0xff] }
 0x199   :  { %1749 = vmatpush2.msra.mxu1 %v1748_v63  ;;  %1778 = vmatpush1.msra.mxu0 %v6294_v32  ;;  %v7624_v32 = vld [vmem:[#allocation14_spill] sm:$0xff] }
 0x19a   :  { %1750 = vmatprep.subr.mxu1 %v4881_v0  ;;  %1779 = vmatprep.subr.mxu0 %v4881_v0 }
 0x19b   :  { %1755 = vmatpush2.msra.mxu1 %v1754_v42  ;;  %1781 = vmatpush1.msra.mxu0 %v6308_v11 }
 0x19c   :  { %1756 = vmatprep.subr.mxu1 %v4881_v0  ;;  %1782 = vmatprep.subr.mxu0 %v4881_v0 }
 0x19d   :  { %1761 = vmatpush2.msra.mxu1 %v1760_v15  ;;  %1784 = vmatpush1.msra.mxu0 %v6323_v22  ;;  %v7615_v15 = vld [vmem:[#allocation9_spill] sm:$0xff] }
 0x19e   :  { %1762 = vmatprep.subr.mxu1 %v4881_v0  ;;  %1785 = vmatprep.subr.mxu0 %v4881_v0 }
 0x19f   :  { %1767 = vmatpush2.msra.mxu1 %v1766_v28  ;;  %1769 = vmatprep.mubr.f32.mxu1 %v5232_v56  ;;  %v7616_v28 = vld [vmem:[#allocation2_spill] sm:$0xff] }
 0x1a0   :  { %1787 = vmatpush1.msra.mxu0 %v6334_v5  ;;  %1771 = vmatmul.mubr.f32.vlgmr.msra.gmra.mxu1 %v5244_v21 }
 0x1a1   :  { %1788 = vmatprep.subr.mxu0 %v4881_v0  ;;  %1878 = vmatprep.subr.mxu1 %v4881_v0 }
 0x1a2   :  { %1790 = vmatpush1.msra.mxu0 %v6348_v10  ;;  %1879 = vmatpush1.msra.mxu1 %v6273_v51 }
 0x1a3   :  { %1791 = vmatprep.subr.mxu0 %v4881_v0  ;;  %1880 = vmatprep.subr.mxu1 %v4881_v0 }
 0x1a4   :  { %1793 = vmatpush1.msra.mxu0 %v6357_v62  ;;  %1881 = vmatpush1.msra.mxu1 %v6283_v1 }
 0x1a5   :  { %1794 = vmatprep.subr.mxu0 %v4881_v0  ;;  %1882 = vmatprep.subr.mxu1 %v4881_v0 }
 0x1a6   :  { %1796 = vmatpush1.msra.mxu0 %v6371_v61  ;;  %1883 = vmatpush1.msra.mxu1 %v6290_v59 }
 0x1a7   :  { %1797 = vmatprep.subr.mxu0 %v4881_v0  ;;  %1884 = vmatprep.subr.mxu1 %v4881_v0 }
 0x1a8   :  { %1799 = vmatpush1.msra.mxu0 %v6396_v46  ;;  %1885 = vmatpush1.msra.mxu1 %v6304_v7 }
 0x1a9   :  { %1800 = vmatprep.subr.mxu0 %v4881_v0  ;;  %1886 = vmatprep.subr.mxu1 %v4881_v0 }
 0x1aa   :  { %1802 = vmatpush1.msra.mxu0 %v6409_v55  ;;  %1887 = vmatpush1.msra.mxu1 %v6315_v50  ;;  %v940_v8 = vpop.f32.mrf.mxu0 }
 0x1ab   :  { %1803 = vmatprep.subr.mxu0 %v4881_v0  ;;  %1888 = vmatprep.subr.mxu1 %v4881_v0 }
 0x1ac   :  { %1805 = vmatpush1.msra.mxu0 %v6425_v6  ;;  %1889 = vmatpush1.msra.mxu1 %v6327_v54  ;;  %v942_v48 = vpop.f32.mrf.mxu0 }
 0x1ad   :  { %1806 = vmatprep.subr.mxu0 %v4881_v0  ;;  %1890 = vmatprep.subr.mxu1 %v4881_v0  ;;  %v7618_v48 = vld [vmem:[#allocation10_spill] sm:$0xff] }
 0x1ae   :  { %1808 = vmatpush1.msra.mxu0 %v6441_v60  ;;  %1891 = vmatpush1.msra.mxu1 %v6338_v25 }
 0x1af   :  { %1809 = vmatprep.subr.mxu0 %v4881_v0  ;;  %1892 = vmatprep.subr.mxu1 %v4881_v0 }
 0x1b0   :  { %1811 = vmatpush1.msra.mxu0 %v6454_v43  ;;  %1893 = vmatpush1.msra.mxu1 %v6364_v41 }
 0x1b1   :  { %1812 = vmatprep.subr.mxu0 %v4881_v0  ;;  %1894 = vmatprep.subr.mxu1 %v4881_v0 }
 0x1b2   :  { %1814 = vmatpush1.msra.mxu0 %v6468_v33  ;;  %1895 = vmatpush1.msra.mxu1 %v6378_v31  ;;  %v1124_v63 = vpop.f32.mrf.mxu1 }
 0x1b3   :  { %1815 = vmatprep.subr.mxu0 %v4881_v0  ;;  %1896 = vmatprep.subr.mxu1 %v4881_v0  ;;  %v6761_v37 = vadd.f32 %v1124_v63, %v940_v8  ;;  %v7617_v8 = vld [vmem:[#allocation12_spill] sm:$0xff]  ;;  %v7619_v63 = vld [vmem:[#allocation13_spill] sm:$0xff] }
 0x1b4   :  { %1817 = vmatpush1.msra.mxu0 %v6484_v26  ;;  %1897 = vmatpush1.msra.mxu1 %v6392_v53  ;;  %v1126_v42 = vpop.f32.mrf.mxu1 }
 0x1b5   :  { %1818 = vmatprep.subr.mxu0 %v4881_v0  ;;  %1898 = vmatprep.subr.mxu1 %v4881_v0  ;;  %v7620_v42 = vld [vmem:[#allocation3_spill] sm:$0xff] }
 0x1b6   :  { %1820 = vmatpush1.msra.mxu0 %v6490_v9  ;;  %1899 = vmatpush1.msra.mxu1 %v6405_v45 }
 0x1b7   :  { %1821 = vmatprep.subr.mxu0 %v4881_v0  ;;  %1900 = vmatprep.subr.mxu1 %v4881_v0 }
 0x1b8   :  { %1823 = vmatpush1.msra.mxu0 %v6506_v29  ;;  %1901 = vmatpush1.msra.mxu1 %v6420_v34 }
 0x1b9   :  { %1832 = vmatprep.subr.mxu0 %v4881_v0  ;;  %1902 = vmatprep.subr.mxu1 %v4881_v0 }
 0x1ba   :  { %1834 = vmatpush2.msra.mxu0 %v6526_v19  ;;  %1903 = vmatpush1.msra.mxu1 %v6433_v40 }
 0x1bb   :  { %1835 = vmatprep.subr.mxu0 %v4881_v0  ;;  %1904 = vmatprep.subr.mxu1 %v4881_v0 }
 0x1bc   :  { %1837 = vmatpush2.msra.mxu0 %v6544_v17  ;;  %1905 = vmatpush1.msra.mxu1 %v6449_v58 }
 0x1bd   :  { %1838 = vmatprep.subr.mxu0 %v4881_v0  ;;  %1906 = vmatprep.subr.mxu1 %v4881_v0 }
 0x1be   :  { %1840 = vmatpush2.msra.mxu0 %v6557_v49  ;;  %1907 = vmatpush1.msra.mxu1 %v6458_v3 }
 0x1bf   :  { %1841 = vmatprep.subr.mxu0 %v4881_v0  ;;  %1908 = vmatprep.subr.mxu1 %v4881_v0 }
 0x1c0   :  { %1843 = vmatpush2.msra.mxu0 %v6573_v47  ;;  %1909 = vmatpush1.msra.mxu1 %v6472_v52 }
 0x1c1   :  { %1844 = vmatprep.subr.mxu0 %v4881_v0  ;;  %1918 = vmatprep.subr.mxu1 %v4881_v0 }
 0x1c2   :  { %1846 = vmatpush2.msra.mxu0 %v6586_v23  ;;  %1919 = vmatpush2.msra.mxu1 %v6496_v18 }
 0x1c3   :  { %1847 = vmatprep.subr.mxu0 %v4881_v0  ;;  %1920 = vmatprep.subr.mxu1 %v4881_v0 }
 0x1c4   :  { %1849 = vmatpush2.msra.mxu0 %v6602_v27  ;;  %1921 = vmatpush2.msra.mxu1 %v6512_v30 }
 0x1c5   :  { %1850 = vmatprep.subr.mxu0 %v4881_v0  ;;  %1922 = vmatprep.subr.mxu1 %v4881_v0 }
 0x1c6   :  { %1852 = vmatpush2.msra.mxu0 %v6613_v13  ;;  %1923 = vmatpush2.msra.mxu1 %v7613_v39 }
 0x1c7   :  { %1853 = vmatprep.subr.mxu0 %v4881_v0  ;;  %1924 = vmatprep.subr.mxu1 %v4881_v0 }
 0x1c8   :  { %1855 = vmatpush2.msra.mxu0 %v6629_v16  ;;  %1925 = vmatpush2.msra.mxu1 %v7614_v24 }
 0x1c9   :  { %1856 = vmatprep.subr.mxu0 %v4881_v0  ;;  %1926 = vmatprep.subr.mxu1 %v4881_v0 }
 0x1ca   :  { %1858 = vmatpush2.msra.mxu0 %v6646_v44  ;;  %1927 = vmatpush2.msra.mxu1 %v7615_v15 }
 0x1cb   :  { %1859 = vmatprep.subr.mxu0 %v4881_v0  ;;  %1928 = vmatprep.subr.mxu1 %v4881_v0 }
 0x1cc   :  { %1861 = vmatpush2.msra.mxu0 %v6659_v2  ;;  %1929 = vmatpush2.msra.mxu1 %v6568_v20 }
 0x1cd   :  { %1862 = vmatprep.subr.mxu0 %v4881_v0  ;;  %1930 = vmatprep.subr.mxu1 %v4881_v0 }
 0x1ce   :  { %1864 = vmatpush2.msra.mxu0 %v6670_v12  ;;  %1931 = vmatpush2.msra.mxu1 %v7616_v28 }
 0x1cf   :  { %1865 = vmatprep.subr.mxu0 %v4881_v0  ;;  %1932 = vmatprep.subr.mxu1 %v4881_v0 }
 0x1d0   :  { %1867 = vmatpush2.msra.mxu0 %v6681_v38  ;;  %1870 = vmatprep.mubr.f32.mxu0 %v7617_v8  ;;  %v7622_v8 = vand.u32 4294901760, %v6308_v11  ;;  %v7625_v11 = vand.u32 4294901760, %v6334_v5  ;;  %v7629_v5 = vand.u32 4294901760, %v6371_v61  ;;  %v7632_v61 = vand.u32 4294901760, %v6425_v6 }
 0x1d1   :  { %1933 = vmatpush2.msra.mxu1 %v7618_v48  ;;  %1873 = vmatmul.mubr.f32.vlgmr.msra.gmra.mxu0 %v7619_v63  ;;  %v7623_v63 = vand.u32 4294901760, %v6323_v22  ;;  %v7627_v22 = vand.u32 4294901760, %v6348_v10  ;;  %v7631_v10 = vand.u32 4294901760, %v6409_v55  ;;  %v7636_v55 = vand.u32 4294901760, %v6484_v26 }
 0x1d2   :  { %1934 = vmatprep.subr.mxu1 %v4881_v0  ;;  %1954 = vmatprep.subr.mxu0 %v4881_v0  ;;  %v7637_v6 = vand.u32 4294901760, %v6490_v9  ;;  %v7645_v9 = vand.u32 4294901760, %v6613_v13 }
 0x1d3   :  { %1935 = vmatpush2.msra.mxu1 %v7620_v42  ;;  %1957 = vmatpush1.msra.mxu0 %v7621_v14  ;;  %v7626_v14 = vld [vmem:[#allocation15_spill] sm:$0xff] }
 0x1d4   :  { %1936 = vmatprep.subr.mxu1 %v4881_v0  ;;  %1958 = vmatprep.subr.mxu0 %v4881_v0 }
 0x1d5   :  { %1937 = vmatpush2.msra.mxu1 %v6633_v36  ;;  %1961 = vmatpush1.msra.mxu0 %v7622_v8  ;;  %v7628_v8 = vand.u32 4294901760, %v6357_v62 }
 0x1d6   :  { %1938 = vmatprep.subr.mxu1 %v4881_v0  ;;  %1962 = vmatprep.subr.mxu0 %v4881_v0 }
 0x1d7   :  { %1939 = vmatpush2.msra.mxu1 %v6642_v35  ;;  %1965 = vmatpush1.msra.mxu0 %v7623_v63 }
 0x1d8   :  { %1940 = vmatprep.subr.mxu1 %v4881_v0  ;;  %1966 = vmatprep.subr.mxu0 %v4881_v0 }
 0x1d9   :  { %1941 = vmatpush2.msra.mxu1 %v6655_v4  ;;  %1945 = vmatprep.mubr.f32.mxu1 %v7624_v32 }
 0x1da   :  { %1969 = vmatpush1.msra.mxu0 %v7625_v11  ;;  %1949 = vmatmul.mubr.f32.vlgmr.msra.gmra.mxu1 %v7626_v14 }
 0x1db   :  { %1970 = vmatprep.subr.mxu0 %v4881_v0  ;;  %2082 = vmatprep.subr.mxu1 %v4881_v0 }
 0x1dc   :  { %1973 = vmatpush1.msra.mxu0 %v7627_v22  ;;  %2083 = vmatpush1.msra.mxu1 %v6273_v51  ;;  %v7630_v51 = vand.u32 4294901760, %v6396_v46 }
 0x1dd   :  { %1974 = vmatprep.subr.mxu0 %v4881_v0  ;;  %2084 = vmatprep.subr.mxu1 %v4881_v0 }
 0x1de   :  { %1977 = vmatpush1.msra.mxu0 %v7628_v8  ;;  %2085 = vmatpush1.msra.mxu1 %v6283_v1 }
 0x1df   :  { %1978 = vmatprep.subr.mxu0 %v4881_v0  ;;  %2086 = vmatprep.subr.mxu1 %v4881_v0 }
 0x1e0   :  { %1981 = vmatpush1.msra.mxu0 %v7629_v5  ;;  %2087 = vmatpush1.msra.mxu1 %v6290_v59 }
 0x1e1   :  { %1982 = vmatprep.subr.mxu0 %v4881_v0  ;;  %2088 = vmatprep.subr.mxu1 %v4881_v0 }
 0x1e2   :  { %1985 = vmatpush1.msra.mxu0 %v7630_v51  ;;  %2089 = vmatpush1.msra.mxu1 %v6304_v7  ;;  %v7633_v7 = vand.u32 4294901760, %v6441_v60  ;;  %v7642_v60 = vand.u32 4294901760, %v6573_v47  ;;  %v28_v47 = vld [vmem:[%s7361_s3 + $0x10] sm:$0xff] }
 0x1e3   :  { %1986 = vmatprep.subr.mxu0 %v4881_v0  ;;  %2090 = vmatprep.subr.mxu1 %v4881_v0  ;;  %v1226_v1 = vpop.f32.mrf.mxu0 }
 0x1e4   :  { %1989 = vmatpush1.msra.mxu0 %v7631_v10  ;;  %2091 = vmatpush1.msra.mxu1 %v6315_v50  ;;  %v1227_v59 = vadd.f32 %v1226_v1, %v6761_v37  ;;  %v7634_v50 = vand.u32 4294901760, %v6454_v43  ;;  %v7648_v37 = vand.u32 4294901760, %v6659_v2 }
 0x1e5   :  { %1990 = vmatprep.subr.mxu0 %v4881_v0  ;;  %2092 = vmatprep.subr.mxu1 %v4881_v0  ;;  %v1228_v62 = vpop.f32.mrf.mxu0 }
 0x1e6   :  { %1993 = vmatpush1.msra.mxu0 %v7632_v61  ;;  %2093 = vmatpush1.msra.mxu1 %v6327_v54  ;;  %v7635_v54 = vand.u32 4294901760, %v6468_v33  ;;  %v7644_v33 = vand.u32 4294901760, %v6602_v27  ;;  %v6959_v27 = vand.u32 4294901760, %v28_v47 }
 0x1e7   :  { %1994 = vmatprep.subr.mxu0 %v4881_v0  ;;  %2094 = vmatprep.subr.mxu1 %v4881_v0 }
 0x1e8   :  { %1997 = vmatpush1.msra.mxu0 %v7633_v7  ;;  %2095 = vmatpush1.msra.mxu1 %v6338_v25  ;;  %v31_v7 = vld [vmem:[%s7362_s5 + $0x10] sm:$0x1] }
 0x1e9   :  { %1998 = vmatprep.subr.mxu0 %v4881_v0  ;;  %2096 = vmatprep.subr.mxu1 %v4881_v0 }
 0x1ea   :  { %2001 = vmatpush1.msra.mxu0 %v7634_v50  ;;  %2097 = vmatpush1.msra.mxu1 %v6364_v41  ;;  %v7103_v50 = vand.u32 4294901760, %v31_v7 }
 0x1eb   :  { %2002 = vmatprep.subr.mxu0 %v4881_v0  ;;  %2098 = vmatprep.subr.mxu1 %v4881_v0 }
 0x1ec   :  { %2005 = vmatpush1.msra.mxu0 %v7635_v54  ;;  %2099 = vmatpush1.msra.mxu1 %v6378_v31  ;;  %v1302_v46 = vpop.f32.mrf.mxu1  ;;  %v7638_v31 = vand.u32 4294901760, %v6506_v29  ;;  %v7646_v29 = vand.u32 4294901760, %v6629_v16  ;;  %v7106_v54 = vsub.f32 %v31_v7, %v7103_v50 }
 0x1ed   :  { %2006 = vmatprep.subr.mxu0 %v4881_v0  ;;  %2100 = vmatprep.subr.mxu1 %v4881_v0  ;;  %v6893_v25 = vadd.f32 %v1302_v46, %v1227_v59  ;;  %v30_v46 = vld [vmem:[%s7362_s5 + $0x8] sm:$0xff] }
 0x1ee   :  { %2009 = vmatpush1.msra.mxu0 %v7636_v55  ;;  %2101 = vmatpush1.msra.mxu1 %v6392_v53  ;;  %v1304_v41 = vpop.f32.mrf.mxu1  ;;  %v7639_v53 = vand.u32 4294901760, %v6526_v19  ;;  %v7116_v55 = vand.u32 4294901760, %v30_v46 }
 0x1ef   :  { %2010 = vmatprep.subr.mxu0 %v4881_v0  ;;  %2102 = vmatprep.subr.mxu1 %v4881_v0 }
 0x1f0   :  { %2013 = vmatpush1.msra.mxu0 %v7637_v6  ;;  %2103 = vmatpush1.msra.mxu1 %v6405_v45  ;;  %v7640_v45 = vand.u32 4294901760, %v6544_v17  ;;  %v7647_v17 = vand.u32 4294901760, %v6646_v44  ;;  %v7121_v6 = vsub.f32 %v30_v46, %v7116_v55 }
 0x1f1   :  { %2014 = vmatprep.subr.mxu0 %v4881_v0  ;;  %2104 = vmatprep.subr.mxu1 %v4881_v0 }
 0x1f2   :  { %2017 = vmatpush1.msra.mxu0 %v7638_v31  ;;  %2105 = vmatpush1.msra.mxu1 %v6420_v34  ;;  %v7641_v34 = vand.u32 4294901760, %v6557_v49  ;;  %v6984_v49 = vsub.f32 %v28_v47, %v6959_v27  ;;  %v29_v31 = vld [vmem:[%s7362_s5] sm:$0xff] }
 0x1f3   :  { %2026 = vmatprep.subr.mxu0 %v4881_v0  ;;  %2106 = vmatprep.subr.mxu1 %v4881_v0 }
 0x1f4   :  { %2029 = vmatpush2.msra.mxu0 %v7639_v53  ;;  %2107 = vmatpush1.msra.mxu1 %v6433_v40  ;;  %v2159_v40 = vld [vmem:[%s7360_s4] sm:$0xff]  ;;  %v7004_v2 = vand.u32 4294901760, %v6984_v49 }
 0x1f5   :  { %2030 = vmatprep.subr.mxu0 %v4881_v0  ;;  %2108 = vmatprep.subr.mxu1 %v4881_v0  ;;  %v2163_v43 = vsel %vm2161_vm1, %v2159_v40, 0 }
 0x1f6   :  { %2033 = vmatpush2.msra.mxu0 %v7640_v45  ;;  %2109 = vmatpush1.msra.mxu1 %v6449_v58  ;;  %v7643_v58 = vand.u32 4294901760, %v6586_v23  ;;  %v27_v23 = vld [vmem:[%s7361_s3 + $0x8] sm:$0xff]  ;;  %v7131_v45 = vand.u32 4294901760, %v7121_v6 }
 0x1f7   :  { %2034 = vmatprep.subr.mxu0 %v4881_v0  ;;  %2110 = vmatprep.subr.mxu1 %v4881_v0 }
 0x1f8   :  { %2037 = vmatpush2.msra.mxu0 %v7641_v34  ;;  %2111 = vmatpush1.msra.mxu1 %v6458_v3  ;;  %v2160_v3 = vld [vmem:[%s7360_s4 + $0x8] sm:$0xff]  ;;  %v7133_v34 = vand.u32 4294901760, %v29_v31  ;;  %v2857_v40 = vsub.f32 %v7121_v6, %v7131_v45 }
 0x1f9   :  { %2038 = vmatprep.subr.mxu0 %v4881_v0  ;;  %2112 = vmatprep.subr.mxu1 %v4881_v0  ;;  %v2166_v26 = vsel %vm2161_vm1, %v2160_v3, 0 }
 0x1fa   :  { %2041 = vmatpush2.msra.mxu0 %v7642_v60  ;;  %2113 = vmatpush1.msra.mxu1 %v6472_v52  ;;  %v6953_v52 = vand.u32 4294901760, %v2163_v43  ;;  %v6971_v13 = vand.u32 4294901760, %v2166_v26  ;;  %v7139_v60 = vsub.f32 %v29_v31, %v7133_v34 }
 0x1fb   :  { %2042 = vmatprep.subr.mxu0 %v4881_v0  ;;  %2122 = vmatprep.subr.mxu1 %v4881_v0 }
 0x1fc   :  { %2045 = vmatpush2.msra.mxu0 %v7643_v58  ;;  %2123 = vmatpush2.msra.mxu1 %v6496_v18  ;;  %v26_v18 = vld [vmem:[%s7361_s3] sm:$0xff]  ;;  %v6976_v19 = vsub.f32 %v2163_v43, %v6953_v52  ;;  %v6995_v44 = vsub.f32 %v2166_v26, %v6971_v13  ;;  %v7144_v58 = vand.u32 4294901760, %v2857_v40  ;;  %v7147_v43 = vand.u32 4294901760, %v7139_v60 }
 0x1fd   :  { %2046 = vmatprep.subr.mxu0 %v4881_v0  ;;  %2124 = vmatprep.subr.mxu1 %v4881_v0  ;;  %v6981_v16 = vand.u32 4294901760, %v26_v18 }
 0x1fe   :  { %2049 = vmatpush2.msra.mxu0 %v7644_v33  ;;  %2125 = vmatpush2.msra.mxu1 %v6512_v30  ;;  %v6969_v30 = vand.u32 4294901760, %v27_v23  ;;  %v2864_v3 = vsub.f32 %v7139_v60, %v7147_v43 }
 0x1ff   :  { %2050 = vmatprep.subr.mxu0 %v4881_v0  ;;  %2126 = vmatprep.subr.mxu1 %v4881_v0 }
 0x200   :  { %2053 = vmatpush2.msra.mxu0 %v7645_v9  ;;  %2127 = vmatpush2.msra.mxu1 %v7613_v39  ;;  %v6992_v39 = vsub.f32 %v27_v23, %v6969_v30  ;;  %v7157_v47 = vand.u32 4294901760, %v2864_v3 }
 0x201   :  { %2054 = vmatprep.subr.mxu0 %v4881_v0  ;;  %2128 = vmatprep.subr.mxu1 %v4881_v0 }
 0x202   :  { %2057 = vmatpush2.msra.mxu0 %v7646_v29  ;;  %2129 = vmatpush2.msra.mxu1 %v7614_v24  ;;  %v2238_v24 = vand.u32 4294901760, %v6976_v19  ;;  %v7015_v12 = vand.u32 4294901760, %v6992_v39 }
 0x203   :  { %2058 = vmatprep.subr.mxu0 %v4881_v0  ;;  %2130 = vmatprep.subr.mxu1 %v4881_v0 }
 0x204   :  { %2061 = vmatpush2.msra.mxu0 %v7647_v17  ;;  %2131 = vmatpush2.msra.mxu1 %v7615_v15  ;;  %v7649_v15 = vand.u32 4294901760, %v6681_v38  ;;  %v2286_v38 = vsub.f32 %v6984_v49, %v7004_v2 }
 0x205   :  { %2062 = vmatprep.subr.mxu0 %v4881_v0  ;;  %2132 = vmatprep.subr.mxu1 %v4881_v0 }
 0x206   :  { %2065 = vmatpush2.msra.mxu0 %v7648_v37  ;;  %2133 = vmatpush2.msra.mxu1 %v6568_v20  ;;  %v7007_v20 = vsub.f32 %v26_v18, %v6981_v16 }
 0x207   :  { %2066 = vmatprep.subr.mxu0 %v4881_v0  ;;  %2134 = vmatprep.subr.mxu1 %v4881_v0 }
 0x208   :  { %2069 = vmatpush2.msra.mxu0 %v1758_v57  ;;  %2135 = vmatpush2.msra.mxu1 %v7616_v28  ;;  %v2248_v57 = vand.u32 4294901760, %v6995_v44  ;;  %v2239_v28 = vsub.f32 %v6976_v19, %v2238_v24  ;;  %v7028_v63 = vand.u32 4294901760, %v7007_v20 }
 0x209   :  { %2070 = vmatprep.subr.mxu0 %v4881_v0  ;;  %2136 = vmatprep.subr.mxu1 %v4881_v0 }
 0x20a   :  { %2073 = vmatpush2.msra.mxu0 %v7649_v15  ;;  %2075 = vmatprep.mubr.f32.mxu0 %v5232_v56  ;;  %v2249_v32 = vsub.f32 %v6995_v44, %v2248_v57  ;;  %v2240_v11 = vand.u32 4294901760, %v2239_v28  ;;  %v2300_v14 = vsub.f32 %v7007_v20, %v7028_v63 }
 0x20b   :  { %2137 = vmatpush2.msra.mxu1 %v7618_v48  ;;  %2077 = vmatmul.mubr.f32.vlgmr.msra.gmra.mxu0 %v5244_v21  ;;  %v2293_v48 = vsub.f32 %v6992_v39, %v7015_v12 }
 0x20c   :  { %2138 = vmatprep.subr.mxu1 %v4881_v0  ;;  %4663 = vmatprep.subr.mxu0 %v6959_v27  ;;  %v7054_v22 = vand.u32 4294901760, %v2300_v14 }
 0x20d   :  { %2139 = vmatpush2.msra.mxu1 %v7620_v42  ;;  %4664 = vmatpush3.msra.mxu0 %v6959_v27  ;;  %v7041_v42 = vand.u32 4294901760, %v2286_v38 }
 0x20e   :  { %2140 = vmatprep.subr.mxu1 %v4881_v0  ;;  %4665 = vmatprep.subr.mxu0 %v6969_v30 }
 0x20f   :  { %2141 = vmatpush2.msra.mxu1 %v6633_v36  ;;  %2147 = vmatprep.mubr.f32.mxu1 %v5232_v56  ;;  %v7049_v36 = vand.u32 4294901760, %v2293_v48  ;;  %v2250_v56 = vand.u32 4294901760, %v2249_v32 }
 0x210   :  { %2142 = vmatprep.subr.mxu1 %v4881_v0  ;;  %4666 = vmatpush3.msra.mxu0 %v6969_v30 }
 0x211   :  { %2143 = vmatpush2.msra.mxu1 %v6642_v35  ;;  %4667 = vmatprep.subr.mxu0 %v6981_v16 }
 0x212   :  { %2144 = vmatprep.subr.mxu1 %v4881_v0  ;;  %4668 = vmatpush3.msra.mxu0 %v6981_v16 }
 0x213   :  { %2145 = vmatpush2.msra.mxu1 %v6655_v4  ;;  %4669 = vmatprep.mubr.f32.mxu0 %v2240_v11 }
 0x214   :  { %2149 = vmatmul.mubr.f32.vlgmr.msra.gmra.mxu1 %v5244_v21  ;;  %4672 = vmatprep.subr.mxu1 %v7041_v42 }
 0x215   :  { %4673 = vmatpush3.msra.mxu1 %v7041_v42  ;;  %4681 = vmatprep.subr.mxu0 %v6984_v49 }
 0x216   :  { %4674 = vmatprep.subr.mxu1 %v7049_v36  ;;  %4670 = vmatmul.mubr.f32.vlgmr.msra.gmra.mxu0 %v2250_v56 }
 0x217   :  { %4675 = vmatpush3.msra.mxu1 %v7049_v36  ;;  %4682 = vmatpush3.msra.mxu0 %v6984_v49 }
 0x218   :  { %4676 = vmatprep.subr.mxu1 %v7054_v22  ;;  %4683 = vmatprep.subr.mxu0 %v6992_v39 }
 0x219   :  { %4677 = vmatpush3.msra.mxu1 %v7054_v22  ;;  %4678 = vmatprep.mubr.f32.mxu1 %v6953_v52 }
 0x21a   :  { %4684 = vmatpush3.msra.mxu0 %v6992_v39  ;;  %4679 = vmatmul.mubr.f32.vlgmr.msra.gmra.mxu1 %v6971_v13 }
 0x21b   :  { %4685 = vmatprep.subr.mxu0 %v7007_v20  ;;  %4690 = vmatprep.subr.mxu1 %v6959_v27 }
 0x21c   :  { %4686 = vmatpush3.msra.mxu0 %v7007_v20  ;;  %4687 = vmatprep.mubr.f32.mxu0 %v6976_v19 }
 0x21d   :  { %4691 = vmatpush3.msra.mxu1 %v6959_v27  ;;  %4688 = vmatmul.mubr.f32.vlgmr.msra.gmra.mxu0 %v6995_v44  ;;  %v1430_v21 = vpop.f32.mrf.mxu0 }
 0x21e   :  { %4692 = vmatprep.subr.mxu1 %v6969_v30  ;;  %4699 = vmatprep.subr.mxu0 %v7004_v2  ;;  %v1431_v35 = vadd.f32 %v1430_v21, %v6893_v25  ;;  %v7114_v25 = vand.u32 4294901760, %v7106_v54  ;;  %v4337_v21 = vld [vmem:[%s7363_s2 + $0x1] ss:$0 sm:$0xff] }
 0x21f   :  { %4693 = vmatpush3.msra.mxu1 %v6969_v30  ;;  %4700 = vmatpush3.msra.mxu0 %v7004_v2  ;;  %v1432_v4 = vpop.f32.mrf.mxu0 }
 0x220   :  { %4694 = vmatprep.subr.mxu1 %v6981_v16  ;;  %4701 = vmatprep.subr.mxu0 %v7015_v12  ;;  %v2850_v41 = vsub.f32 %v7106_v54, %v7114_v25 }
 0x221   :  { %4695 = vmatpush3.msra.mxu1 %v6981_v16  ;;  %4696 = vmatprep.mubr.f32.mxu1 %v2238_v24 }
 0x222   :  { %4702 = vmatpush3.msra.mxu0 %v7015_v12  ;;  %4697 = vmatmul.mubr.f32.vlgmr.msra.gmra.mxu1 %v2248_v57  ;;  %v7128_v53 = vand.u32 4294901760, %v2850_v41 }
 0x223   :  { %4703 = vmatprep.subr.mxu0 %v7028_v63  ;;  %4708 = vmatprep.subr.mxu1 %v6959_v27 }
 0x224   :  { %4704 = vmatpush3.msra.mxu0 %v7028_v63  ;;  %4705 = vmatprep.mubr.f32.mxu0 %v6953_v52 }
 0x225   :  { %4709 = vmatpush3.msra.mxu1 %v6959_v27  ;;  %4706 = vmatmul.mubr.f32.vlgmr.msra.gmra.mxu0 %v6971_v13 }
 0x226   :  { %4710 = vmatprep.subr.mxu1 %v6969_v30  ;;  %4714 = vmatprep.mubr.f32.mxu1 %v6953_v52  ;;  %v1502_v8 = vpop.f32.mrf.mxu1 }
 0x227   :  { %4711 = vmatpush3.msra.mxu1 %v6969_v30  ;;  %v7093_v5 = vadd.f32 %v1502_v8, %v1431_v35  ;;  %4717 = vmatprep.subr.mxu0 %v4881_v0  ;;  %v4338_v35 = vld [vmem:[%s7363_s2 + $0x2] ss:$0 sm:$0xff] }
 0x228   :  { %4712 = vmatprep.subr.mxu1 %v6981_v16  ;;  %v1504_v51 = vpop.f32.mrf.mxu1  ;;  %4718 = vmatpush3.xpose.msra.mxu0 %v7103_v50 }
 0x229   :  { %4713 = vmatpush3.msra.mxu1 %v6981_v16  ;;  %4719 = vmatprep.subr.mxu0 %v4881_v0 }
 0x22a   :  { %4715 = vmatmul.mubr.f32.vlgmr.msra.gmra.mxu1 %v6971_v13  ;;  %4726 = vmatprep.subr.mxu1 %v4881_v0 }
 0x22b   :  { %4727 = vmatpush3.xpose.msra.mxu1 %v7128_v53  ;;  %4732 = vmatprep.mubr.msk.f32.mxu1 %vm4882_vm2, %v4881_v0 }
 0x22c   :  { %4720 = vmatpush3.xpose.msra.mxu0 %v7116_v55  ;;  %4728 = vmatprep.subr.mxu1 %v4881_v0 }
 0x22d   :  { %4721 = vmatprep.subr.mxu0 %v4881_v0  ;;  %4723 = vmatprep.mubr.msk.f32.mxu0 %vm4882_vm2, %v4881_v0 }
 0x22f   :  { %4729 = vmatpush3.xpose.msra.mxu1 %v7144_v58 }
 0x230   :  { %4722 = vmatpush3.xpose.msra.mxu0 %v7133_v34  ;;  %4730 = vmatprep.subr.mxu1 %v4881_v0 }
 0x231   :  { %4735 = vmatprep.subr.mxu0 %v4881_v0 }
 0x233   :  { %4731 = vmatpush3.xpose.msra.mxu1 %v7157_v47 }
 0x234   :  { %4744 = vmatprep.subr.mxu1 %v4881_v0 }
 0x258   :  { %v1588_v1 = vpop.f32.mrf.mxu0 }
 0x25a   :  { %v1590_v10 = vpop.f32.mrf.mxu0 }
 0x25b   :  { %v7168_v10 = vadd.f32 %v4337_v21, %v7093_v5 }
 0x25d   :  { %v2685_v40 = vrot.slane %v7168_v10, 7 }
 0x260   :  { %v1772_v59 = vpop.f32.mrf.mxu1 }
 0x261   :  { %v1773_v62 = vadd.f32 %v1772_v59, %v1588_v1 }
 0x262   :  { %v1774_v61 = vpop.f32.mrf.mxu1 }
 0x263   :  { %v4336_v61 = vld [vmem:[%s7363_s2] ss:$0 sm:$0xff] }
 0x291   :  { %v1874_v33 = vpop.f32.mrf.mxu0 }
 0x292   :  { %v1875_v23 = vadd.f32 %v1874_v33, %v1773_v62  ;;  %v7650_v33 = vld [vmem:[#allocation8_spill] sm:$0xff] }
 0x293   :  { %v1876_v52 = vpop.f32.mrf.mxu0 }
 0x29a   :  { %v1950_v26 = vpop.f32.mrf.mxu1 }
 0x29b   :  { %v1951_v9 = vadd.f32 %v1950_v26, %v1875_v23  ;;  %v7178_v23 = vadd.f32 %v4336_v61, %v7650_v33 }
 0x29c   :  { %v1952_v18 = vpop.f32.mrf.mxu1 }
 0x2cb   :  { %v2078_v29 = vpop.f32.mrf.mxu0 }
 0x2cc   :  { %v2079_v38 = vadd.f32 %v2078_v29, %v1951_v9  ;;  %v2709_v29 = vrot.slane %v7168_v10, 3 }
 0x2cd   :  { %v2080_v13 = vpop.f32.mrf.mxu0 }
 0x2d4   :  { %v2150_v19 = vpop.f32.mrf.mxu1 }
 0x2d5   :  { %v2151_v11 = vadd.f32 %v2150_v19, %v2079_v38 }
 0x2d6   :  { %v2152_v17 = vpop.f32.mrf.mxu1  ;;  %v4671_v37 = vpop.f32.mrf.mxu0 }
 0x2d7   :  { %v7170_v59 = vadd.f32 %v4338_v35, %v2151_v11 }
 0x2d8   :  { %v2242_v44 = vpop.f32.mrf.mxu0 }
 0x2d9   :  { %v2693_v3 = vrot.slane %v7170_v59, 6  ;;  %v2716_v13 = vrot.slane %v7170_v59, 2 }
 0x2da   :  { %v4680_v24 = vpop.f32.mrf.mxu1 }
 0x2db   :  { %v2345_v15 = vadd.f32 %v4680_v24, %v4671_v37  ;;  %v2706_v37 = vrot.slane %v7178_v23, 4 }
 0x2dc   :  { %v2338_v57 = vpop.f32.mrf.mxu1 }
 0x2dd   :  { %v4689_v28 = vpop.f32.mrf.mxu0  ;;  %v2339_v48 = vadd.f32 %v2338_v57, %v2242_v44 }
 0x2de   :  { %v2430_v14 = vadd.f32 %v4689_v28, %v2345_v15 }
 0x2df   :  { %v2422_v56 = vpop.f32.mrf.mxu0 }
 0x2e0   :  { %v2423_v1 = vadd.f32 %v2422_v56, %v2339_v48 }
 0x2e2   :  { %v4698_v32 = vpop.f32.mrf.mxu1 }
 0x2e3   :  { %v2514_v4 = vadd.f32 %v4698_v32, %v2430_v14 }
 0x2e4   :  { %v2505_v8 = vpop.f32.mrf.mxu1 }
 0x2e5   :  { %v4707_v51 = vpop.f32.mrf.mxu0  ;;  %v2506_v62 = vadd.f32 %v2505_v8, %v2423_v1 }
 0x2e6   :  { %v2600_v7 = vadd.f32 %v4707_v51, %v2514_v4 }
 0x2e7   :  { %v2593_v46 = vpop.f32.mrf.mxu0 }
 0x2e8   :  { %v2594_v5 = vadd.f32 %v2593_v46, %v2506_v62 }
 0x2ea   :  { %v4716_v41 = vpop.f32.mrf.mxu1 }
 0x2eb   :  { %v2680_v31 = vadd.f32 %v4716_v41, %v2600_v7 }
 0x2ec   :  { %v2673_v52 = vpop.f32.mrf.mxu1 }
 0x2ed   :  { %v2726_v26 = vmul.f32 %v2685_v40, %v2680_v31  ;;  %v2731_v9 = vmul.f32 %v2693_v3, %v2680_v31  ;;  %v2674_v18 = vadd.f32 %v2673_v52, %v2594_v5  ;;  %v2725_v19 = vmul.f32 %v2680_v31, %v7178_v23 }
 0x2ee   :  { %v2737_v14 = vrot.slane %v2680_v31, 3 }
 0x2ef   :  { %v2728_v17 = vrot.slane %v2726_v26, 1  ;;  %v2687_v44 = vmul.f32 %v2685_v40, %v2674_v18  ;;  %v2695_v24 = vmul.f32 %v2693_v3, %v2674_v18  ;;  %v2733_v57 = vrot.slane %v2731_v9, 2  ;;  %v4339_v26 = vld [vmem:[%s7360_s4 + $0x10] sm:$0xff] }
 0x2f0   :  { %v2711_v28 = vmul.f32 %v2709_v29, %v2674_v18  ;;  %v2718_v38 = vmul.f32 %v2716_v13, %v2674_v18  ;;  %v2683_v48 = vmul.f32 %v2674_v18, %v7178_v23  ;;  %v2708_v56 = vmul.f32 %v2706_v37, %v2674_v18 }
 0x2f1   :  { %v2730_v15 = vadd.f32 %v2728_v17, %v2725_v19  ;;  %v2689_v32 = vrot.slane %v2687_v44, 1  ;;  %v2697_v4 = vrot.slane %v2695_v24, 2  ;;  %v2701_v61 = vrot.slane %v2674_v18, 3  ;;  %v4340_v18 = vld [vmem:[%s7360_s4 + $0x18] sm:$0xff] }
 0x2f2   :  { %v2713_v21 = vrot.slane %v2711_v28, 1  ;;  %v2720_v1 = vrot.slane %v2718_v38, 2  ;;  %v3220_v9 = vsel %vm2161_vm1, %v4339_v26, 0  ;;  %v3223_v13 = vsel %vm2161_vm1, %v4340_v18, 0 }
 0x2f3   :  { %v2735_v11 = vadd.f32 %v2733_v57, %v2730_v15  ;;  %v2691_v35 = vadd.f32 %v2689_v32, %v2683_v48  ;;  %v7218_v29 = vand.u32 4294901760, %v3220_v9  ;;  %v7230_v17 = vand.u32 4294901760, %v3223_v13 }
 0x2f4   :  { %v2715_v51 = vadd.f32 %v2713_v21, %v2708_v56 }
 0x2f5   :  { %v2739_v8 = vadd.f32 %v2737_v14, %v2735_v11  ;;  %v2699_v62 = vadd.f32 %v2697_v4, %v2691_v35  ;;  %v3294_v19 = vsub.f32 %v3220_v9, %v7218_v29  ;;  %v3304_v44 = vsub.f32 %v3223_v13, %v7230_v17 }
 0x2f6   :  { %v2722_v7 = vadd.f32 %v2720_v1, %v2715_v51  ;;  %v3740_v9 = vrot.slane %v7178_v23, 1 }
 0x2f7   :  { %2740 = vst [vmem:[%s7364_s6 + $0x2] sm:$0x1] %v2739_v8  ;;  %v2703_v46 = vadd.f32 %v2701_v61, %v2699_v62  ;;  %v3295_v37 = vand.u32 4294901760, %v3294_v19  ;;  %v3305_v15 = vand.u32 4294901760, %v3304_v44 }
 0x2f8   :  { %v2723_v41 = vadd.f32 %v2722_v7, %v2701_v61 }
 0x2f9   :  { %2704 = vst [vmem:[%s7364_s6] sm:$0x1] %v2703_v46  ;;  %v3296_v24 = vsub.f32 %v3294_v19, %v3295_v37 }
 0x2fa   :  { %2724 = vst [vmem:[%s7364_s6 - $0x3] sm:$0x10] %v2723_v41 }
 0x2fb   :  { %v3297_v57 = vand.u32 4294901760, %v3296_v24 }
 0x301   :  { %v2741_v31 = vld [vmem:[%s7364_s6] sm:$0x7] }
 0x302   :  { %v2810_v40 = vand.u32 4294901760, %v2741_v31 }
 0x304   :  { %v2811_v3 = vsub.f32 %v2741_v31, %v2810_v40  ;;  %4733 = vmatmul.mubr.f32.vlgmr.msra.gmra.mxu1 %v2810_v40 }
 0x305   :  { %4745 = vmatpush3.xpose.msra.mxu1 %v7103_v50  ;;  %4750 = vmatprep.mubr.msk.f32.mxu1 %vm4882_vm2, %v4881_v0 }
 0x306   :  { %4746 = vmatprep.subr.mxu1 %v4881_v0  ;;  %v2812_v33 = vand.u32 4294901760, %v2811_v3 }
 0x308   :  { %v2813_v5 = vsub.f32 %v2811_v3, %v2812_v33 }
 0x309   :  { %4747 = vmatpush3.xpose.msra.mxu1 %v7116_v55 }
 0x30a   :  { %4748 = vmatprep.subr.mxu1 %v4881_v0  ;;  %v2814_v52 = vand.u32 4294901760, %v2813_v5 }
 0x30c   :  { %4724 = vmatmul.mubr.f32.vlgmr.msra.gmra.mxu0 %v2814_v52  ;;  %v3748_v52 = vrot.slane %v7170_v59, 7 }
 0x30d   :  { %4736 = vmatpush3.xpose.msra.mxu0 %v7106_v54  ;;  %4749 = vmatpush3.xpose.msra.mxu1 %v7133_v34 }
 0x30e   :  { %4737 = vmatprep.subr.mxu0 %v4881_v0  ;;  %4762 = vmatprep.subr.mxu1 %v4881_v0 }
 0x30f   :  { %4741 = vmatprep.mubr.msk.f32.mxu0 %vm4882_vm2, %v4881_v0 }
 0x310   :  { %4751 = vmatmul.mubr.f32.vlgmr.msra.gmra.mxu1 %v2812_v33 }
 0x311   :  { %4738 = vmatpush3.xpose.msra.mxu0 %v7121_v6  ;;  %4763 = vmatpush3.xpose.msra.mxu1 %v7103_v50 }
 0x312   :  { %4739 = vmatprep.subr.mxu0 %v4881_v0  ;;  %4764 = vmatprep.subr.mxu1 %v4881_v0 }
 0x313   :  { %4768 = vmatprep.mubr.msk.f32.mxu1 %vm4882_vm2, %v4881_v0 }
 0x315   :  { %4740 = vmatpush3.xpose.msra.mxu0 %v7139_v60  ;;  %4765 = vmatpush3.xpose.msra.mxu1 %v7116_v55 }
 0x316   :  { %4753 = vmatprep.subr.mxu0 %v4881_v0  ;;  %4766 = vmatprep.subr.mxu1 %v4881_v0 }
 0x318   :  { %4742 = vmatmul.mubr.f32.vlgmr.msra.gmra.mxu0 %v2811_v3 }
 0x319   :  { %4754 = vmatpush3.xpose.msra.mxu0 %v7114_v25  ;;  %4767 = vmatpush3.xpose.msra.mxu1 %v7133_v34 }
 0x31a   :  { %4755 = vmatprep.subr.mxu0 %v4881_v0  ;;  %4759 = vmatprep.mubr.msk.f32.mxu0 %vm4882_vm2, %v4881_v0 }
 0x31b   :  { %4780 = vmatprep.subr.mxu1 %v7041_v42 }
 0x31c   :  { %4769 = vmatmul.mubr.f32.vlgmr.msra.gmra.mxu1 %v2810_v40 }
 0x31d   :  { %4756 = vmatpush3.xpose.msra.mxu0 %v7131_v45  ;;  %4781 = vmatpush3.msra.mxu1 %v7041_v42  ;;  %v3306_v42 = vsub.f32 %v3304_v44, %v3305_v15 }
 0x31e   :  { %4757 = vmatprep.subr.mxu0 %v4881_v0  ;;  %4782 = vmatprep.subr.mxu1 %v7049_v36 }
 0x31f   :  { %4783 = vmatpush3.msra.mxu1 %v7049_v36  ;;  %4786 = vmatprep.mubr.f32.mxu1 %v7218_v29  ;;  %v3307_v36 = vand.u32 4294901760, %v3306_v42 }
 0x320   :  { %4784 = vmatprep.subr.mxu1 %v7054_v22 }
 0x321   :  { %4758 = vmatpush3.xpose.msra.mxu0 %v7147_v43  ;;  %4785 = vmatpush3.msra.mxu1 %v7054_v22 }
 0x322   :  { %4771 = vmatprep.subr.mxu0 %v6959_v27  ;;  %4787 = vmatmul.mubr.f32.vlgmr.msra.gmra.mxu1 %v7230_v17 }
 0x323   :  { %4798 = vmatprep.subr.mxu1 %v6959_v27  ;;  %4804 = vmatprep.mubr.f32.mxu1 %v3295_v37  ;;  %v3771_v37 = vrot.slane %v7170_v59, 3 }
 0x324   :  { %4760 = vmatmul.mubr.f32.vlgmr.msra.gmra.mxu0 %v2810_v40  ;;  %4799 = vmatpush3.msra.mxu1 %v6959_v27 }
 0x325   :  { %4772 = vmatpush3.msra.mxu0 %v6959_v27  ;;  %4777 = vmatprep.mubr.f32.mxu0 %v3297_v57 }
 0x326   :  { %4773 = vmatprep.subr.mxu0 %v6969_v30  ;;  %4800 = vmatprep.subr.mxu1 %v6969_v30 }
 0x327   :  { %4774 = vmatpush3.msra.mxu0 %v6969_v30  ;;  %4801 = vmatpush3.msra.mxu1 %v6969_v30 }
 0x328   :  { %4775 = vmatprep.subr.mxu0 %v6981_v16  ;;  %4802 = vmatprep.subr.mxu1 %v6981_v16 }
 0x329   :  { %4776 = vmatpush3.msra.mxu0 %v6981_v16  ;;  %4803 = vmatpush3.msra.mxu1 %v6981_v16 }
 0x32a   :  { %4778 = vmatmul.mubr.f32.vlgmr.msra.gmra.mxu0 %v3307_v36  ;;  %4789 = vmatprep.subr.mxu0 %v6984_v49 }
 0x32b   :  { %4790 = vmatpush3.msra.mxu0 %v6984_v49  ;;  %4795 = vmatprep.mubr.f32.mxu0 %v3294_v19 }
 0x32c   :  { %4791 = vmatprep.subr.mxu0 %v6992_v39  ;;  %4816 = vmatprep.subr.mxu1 %v6959_v27 }
 0x32d   :  { %4792 = vmatpush3.msra.mxu0 %v6992_v39  ;;  %4805 = vmatmul.mubr.f32.vlgmr.msra.gmra.mxu1 %v3305_v15  ;;  %v3761_v15 = vrot.slane %v7178_v23, 5 }
 0x32e   :  { %4793 = vmatprep.subr.mxu0 %v7007_v20  ;;  %4817 = vmatpush3.msra.mxu1 %v6959_v27 }
 0x32f   :  { %4794 = vmatpush3.msra.mxu0 %v7007_v20  ;;  %4818 = vmatprep.subr.mxu1 %v6969_v30 }
 0x330   :  { %4796 = vmatmul.mubr.f32.vlgmr.msra.gmra.mxu0 %v3304_v44  ;;  %4807 = vmatprep.subr.mxu0 %v7004_v2 }
 0x331   :  { %4808 = vmatpush3.msra.mxu0 %v7004_v2  ;;  %4819 = vmatpush3.msra.mxu1 %v6969_v30 }
 0x332   :  { %4809 = vmatprep.subr.mxu0 %v7015_v12  ;;  %4820 = vmatprep.subr.mxu1 %v6981_v16 }
 0x333   :  { %4810 = vmatpush3.msra.mxu0 %v7015_v12  ;;  %4813 = vmatprep.mubr.f32.mxu0 %v7218_v29 }
 0x334   :  { %4811 = vmatprep.subr.mxu0 %v7028_v63  ;;  %4821 = vmatpush3.msra.mxu1 %v6981_v16 }
 0x335   :  { %4812 = vmatpush3.msra.mxu0 %v7028_v63  ;;  %4822 = vmatprep.mubr.f32.mxu1 %v7218_v29 }
 0x336   :  { %4814 = vmatmul.mubr.f32.vlgmr.msra.gmra.mxu0 %v7230_v17  ;;  %4823 = vmatmul.mubr.f32.vlgmr.msra.gmra.mxu1 %v7230_v17  ;;  %v3764_v17 = vrot.slane %v7168_v10, 4 }
 0x337   :  { %4834 = vmatprep.subr.mxu1 %v4881_v0  ;;  %4825 = vmatprep.subr.mxu0 %v4881_v0 }
 0x338   :  { %4835 = vmatpush3.xpose.msra.mxu1 %v7128_v53  ;;  %4826 = vmatpush3.xpose.msra.mxu0 %v7103_v50 }
 0x339   :  { %4836 = vmatprep.subr.mxu1 %v4881_v0  ;;  %4827 = vmatprep.subr.mxu0 %v4881_v0 }
 0x33a   :  { %4840 = vmatprep.mubr.msk.f32.mxu1 %vm4882_vm2, %v4881_v0  ;;  %4831 = vmatprep.mubr.msk.f32.mxu0 %vm4882_vm2, %v4881_v0 }
 0x33c   :  { %4837 = vmatpush3.xpose.msra.mxu1 %v7144_v58  ;;  %4828 = vmatpush3.xpose.msra.mxu0 %v7116_v55 }
 0x33d   :  { %4838 = vmatprep.subr.mxu1 %v4881_v0  ;;  %4829 = vmatprep.subr.mxu0 %v4881_v0 }
 0x340   :  { %4839 = vmatpush3.xpose.msra.mxu1 %v7157_v47  ;;  %4830 = vmatpush3.xpose.msra.mxu0 %v7133_v34 }
 0x341   :  { %4852 = vmatprep.subr.mxu1 %v4881_v0  ;;  %4843 = vmatprep.subr.mxu0 %v4881_v0 }
 0x3c4   :  { %v2902_v27 = vpop.f32.mrf.mxu1 }
 0x3c6   :  { %v4734_v30 = vpop.f32.mrf.mxu1 }
 0x3cc   :  { %v2816_v16 = vpop.f32.mrf.mxu0 }
 0x3cd   :  { %v2903_v22 = vadd.f32 %v2902_v27, %v2816_v16 }
 0x3ce   :  { %v4725_v49 = vpop.f32.mrf.mxu0 }
 0x3d0   :  { %v3056_v39 = vpop.f32.mrf.mxu1 }
 0x3d2   :  { %v4752_v2 = vpop.f32.mrf.mxu1 }
 0x3d8   :  { %v2980_v20 = vpop.f32.mrf.mxu0 }
 0x3d9   :  { %v2981_v58 = vadd.f32 %v2980_v20, %v2903_v22 }
 0x3da   :  { %v4743_v12 = vpop.f32.mrf.mxu0 }
 0x3db   :  { %v3057_v28 = vadd.f32 %v3056_v39, %v2981_v58 }
 0x3dc   :  { %v3210_v63 = vpop.f32.mrf.mxu1 }
 0x3de   :  { %v4770_v53 = vpop.f32.mrf.mxu1 }
 0x3e2   :  { %v4788_v11 = vpop.f32.mrf.mxu1 }
 0x3e4   :  { %v3136_v47 = vpop.f32.mrf.mxu0  ;;  %v3395_v56 = vpop.f32.mrf.mxu1 }
 0x3e5   :  { %v3137_v38 = vadd.f32 %v3136_v47, %v3057_v28 }
 0x3e6   :  { %v4761_v48 = vpop.f32.mrf.mxu0 }
 0x3e7   :  { %v3211_v32 = vadd.f32 %v3210_v63, %v3137_v38 }
 0x3e9   :  { %3215 = vst.msk [vmem:[%s7365_s7] sm:$0x7] %vm3214_vm3, %v3211_v32 }
 0x3ea   :  { %v4779_v14 = vpop.f32.mrf.mxu0 }
 0x3eb   :  { %v3402_v35 = vadd.f32 %v4788_v11, %v4779_v14 }
 0x3ec   :  { %v3299_v21 = vpop.f32.mrf.mxu0 }
 0x3ed   :  { %v4806_v4 = vpop.f32.mrf.mxu1  ;;  %v3396_v51 = vadd.f32 %v3395_v56, %v3299_v21 }
 0x3ef   :  { %v3562_v7 = vpop.f32.mrf.mxu1 }
 0x3f0   :  { %v4797_v8 = vpop.f32.mrf.mxu0 }
 0x3f1   :  { %v3487_v1 = vadd.f32 %v4797_v8, %v3402_v35 }
 0x3f2   :  { %v3479_v62 = vpop.f32.mrf.mxu0 }
 0x3f3   :  { %v3480_v61 = vadd.f32 %v3479_v62, %v3396_v51  ;;  %v3571_v46 = vadd.f32 %v4806_v4, %v3487_v1 }
 0x3f5   :  { %v3563_v31 = vadd.f32 %v3562_v7, %v3480_v61 }
 0x3f6   :  { %v4815_v41 = vpop.f32.mrf.mxu0  ;;  %v4824_v3 = vpop.f32.mrf.mxu1 }
 0x3f7   :  { %v3657_v40 = vadd.f32 %v4815_v41, %v3571_v46 }
 0x3f8   :  { %v3650_v33 = vpop.f32.mrf.mxu0  ;;  %v3730_v13 = vpop.f32.mrf.mxu1 }
 0x3f9   :  { %v3737_v5 = vadd.f32 %v4824_v3, %v3657_v40  ;;  %v3651_v26 = vadd.f32 %v3650_v33, %v3563_v31 }
 0x3fb   :  { %v3781_v18 = vmul.f32 %v3737_v5, %v7168_v10  ;;  %v3786_v29 = vmul.f32 %v3748_v52, %v3737_v5  ;;  %v3731_v19 = vadd.f32 %v3730_v13, %v3651_v26  ;;  %v3780_v44 = vmul.f32 %v3740_v9, %v3737_v5 }
 0x3fc   :  { %v3792_v20 = vrot.slane %v3737_v5, 3 }
 0x3fd   :  { %v3783_v24 = vrot.slane %v3781_v18, 1  ;;  %v3743_v57 = vmul.f32 %v3731_v19, %v7168_v10  ;;  %v3750_v42 = vmul.f32 %v3748_v52, %v3731_v19  ;;  %v3788_v27 = vrot.slane %v3786_v29, 2 }
 0x3fe   :  { %v3766_v30 = vmul.f32 %v3764_v17, %v3731_v19  ;;  %v3773_v16 = vmul.f32 %v3771_v37, %v3731_v19  ;;  %v3742_v49 = vmul.f32 %v3740_v9, %v3731_v19  ;;  %v3763_v12 = vmul.f32 %v3761_v15, %v3731_v19 }
 0x3ff   :  { %v3785_v36 = vadd.f32 %v3783_v24, %v3780_v44  ;;  %v3745_v39 = vrot.slane %v3743_v57, 1  ;;  %v3752_v53 = vrot.slane %v3750_v42, 2  ;;  %v3756_v23 = vrot.slane %v3731_v19, 3 }
 0x400   :  { %v3768_v63 = vrot.slane %v3766_v30, 1  ;;  %v3775_v28 = vrot.slane %v3773_v16, 2 }
 0x401   :  { %v3790_v2 = vadd.f32 %v3788_v27, %v3785_v36  ;;  %v3747_v22 = vadd.f32 %v3745_v39, %v3742_v49 }
 0x402   :  { %v3770_v58 = vadd.f32 %v3768_v63, %v3763_v12 }
 0x403   :  { %v3794_v59 = vadd.f32 %v3792_v20, %v3790_v2  ;;  %v3754_v47 = vadd.f32 %v3752_v53, %v3747_v22 }
 0x404   :  { %v3777_v10 = vadd.f32 %v3775_v28, %v3770_v58 }
 0x405   :  { %4343 = vst [vmem:[%s7364_s6 + $0x6] sm:$0x1] %v3794_v59  ;;  %v3758_v38 = vadd.f32 %v3756_v23, %v3754_v47 }
 0x406   :  { %v3778_v48 = vadd.f32 %v3777_v10, %v3756_v23 }
 0x407   :  { %4341 = vst [vmem:[%s7364_s6 + $0x4] sm:$0x1] %v3758_v38 }
 0x408   :  { %4342 = vst [vmem:[%s7364_s6 + $0x1] sm:$0x10] %v3778_v48 }
 0x40f   :  { %v4344_v32 = vld [vmem:[%s7364_s6 + $0x4] sm:$0x7] }
 0x410   :  { %v3865_v11 = vand.u32 4294901760, %v4344_v32 }
 0x412   :  { %v3866_v14 = vsub.f32 %v4344_v32, %v3865_v11  ;;  %4841 = vmatmul.mubr.f32.vlgmr.msra.gmra.mxu1 %v3865_v11 }
 0x413   :  { %4853 = vmatpush3.xpose.msra.mxu1 %v7103_v50  ;;  %4858 = vmatprep.mubr.msk.f32.mxu1 %vm4882_vm2, %v4881_v0 }
 0x414   :  { %4854 = vmatprep.subr.mxu1 %v4881_v0  ;;  %v3867_v56 = vand.u32 4294901760, %v3866_v14 }
 0x416   :  { %v3868_v21 = vsub.f32 %v3866_v14, %v3867_v56 }
 0x417   :  { %4855 = vmatpush3.xpose.msra.mxu1 %v7116_v55 }
 0x418   :  { %4856 = vmatprep.subr.mxu1 %v4881_v0  ;;  %v3869_v35 = vand.u32 4294901760, %v3868_v21 }
 0x41a   :  { %4832 = vmatmul.mubr.f32.vlgmr.msra.gmra.mxu0 %v3869_v35 }
 0x41b   :  { %4844 = vmatpush3.xpose.msra.mxu0 %v7106_v54  ;;  %4857 = vmatpush3.xpose.msra.mxu1 %v7133_v34 }
 0x41c   :  { %4845 = vmatprep.subr.mxu0 %v4881_v0  ;;  %4870 = vmatprep.subr.mxu1 %v4881_v0 }
 0x41d   :  { %4849 = vmatprep.mubr.msk.f32.mxu0 %vm4882_vm2, %v4881_v0 }
 0x41e   :  { %4859 = vmatmul.mubr.f32.vlgmr.msra.gmra.mxu1 %v3867_v56 }
 0x41f   :  { %4846 = vmatpush3.xpose.msra.mxu0 %v7121_v6  ;;  %4871 = vmatpush3.xpose.msra.mxu1 %v7103_v50 }
 0x420   :  { %4847 = vmatprep.subr.mxu0 %v4881_v0  ;;  %4872 = vmatprep.subr.mxu1 %v4881_v0 }
 0x421   :  { %4876 = vmatprep.mubr.msk.f32.mxu1 %vm4882_vm2, %v4881_v0 }
 0x423   :  { %4848 = vmatpush3.xpose.msra.mxu0 %v7139_v60  ;;  %4873 = vmatpush3.xpose.msra.mxu1 %v7116_v55 }
 0x424   :  { %4861 = vmatprep.subr.mxu0 %v4881_v0  ;;  %4874 = vmatprep.subr.mxu1 %v4881_v0 }
 0x426   :  { %4850 = vmatmul.mubr.f32.vlgmr.msra.gmra.mxu0 %v3866_v14 }
 0x427   :  { %4862 = vmatpush3.xpose.msra.mxu0 %v7114_v25  ;;  %4875 = vmatpush3.xpose.msra.mxu1 %v7133_v34 }
 0x428   :  { %4863 = vmatprep.subr.mxu0 %v4881_v0  ;;  %4867 = vmatprep.mubr.msk.f32.mxu0 %vm4882_vm2, %v4881_v0 }
 0x42a   :  { %4877 = vmatmul.mubr.f32.vlgmr.msra.gmra.mxu1 %v3865_v11 }
 0x42b   :  { %4864 = vmatpush3.xpose.msra.mxu0 %v7131_v45 }
 0x42c   :  { %4865 = vmatprep.subr.mxu0 %v4881_v0 }
 0x42f   :  { %4866 = vmatpush3.xpose.msra.mxu0 %v7147_v43 }
 0x432   :  { %4868 = vmatmul.mubr.f32.vlgmr.msra.gmra.mxu0 %v3865_v11 }
 0x4d2   :  { %v3957_v50 = vpop.f32.mrf.mxu1 }
 0x4d4   :  { %v4842_v54 = vpop.f32.mrf.mxu1 }
 0x4da   :  { %v3871_v55 = vpop.f32.mrf.mxu0 }
 0x4db   :  { %v3958_v51 = vadd.f32 %v3957_v50, %v3871_v55 }
 0x4dc   :  { %v4833_v6 = vpop.f32.mrf.mxu0 }
 0x4de   :  { %v4111_v25 = vpop.f32.mrf.mxu1 }
 0x4e0   :  { %v4860_v60 = vpop.f32.mrf.mxu1 }
 0x4e6   :  { %v4035_v34 = vpop.f32.mrf.mxu0 }
 0x4e7   :  { %v4036_v62 = vadd.f32 %v4035_v34, %v3958_v51 }
 0x4e8   :  { %v4851_v4 = vpop.f32.mrf.mxu0 }
 0x4e9   :  { %v4112_v61 = vadd.f32 %v4111_v25, %v4036_v62 }
 0x4ea   :  { %v4265_v8 = vpop.f32.mrf.mxu1 }
 0x4ec   :  { %v4878_v1 = vpop.f32.mrf.mxu1 }
 0x4f2   :  { %v4191_v7 = vpop.f32.mrf.mxu0 }
 0x4f3   :  { %v4192_v45 = vadd.f32 %v4191_v7, %v4112_v61 }
 0x4f4   :  { %v4869_v46 = vpop.f32.mrf.mxu0 }
 0x4f5   :  { %v4266_v0 = vadd.f32 %v4265_v8, %v4192_v45 }
 0x4f7   :  { %4345 = vst.msk [vmem:[%s7365_s7 + $0x4] sm:$0x7] %vm3214_vm3, %v4266_v0 }

</bundles_post_ra>
